<compile_context>
chip_gen: v5e
topology: v5e:2x2
jax: 0.10.0
libtpu: 0.0.40
codegen_flags: <defaults>
</compile_context>

<pallas_src>
import functools

import numpy as np
import jax
import jax.numpy as jnp
from jax.experimental import pallas as pl
from jax.experimental.pallas import tpu as pltpu

# ----------------------------- configuration -------------------------------
IMG_IN = (16, 16)
IMG_OUT = (8, 8)
PATCH = (4, 4)
IN_CHANS = 3
OUT_CHANS = 2
EMBED_BASE = 8
NUM_HEADS = 4
EMBED = EMBED_BASE * NUM_HEADS          # Network.__init__ does embed_dim *= num_heads -> 32
DEPTH = 2
MLP_RATIO = 4.0
HIDDEN = int(EMBED * MLP_RATIO)         # 128
GPSA_INTERVAL = (1, 1)                  # block 0 -> GPSA, block 1 -> MHSA
LOCALITY_STRENGTH = 1.0
HEAD_DIM = EMBED // NUM_HEADS
SCALE = HEAD_DIM ** (-0.5)
LN_EPS = 1e-5
DTYPE = jnp.float32

BLOCK_USE_GPSA = tuple(
    (i >= GPSA_INTERVAL[0] - 1) and (i < GPSA_INTERVAL[1]) for i in range(DEPTH)
)

# ------------------------- static slab / layout constants --------------------
LANE = 128                                   # lane-dense width for I/O and slabs
VEC = 8                                      # sublane-aligned row-group for vectors
GRID_HP = IMG_IN[0] // PATCH[0]
GRID_WP = IMG_IN[1] // PATCH[1]
N_TOK = GRID_HP * GRID_WP                    # 16 tokens
KP = IN_CHANS * PATCH[0] * PATCH[1]          # 48
OUTP = OUT_CHANS * PATCH[0] * PATCH[1]       # 32

assert KP + N_TOK + 1 <= LANE                # augmented patch-embed fits in 128 lanes
assert 3 * EMBED <= LANE and HIDDEN <= LANE and OUTP <= LANE

# slab32 (lane width = EMBED): augmented patch-embed W, per-block [vec8|proj_w|fc2_w], tail vec8
S32_BLK_ROWS = VEC + EMBED + LANE            # 8 + 32 + 128 = 168
S32_BLK0 = LANE                              # augmented patch-embed occupies rows [0, 128)
S32_TAIL = S32_BLK0 + DEPTH * S32_BLK_ROWS
S32_ROWS = S32_TAIL + VEC                    # 472

# slab128 (lane width = 128): per-block [qkv_w|fc1_w|fc1_b-group], tail [convT_w|convT_b-group]
S128_BLK_ROWS = 2 * EMBED + VEC              # 72
S128_TAIL = DEPTH * S128_BLK_ROWS
S128_ROWS = S128_TAIL + EMBED + VEC          # 184


# --------------------------- in-kernel math helpers --------------------------
def _ln(x, w, b):
    """LayerNorm over the last dim (f32), matching torch.nn.LayerNorm."""
    mu = jnp.mean(x, axis=-1, keepdims=True)
    var = jnp.mean(jnp.square(x - mu), axis=-1, keepdims=True)
    return (x - mu) * jax.lax.rsqrt(var + LN_EPS) * w + b


def _softmax_last(x):
    m = jnp.max(x, axis=-1, keepdims=True)
    e = jnp.exp(x - m)
    return e / jnp.sum(e, axis=-1, keepdims=True)


def _erf(x):
    # Abramowitz & Stegun 7.1.26 polynomial, |abs err| < 1.5e-7 (f32 accurate).
    # TODO(synk): switch to lax.erf once its Mosaic lowering is guaranteed.
    p = 0.3275911
    a1, a2, a3, a4, a5 = (0.254829592, -0.284496736, 1.421413741,
                          -1.453152027, 1.061405429)
    sgn = jnp.where(x >= 0.0, 1.0, -1.0)
    z = jnp.abs(x)
    t = 1.0 / (1.0 + p * z)
    poly = ((((a5 * t + a4) * t + a3) * t + a2) * t + a1) * t
    return sgn * (1.0 - poly * jnp.exp(-z * z))


def _gelu_exact(x):
    return 0.5 * x * (1.0 + _erf(x * 0.7071067811865476))


# ------------------------------ fused network kernel -------------------------
def _network_kernel(patches_ref, bias_ref, s32_ref, s128_ref, *rest, use_gpsa):
    """Single invocation: all B*N tokens of the whole network, VMEM resident."""
    o_ref = rest[-1]
    extras = rest[:-1]            # (pos_bd_ref, gate_ref) per GPSA block, in order

    # patch embed: one (BN,128)@(128,C) matmul; the augmented columns/rows also
    # add the interpolated pos-embed and the conv bias.
    xin = patches_ref[...].astype(jnp.float32)                 # (BN, 128)
    w_pe = s32_ref[0:LANE, :].astype(jnp.float32)              # (128, C)
    x = jnp.dot(xin, w_pe, preferred_element_type=jnp.float32)  # (BN, C)

    # block-diagonal additive bias: 0 within a batch element, -1e30 across.
    bias = bias_ref[...].astype(jnp.float32)                   # (BN, BN)

    ei = 0
    for bi, gpsa in enumerate(use_gpsa):
        r32 = S32_BLK0 + bi * S32_BLK_ROWS
        vec = s32_ref[r32:r32 + VEC, :].astype(jnp.float32)     # (8, C)
        n1w, n1b = vec[0:1, :], vec[1:2, :]
        n2w, n2b = vec[2:3, :], vec[3:4, :]
        proj_b, fc2_b = vec[4:5, :], vec[5:6, :]
        proj_w = s32_ref[r32 + VEC:r32 + VEC + EMBED, :].astype(jnp.float32)          # (C, C)
        fc2_w = s32_ref[r32 + VEC + EMBED:r32 + VEC + EMBED + LANE, :].astype(jnp.float32)  # (128, C)

        r128 = bi * S128_BLK_ROWS
        qkv_w = s128_ref[r128:r128 + EMBED, :].astype(jnp.float32)                    # (C, 128)
        fc1_w = s128_ref[r128 + EMBED:r128 + 2 * EMBED, :].astype(jnp.float32)        # (C, 128)
        fc1g = s128_ref[r128 + 2 * EMBED:r128 + 2 * EMBED + VEC, :].astype(jnp.float32)
        fc1_b = fc1g[0:1, :]                                                          # (1, 128)

        if gpsa:
            pos_bd_ref = extras[ei]          # (H, BN, BN) block-diag pos softmax
            gate_ref = extras[ei + 1]        # (H,) sigmoid(gating) in SMEM
            ei += 2

        # ---------------- attention (fused qkv, masked block-diag) ------------
        h = _ln(x, n1w, n1b)
        qkv = jnp.dot(h, qkv_w, preferred_element_type=jnp.float32)   # (BN, 128) [q|k|v|0]
        attn_out = jnp.zeros_like(x)
        for hh in range(NUM_HEADS):
            lo = hh * HEAD_DIM
            qh = qkv[:, lo:lo + HEAD_DIM]                              # (BN, D)
            kh = qkv[:, EMBED + lo:EMBED + lo + HEAD_DIM]              # (BN, D)
            vh = qkv[:, 2 * EMBED + lo:2 * EMBED + lo + HEAD_DIM]      # (BN, D)
            s = jax.lax.dot_general(qh, kh, (((1,), (1,)), ((), ())),
                                    preferred_element_type=jnp.float32) * SCALE
            a = _softmax_last(s + bias)                                # off-block -> exactly 0
            if gpsa:
                g = gate_ref[hh]                                       # SMEM scalar
                a = (1.0 - g) * a + g * pos_bd_ref[hh].astype(jnp.float32)
                a = a / jnp.sum(a, axis=-1, keepdims=True)             # GPSA renorm
            oh = jnp.dot(a, vh, preferred_element_type=jnp.float32)    # (BN, D)
            # Fold this head straight into the output projection; the row
            # slice of proj_w is sublane-aligned so no lane concatenate needed.
            attn_out = attn_out + jnp.dot(oh, proj_w[lo:lo + HEAD_DIM, :],
                                          preferred_element_type=jnp.float32)
        x = x + attn_out + proj_b

        # ------------------------------- MLP ---------------------------------
        h2 = _ln(x, n2w, n2b)
        m = jnp.dot(h2, fc1_w, preferred_element_type=jnp.float32) + fc1_b
        m = _gelu_exact(m)
        x = x + jnp.dot(m, fc2_w, preferred_element_type=jnp.float32) + fc2_b

    # final norm -> patch-expansion norm -> ConvTranspose2d as per-token linear
    tvec = s32_ref[S32_TAIL:S32_TAIL + VEC, :].astype(jnp.float32)
    nw, nb = tvec[0:1, :], tvec[1:2, :]
    pew, peb = tvec[2:3, :], tvec[3:4, :]
    convT_w = s128_ref[S128_TAIL:S128_TAIL + EMBED, :].astype(jnp.float32)     # (C, 128)
    ctg = s128_ref[S128_TAIL + EMBED:S128_TAIL + EMBED + VEC, :].astype(jnp.float32)
    convT_b = ctg[0:1, :]                                                      # (1, 128)

    x = _ln(_ln(x, nw, nb), pew, peb)
    y = jnp.dot(x, convT_w, preferred_element_type=jnp.float32) + convT_b      # (BN, 128)
    o_ref[...] = y.astype(o_ref.dtype)                                         # dense vst


# ------------------------------- plain-JAX glue ------------------------------
def _resize_1d_coords(in_size, out_size, align_corners):
    if align_corners:
        if out_size == 1:
            src = jnp.zeros((1,), jnp.float32)
        else:
            src = jnp.arange(out_size, dtype=jnp.float32) * ((in_size - 1) / (out_size - 1))
    else:
        scale = in_size / out_size
        src = (jnp.arange(out_size, dtype=jnp.float32) + 0.5) * scale - 0.5
        src = jnp.clip(src, 0.0, float(in_size - 1))
    i0 = jnp.clip(jnp.floor(src).astype(jnp.int32), 0, in_size - 1)
    i1 = jnp.minimum(i0 + 1, in_size - 1)
    frac = src - i0.astype(jnp.float32)
    return i0, i1, frac


def bilinear_resize_nchw(x, out_h, out_w, align_corners):
    """Matches torch F.interpolate(..., mode='bilinear')."""
    y0, y1, fy = _resize_1d_coords(x.shape[2], out_h, align_corners)
    x0, x1, fx = _resize_1d_coords(x.shape[3], out_w, align_corners)
    top = (x[:, :, y0, :] * (1.0 - fy)[None, None, :, None]
           + x[:, :, y1, :] * fy[None, None, :, None])
    return top[:, :, :, x0] * (1.0 - fx) + top[:, :, :, x1] * fx


def get_rel_indices(H, W):
    """(N, N, 3) relative indices [dx, dy, d^2], N = H*W (matches GPSA)."""
    aw = jnp.arange(W)
    indx = aw[None, :] - aw[:, None]
    indx = jnp.tile(indx, (H, H))
    ah = jnp.arange(H)
    indy = ah[None, :] - ah[:, None]
    indy = jnp.repeat(jnp.repeat(indy, W, axis=0), W, axis=1)
    indd = indx ** 2 + indy ** 2
    return jnp.stack([indx, indy, indd], axis=-1).astype(DTYPE)


# ------------------------ one-time parameter preparation ----------------------
def prepare_params(params, batch):
    """Param-only (and batch-size-only) precompute, done ONCE per model/batch."""
    Hp, Wp, N = GRID_HP, GRID_WP, N_TOK
    BN = batch * N

    # Augmented patch-embed weight: rows [0,KP)=conv W, [KP,KP+N)=pos-embed rows,
    # [KP+N]=conv bias, rest zero.  The matching one-hot/ones columns live in
    # the per-call augmented patch input.
    w_pe = params['patch_embed_w'].reshape(EMBED, KP).T                 # (KP, C)
    pos = bilinear_resize_nchw(params['pos_embed'], Hp, Wp, align_corners=False)
    pos_tok = pos.transpose(0, 2, 3, 1).reshape(N, EMBED)               # (N, C)
    w_pe_aug = jnp.zeros((LANE, EMBED), DTYPE)
    w_pe_aug = w_pe_aug.at[:KP].set(w_pe)
    w_pe_aug = w_pe_aug.at[KP:KP + N].set(pos_tok)
    w_pe_aug = w_pe_aug.at[KP + N].set(params['patch_embed_b'])

    rel = get_rel_indices(Hp, Wp)

    # batch block-diagonal mask / additive bias
    mask = jnp.repeat(jnp.repeat(jnp.eye(batch, dtype=DTYPE), N, axis=0), N, axis=1)
    attn_bias = (mask - 1.0) * 1e30                                     # (BN, BN)

    s32_parts = [w_pe_aug]
    s128_parts = []
    gpsa_extras = []
    for bi, blk in enumerate(params['blocks']):
        gpsa = BLOCK_USE_GPSA[bi]
        vec = jnp.zeros((VEC, EMBED), DTYPE)
        vec = vec.at[0].set(blk['norm1_w']).at[1].set(blk['norm1_b'])
        vec = vec.at[2].set(blk['norm2_w']).at[3].set(blk['norm2_b'])
        vec = vec.at[4].set(blk['proj_b']).at[5].set(blk['fc2_b'])
        fc2_pad = jnp.zeros((LANE, EMBED), DTYPE).at[:HIDDEN].set(blk['fc2_w'])
        s32_parts += [vec, blk['proj_w'], fc2_pad]

        if gpsa:
            # fuse q/k/v into one (C, 3C) matmul (qkv_bias=False -> no bias)
            qkv_w = jnp.concatenate([blk['q_w'], blk['k_w'], blk['v_w']], axis=1)
            # positional softmax + gating sigmoid are forward-pass constants
            pos_logits = rel.reshape(N * N, 3) @ blk['pos_proj_w'] + blk['pos_proj_b']
            pos_soft = jax.nn.softmax(
                pos_logits.reshape(N, N, NUM_HEADS).transpose(2, 0, 1), axis=-1)  # (H,N,N)
            pos_bd = mask[None] * jnp.tile(pos_soft.astype(DTYPE), (1, batch, batch))
            gates = jax.nn.sigmoid(blk['gating']).astype(DTYPE)                   # (H,)
            gpsa_extras.append((pos_bd, gates))
        else:
            qkv_w = blk['qkv_w']
        qkv_pad = jnp.zeros((EMBED, LANE), DTYPE).at[:, :3 * EMBED].set(qkv_w)
        fc1_pad = jnp.zeros((EMBED, LANE), DTYPE).at[:, :HIDDEN].set(blk['fc1_w'])
        fc1b_pad = jnp.zeros((VEC, LANE), DTYPE).at[0, :HIDDEN].set(blk['fc1_b'])
        s128_parts += [qkv_pad, fc1_pad, fc1b_pad]

    tvec = jnp.zeros((VEC, EMBED), DTYPE)
    tvec = tvec.at[0].set(params['norm_w']).at[1].set(params['norm_b'])
    tvec = tvec.at[2].set(params['pe_norm_w']).at[3].set(params['pe_norm_b'])
    s32_parts.append(tvec)
    convT_pad = jnp.zeros((EMBED, LANE), DTYPE).at[:, :OUTP].set(
        params['convT_w'].reshape(EMBED, OUTP))
    convTb_pad = jnp.zeros((VEC, LANE), DTYPE).at[0, :OUTP].set(
        jnp.repeat(params['convT_b'], PATCH[0] * PATCH[1]))
    s128_parts += [convT_pad, convTb_pad]

    slab32 = jnp.concatenate(s32_parts, axis=0)
    slab128 = jnp.concatenate(s128_parts, axis=0)
    assert slab32.shape == (S32_ROWS, EMBED), slab32.shape
    assert slab128.shape == (S128_ROWS, LANE), slab128.shape

    # per-token augmentation columns (one-hot for pos rows, ones for bias row)
    base_aug = jnp.zeros((N, LANE - KP), DTYPE)
    base_aug = base_aug.at[:, :N].set(jnp.eye(N, dtype=DTYPE))
    base_aug = base_aug.at[:, N].set(1.0)
    aug = jnp.tile(base_aug, (batch, 1))                                 # (BN, 80)

    return {'slab32': slab32, 'slab128': slab128, 'aug': aug,
            'attn_bias': attn_bias, 'gpsa': tuple(gpsa_extras)}


# -------------------------------- model forward ------------------------------
@jax.jit
def network_forward(prepared, x, underground_data=None):
    # x: (B, IN_CHANS, H, W) NCHW; underground_data unused (signature parity)
    del underground_data
    B, Cin, H, W = x.shape
    ph, pw = PATCH
    Hp, Wp = H // ph, W // pw
    N = Hp * Wp
    BN = B * N
    assert (H, W) == IMG_IN and Cin == IN_CHANS
    assert prepared['aug'].shape[0] == BN, "prepare_params() was built for a different batch"

    # ---- host-side layout glue (no heavy compute) ----
    patches = (x.astype(DTYPE)
                 .reshape(B, Cin, Hp, ph, Wp, pw)
                 .transpose(0, 2, 4, 1, 3, 5)
                 .reshape(BN, KP))                                       # row = b*N + h*Wp + w
    patches_aug = jnp.concatenate([patches, prepared['aug']], axis=1)    # (BN, 128) lane-dense

    inputs = [patches_aug, prepared['attn_bias'], prepared['slab32'], prepared['slab128']]
    vmem = pl.BlockSpec(memory_space=pltpu.MemorySpace.VMEM)
    smem = pl.BlockSpec(memory_space=pltpu.MemorySpace.SMEM)
    in_specs = [vmem, vmem, vmem, vmem]
    gi = 0
    for bi in range(DEPTH):
        if BLOCK_USE_GPSA[bi]:
            pos_bd, gates = prepared['gpsa'][gi]
            gi += 1
            inputs += [pos_bd, gates]
            in_specs += [vmem, smem]

    # ---- single fused kernel, no grid: one invocation for the whole batch ----
    y = pl.pallas_call(
        functools.partial(_network_kernel, use_gpsa=BLOCK_USE_GPSA),
        out_shape=jax.ShapeDtypeStruct((BN, LANE), DTYPE),
        in_specs=in_specs,
        out_specs=pl.BlockSpec(memory_space=pltpu.MemorySpace.VMEM),
        cost_estimate=pl.CostEstimate(flops=3_000_000, transcendentals=20_000,
                                      bytes_accessed=250_000),
    )(*inputs)

    # ---- patch expansion (ConvTranspose2d k=stride=patch already applied) ----
    y = y[:, :OUTP]
    y = (y.reshape(B, Hp, Wp, OUT_CHANS, ph, pw)
           .transpose(0, 3, 1, 4, 2, 5)
           .reshape(B, OUT_CHANS, Hp * ph, Wp * pw))

    # ---- downsample: bilinear, align_corners=True ----
    return bilinear_resize_nchw(y, IMG_OUT[0], IMG_OUT[1], align_corners=True)


# ------------------------------ parameter init -------------------------------
def trunc_normal(key, shape, std=0.02):
    return (std * jax.random.truncated_normal(key, -2.0, 2.0, shape)).astype(DTYPE)


def init_params(key):
    keys = iter(jax.random.split(key, 64))
    params = {
        'patch_embed_w': trunc_normal(next(keys), (EMBED, IN_CHANS, PATCH[0], PATCH[1])),
        'patch_embed_b': jnp.zeros((EMBED,), DTYPE),
        'pos_embed': trunc_normal(next(keys),
                                  (1, EMBED, IMG_IN[0] // PATCH[0], IMG_IN[1] // PATCH[1])),
        'norm_w': jnp.ones((EMBED,), DTYPE), 'norm_b': jnp.zeros((EMBED,), DTYPE),
        'pe_norm_w': jnp.ones((EMBED,), DTYPE), 'pe_norm_b': jnp.zeros((EMBED,), DTYPE),
        'convT_w': trunc_normal(next(keys), (EMBED, OUT_CHANS, PATCH[0], PATCH[1])),
        'convT_b': jnp.zeros((OUT_CHANS,), DTYPE),
    }
    blocks = []
    for i in range(DEPTH):
        blk = {
            'norm1_w': jnp.ones((EMBED,), DTYPE), 'norm1_b': jnp.zeros((EMBED,), DTYPE),
            'norm2_w': jnp.ones((EMBED,), DTYPE), 'norm2_b': jnp.zeros((EMBED,), DTYPE),
            'proj_w': trunc_normal(next(keys), (EMBED, EMBED)),
            'proj_b': jnp.zeros((EMBED,), DTYPE),
            'fc1_w': trunc_normal(next(keys), (EMBED, HIDDEN)),
            'fc1_b': jnp.zeros((HIDDEN,), DTYPE),
            'fc2_w': trunc_normal(next(keys), (HIDDEN, EMBED)),
            'fc2_b': jnp.zeros((EMBED,), DTYPE),
        }
        if BLOCK_USE_GPSA[i]:
            blk['q_w'] = trunc_normal(next(keys), (EMBED, EMBED))
            blk['k_w'] = trunc_normal(next(keys), (EMBED, EMBED))
            blk['v_w'] = jnp.eye(EMBED, dtype=DTYPE)               # GPSA.local_init: v = I
            # GPSA.local_init for pos_proj (torch layout (num_heads, 3), stored as (3, num_heads))
            ks = int(NUM_HEADS ** 0.5)
            center = (ks - 1) / 2 if ks % 2 == 0 else ks // 2
            wp = np.zeros((NUM_HEADS, 3), np.float32)
            for h1 in range(ks):
                for h2 in range(ks):
                    position = h1 + ks * h2
                    wp[position, 2] = -1.0
                    wp[position, 1] = 2.0 * (h1 - center)
                    wp[position, 0] = 2.0 * (h2 - center)
            wp *= LOCALITY_STRENGTH
            blk['pos_proj_w'] = jnp.asarray(wp.T, DTYPE)
            blk['pos_proj_b'] = jnp.zeros((NUM_HEADS,), DTYPE)
            blk['gating'] = jnp.ones((NUM_HEADS,), DTYPE)          # gating_param init = 1
        else:
            blk['qkv_w'] = trunc_normal(next(keys), (EMBED, 3 * EMBED))
        blocks.append(blk)
    params['blocks'] = blocks
    return params


# ----------------------------------- main ------------------------------------
if __name__ == "__main__":
    key = jax.random.PRNGKey(0)
    pkey, xkey = jax.random.split(key)
    params = init_params(pkey)
    x = jax.random.normal(xkey, (2, IN_CHANS, IMG_IN[0], IMG_IN[1]), dtype=DTYPE)
    underground_data = jnp.zeros((2, 1), DTYPE)   # unused, kept for signature parity

    prepared = prepare_params(params, batch=x.shape[0])   # one-time, param-only precompute
    out = network_forward(prepared, x, underground_data)
    out = jax.block_until_ready(out)
    assert out.shape == (2, OUT_CHANS, IMG_OUT[0], IMG_OUT[1]), out.shape
    assert bool(jnp.all(jnp.isfinite(out)))
    print("KERNEL_OK")
</pallas_src>

<mosaic_0001>
module attributes {stable_mosaic.version = 11 : i64} {
  func.func @_network_kernel(%arg0: memref<32x128xf32, #tpu.memory_space<vmem>>, %arg1: memref<32x32xf32, #tpu.memory_space<vmem>>, %arg2: memref<472x32xf32, #tpu.memory_space<vmem>>, %arg3: memref<184x128xf32, #tpu.memory_space<vmem>>, %arg4: memref<4x32x32xf32, #tpu.memory_space<vmem>>, %arg5: memref<4xf32, #tpu.memory_space<smem>>, %arg6: memref<32x128xf32, #tpu.memory_space<vmem>>) attributes {dimension_semantics = [], scalar_prefetch = 0 : i64, scratch_operands = 0 : i64, tpu.core_type = #tpu.core_type<tc>} {
    %c0 = arith.constant 0 : index
    %c0_0 = arith.constant 0 : index
    %0 = vector.load %arg0[%c0, %c0_0] : memref<32x128xf32, #tpu.memory_space<vmem>>, vector<32x128xf32>
    %c0_1 = arith.constant 0 : index
    %c0_2 = arith.constant 0 : index
    %1 = vector.load %arg2[%c0_1, %c0_2] : memref<472x32xf32, #tpu.memory_space<vmem>>, vector<128x32xf32>
    %cst = arith.constant dense<0.000000e+00> : vector<32x32xf32>
    %2 = tpu.matmul %0, %1, %cst {dimension_numbers = #tpu.dot_dimension_numbers<[1], [0], [0], [1], [0, 0, 1, 1], [], []>} : vector<32x128xf32>, vector<128x32xf32>, vector<32x32xf32> -> vector<32x32xf32>
    %c0_3 = arith.constant 0 : index
    %c0_4 = arith.constant 0 : index
    %3 = vector.load %arg1[%c0_3, %c0_4] : memref<32x32xf32, #tpu.memory_space<vmem>>, vector<32x32xf32>
    %c128 = arith.constant 128 : index
    %c0_5 = arith.constant 0 : index
    %4 = vector.load %arg2[%c128, %c0_5] : memref<472x32xf32, #tpu.memory_space<vmem>>, vector<8x32xf32>
    %5 = vector.extract_strided_slice %4 {offsets = [0, 0], sizes = [1, 32], strides = [1, 1]} : vector<8x32xf32> to vector<1x32xf32>
    %6 = vector.extract_strided_slice %4 {offsets = [1, 0], sizes = [1, 32], strides = [1, 1]} : vector<8x32xf32> to vector<1x32xf32>
    %7 = vector.extract_strided_slice %4 {offsets = [2, 0], sizes = [1, 32], strides = [1, 1]} : vector<8x32xf32> to vector<1x32xf32>
    %8 = vector.extract_strided_slice %4 {offsets = [3, 0], sizes = [1, 32], strides = [1, 1]} : vector<8x32xf32> to vector<1x32xf32>
    %9 = vector.extract_strided_slice %4 {offsets = [4, 0], sizes = [1, 32], strides = [1, 1]} : vector<8x32xf32> to vector<1x32xf32>
    %10 = vector.extract_strided_slice %4 {offsets = [5, 0], sizes = [1, 32], strides = [1, 1]} : vector<8x32xf32> to vector<1x32xf32>
    %c136 = arith.constant 136 : index
    %c0_6 = arith.constant 0 : index
    %11 = vector.load %arg2[%c136, %c0_6] : memref<472x32xf32, #tpu.memory_space<vmem>>, vector<32x32xf32>
    %c168 = arith.constant 168 : index
    %c0_7 = arith.constant 0 : index
    %12 = vector.load %arg2[%c168, %c0_7] : memref<472x32xf32, #tpu.memory_space<vmem>>, vector<128x32xf32>
    %c0_8 = arith.constant 0 : index
    %c0_9 = arith.constant 0 : index
    %13 = vector.load %arg3[%c0_8, %c0_9] : memref<184x128xf32, #tpu.memory_space<vmem>>, vector<32x128xf32>
    %c32 = arith.constant 32 : index
    %c0_10 = arith.constant 0 : index
    %14 = vector.load %arg3[%c32, %c0_10] : memref<184x128xf32, #tpu.memory_space<vmem>>, vector<32x128xf32>
    %c64 = arith.constant 64 : index
    %c0_11 = arith.constant 0 : index
    %15 = vector.load %arg3[%c64, %c0_11] : memref<184x128xf32, #tpu.memory_space<vmem>>, vector<8x128xf32>
    %16 = vector.extract_strided_slice %15 {offsets = [0, 0], sizes = [1, 128], strides = [1, 1]} : vector<8x128xf32> to vector<1x128xf32>
    %cst_12 = arith.constant dense<0.000000e+00> : vector<32xf32>
    %17 = vector.multi_reduction <add>, %2, %cst_12 [1] : vector<32x32xf32> to vector<32xf32>
    %18 = vector.shape_cast %17 : vector<32xf32> to vector<32x1xf32>
    %cst_13 = arith.constant 3.200000e+01 : f32
    %19 = vector.broadcast %cst_13 : f32 to vector<32x1xf32>
    %20 = arith.divf %18, %19 : vector<32x1xf32>
    %21 = vector.broadcast %20 : vector<32x1xf32> to vector<32x32xf32>
    %22 = arith.subf %2, %21 : vector<32x32xf32>
    %23 = arith.mulf %22, %22 : vector<32x32xf32>
    %cst_14 = arith.constant dense<0.000000e+00> : vector<32xf32>
    %24 = vector.multi_reduction <add>, %23, %cst_14 [1] : vector<32x32xf32> to vector<32xf32>
    %25 = vector.shape_cast %24 : vector<32xf32> to vector<32x1xf32>
    %cst_15 = arith.constant 3.200000e+01 : f32
    %26 = vector.broadcast %cst_15 : f32 to vector<32x1xf32>
    %27 = arith.divf %25, %26 : vector<32x1xf32>
    %28 = vector.broadcast %20 : vector<32x1xf32> to vector<32x32xf32>
    %29 = arith.subf %2, %28 : vector<32x32xf32>
    %cst_16 = arith.constant 9.99999974E-6 : f32
    %30 = vector.broadcast %cst_16 : f32 to vector<32x1xf32>
    %31 = arith.addf %27, %30 : vector<32x1xf32>
    %32 = math.rsqrt %31 : vector<32x1xf32>
    %33 = vector.broadcast %32 : vector<32x1xf32> to vector<32x32xf32>
    %34 = arith.mulf %29, %33 : vector<32x32xf32>
    %35 = vector.broadcast %5 : vector<1x32xf32> to vector<32x32xf32>
    %36 = arith.mulf %34, %35 : vector<32x32xf32>
    %37 = vector.broadcast %6 : vector<1x32xf32> to vector<32x32xf32>
    %38 = arith.addf %36, %37 : vector<32x32xf32>
    %cst_17 = arith.constant dense<0.000000e+00> : vector<32x128xf32>
    %39 = tpu.matmul %38, %13, %cst_17 {dimension_numbers = #tpu.dot_dimension_numbers<[1], [0], [0], [1], [0, 0, 1, 1], [], []>} : vector<32x32xf32>, vector<32x128xf32>, vector<32x128xf32> -> vector<32x128xf32>
    %cst_18 = arith.constant 0.000000e+00 : f32
    %40 = vector.broadcast %cst_18 : f32 to vector<32x32xf32>
    %41 = vector.extract_strided_slice %39 {offsets = [0, 0], sizes = [32, 8], strides = [1, 1]} : vector<32x128xf32> to vector<32x8xf32>
    %42 = vector.extract_strided_slice %39 {offsets = [0, 32], sizes = [32, 8], strides = [1, 1]} : vector<32x128xf32> to vector<32x8xf32>
    %43 = vector.extract_strided_slice %39 {offsets = [0, 64], sizes = [32, 8], strides = [1, 1]} : vector<32x128xf32> to vector<32x8xf32>
    %cst_19 = arith.constant dense<0.000000e+00> : vector<32x32xf32>
    %44 = tpu.matmul %41, %42, %cst_19 {dimension_numbers = #tpu.dot_dimension_numbers<[1], [1], [0], [0], [0, 0, 1, 0], [], []>} : vector<32x8xf32>, vector<32x8xf32>, vector<32x32xf32> -> vector<32x32xf32>
    %cst_20 = arith.constant 0.353553385 : f32
    %45 = vector.broadcast %cst_20 : f32 to vector<32x32xf32>
    %46 = arith.mulf %44, %45 : vector<32x32xf32>
    %47 = arith.addf %46, %3 : vector<32x32xf32>
    %cst_21 = arith.constant dense<0xFF800000> : vector<32xf32>
    %48 = vector.multi_reduction <maximumf>, %47, %cst_21 [1] : vector<32x32xf32> to vector<32xf32>
    %49 = vector.shape_cast %48 : vector<32xf32> to vector<32x1xf32>
    %50 = vector.broadcast %49 : vector<32x1xf32> to vector<32x32xf32>
    %51 = arith.subf %47, %50 : vector<32x32xf32>
    %52 = math.exp %51 : vector<32x32xf32>
    %cst_22 = arith.constant dense<0.000000e+00> : vector<32xf32>
    %53 = vector.multi_reduction <add>, %52, %cst_22 [1] : vector<32x32xf32> to vector<32xf32>
    %54 = vector.shape_cast %53 : vector<32xf32> to vector<32x1xf32>
    %55 = vector.broadcast %54 : vector<32x1xf32> to vector<32x32xf32>
    %56 = arith.divf %52, %55 : vector<32x32xf32>
    %c0_23 = arith.constant 0 : index
    %57 = memref.load %arg5[%c0_23] : memref<4xf32, #tpu.memory_space<smem>>
    %cst_24 = arith.constant 1.000000e+00 : f32
    %58 = arith.subf %cst_24, %57 : f32
    %59 = vector.broadcast %58 : f32 to vector<32x32xf32>
    %60 = arith.mulf %59, %56 : vector<32x32xf32>
    %c0_25 = arith.constant 0 : index
    %c0_26 = arith.constant 0 : index
    %c0_27 = arith.constant 0 : index
    %61 = vector.load %arg4[%c0_25, %c0_26, %c0_27] : memref<4x32x32xf32, #tpu.memory_space<vmem>>, vector<1x32x32xf32>
    %62 = vector.shape_cast %61 : vector<1x32x32xf32> to vector<32x32xf32>
    %63 = vector.broadcast %57 : f32 to vector<32x32xf32>
    %64 = arith.mulf %63, %62 : vector<32x32xf32>
    %65 = arith.addf %60, %64 : vector<32x32xf32>
    %cst_28 = arith.constant dense<0.000000e+00> : vector<32xf32>
    %66 = vector.multi_reduction <add>, %65, %cst_28 [1] : vector<32x32xf32> to vector<32xf32>
    %67 = vector.shape_cast %66 : vector<32xf32> to vector<32x1xf32>
    %68 = vector.broadcast %67 : vector<32x1xf32> to vector<32x32xf32>
    %69 = arith.divf %65, %68 : vector<32x32xf32>
    %cst_29 = arith.constant dense<0.000000e+00> : vector<32x8xf32>
    %70 = tpu.matmul %69, %43, %cst_29 {dimension_numbers = #tpu.dot_dimension_numbers<[1], [0], [0], [1], [0, 0, 1, 1], [], []>} : vector<32x32xf32>, vector<32x8xf32>, vector<32x8xf32> -> vector<32x8xf32>
    %71 = vector.extract_strided_slice %11 {offsets = [0, 0], sizes = [8, 32], strides = [1, 1]} : vector<32x32xf32> to vector<8x32xf32>
    %cst_30 = arith.constant dense<0.000000e+00> : vector<32x32xf32>
    %72 = tpu.matmul %70, %71, %cst_30 {dimension_numbers = #tpu.dot_dimension_numbers<[1], [0], [0], [1], [0, 0, 1, 1], [], []>} : vector<32x8xf32>, vector<8x32xf32>, vector<32x32xf32> -> vector<32x32xf32>
    %73 = arith.addf %40, %72 : vector<32x32xf32>
    %74 = vector.extract_strided_slice %39 {offsets = [0, 8], sizes = [32, 8], strides = [1, 1]} : vector<32x128xf32> to vector<32x8xf32>
    %75 = vector.extract_strided_slice %39 {offsets = [0, 40], sizes = [32, 8], strides = [1, 1]} : vector<32x128xf32> to vector<32x8xf32>
    %76 = vector.extract_strided_slice %39 {offsets = [0, 72], sizes = [32, 8], strides = [1, 1]} : vector<32x128xf32> to vector<32x8xf32>
    %cst_31 = arith.constant dense<0.000000e+00> : vector<32x32xf32>
    %77 = tpu.matmul %74, %75, %cst_31 {dimension_numbers = #tpu.dot_dimension_numbers<[1], [1], [0], [0], [0, 0, 1, 0], [], []>} : vector<32x8xf32>, vector<32x8xf32>, vector<32x32xf32> -> vector<32x32xf32>
    %cst_32 = arith.constant 0.353553385 : f32
    %78 = vector.broadcast %cst_32 : f32 to vector<32x32xf32>
    %79 = arith.mulf %77, %78 : vector<32x32xf32>
    %80 = arith.addf %79, %3 : vector<32x32xf32>
    %cst_33 = arith.constant dense<0xFF800000> : vector<32xf32>
    %81 = vector.multi_reduction <maximumf>, %80, %cst_33 [1] : vector<32x32xf32> to vector<32xf32>
    %82 = vector.shape_cast %81 : vector<32xf32> to vector<32x1xf32>
    %83 = vector.broadcast %82 : vector<32x1xf32> to vector<32x32xf32>
    %84 = arith.subf %80, %83 : vector<32x32xf32>
    %85 = math.exp %84 : vector<32x32xf32>
    %cst_34 = arith.constant dense<0.000000e+00> : vector<32xf32>
    %86 = vector.multi_reduction <add>, %85, %cst_34 [1] : vector<32x32xf32> to vector<32xf32>
    %87 = vector.shape_cast %86 : vector<32xf32> to vector<32x1xf32>
    %88 = vector.broadcast %87 : vector<32x1xf32> to vector<32x32xf32>
    %89 = arith.divf %85, %88 : vector<32x32xf32>
    %c1 = arith.constant 1 : index
    %90 = memref.load %arg5[%c1] : memref<4xf32, #tpu.memory_space<smem>>
    %cst_35 = arith.constant 1.000000e+00 : f32
    %91 = arith.subf %cst_35, %90 : f32
    %92 = vector.broadcast %91 : f32 to vector<32x32xf32>
    %93 = arith.mulf %92, %89 : vector<32x32xf32>
    %c1_36 = arith.constant 1 : index
    %c0_37 = arith.constant 0 : index
    %c0_38 = arith.constant 0 : index
    %94 = vector.load %arg4[%c1_36, %c0_37, %c0_38] : memref<4x32x32xf32, #tpu.memory_space<vmem>>, vector<1x32x32xf32>
    %95 = vector.shape_cast %94 : vector<1x32x32xf32> to vector<32x32xf32>
    %96 = vector.broadcast %90 : f32 to vector<32x32xf32>
    %97 = arith.mulf %96, %95 : vector<32x32xf32>
    %98 = arith.addf %93, %97 : vector<32x32xf32>
    %cst_39 = arith.constant dense<0.000000e+00> : vector<32xf32>
    %99 = vector.multi_reduction <add>, %98, %cst_39 [1] : vector<32x32xf32> to vector<32xf32>
    %100 = vector.shape_cast %99 : vector<32xf32> to vector<32x1xf32>
    %101 = vector.broadcast %100 : vector<32x1xf32> to vector<32x32xf32>
    %102 = arith.divf %98, %101 : vector<32x32xf32>
    %cst_40 = arith.constant dense<0.000000e+00> : vector<32x8xf32>
    %103 = tpu.matmul %102, %76, %cst_40 {dimension_numbers = #tpu.dot_dimension_numbers<[1], [0], [0], [1], [0, 0, 1, 1], [], []>} : vector<32x32xf32>, vector<32x8xf32>, vector<32x8xf32> -> vector<32x8xf32>
    %104 = vector.extract_strided_slice %11 {offsets = [8, 0], sizes = [8, 32], strides = [1, 1]} : vector<32x32xf32> to vector<8x32xf32>
    %cst_41 = arith.constant dense<0.000000e+00> : vector<32x32xf32>
    %105 = tpu.matmul %103, %104, %cst_41 {dimension_numbers = #tpu.dot_dimension_numbers<[1], [0], [0], [1], [0, 0, 1, 1], [], []>} : vector<32x8xf32>, vector<8x32xf32>, vector<32x32xf32> -> vector<32x32xf32>
    %106 = arith.addf %73, %105 : vector<32x32xf32>
    %107 = vector.extract_strided_slice %39 {offsets = [0, 16], sizes = [32, 8], strides = [1, 1]} : vector<32x128xf32> to vector<32x8xf32>
    %108 = vector.extract_strided_slice %39 {offsets = [0, 48], sizes = [32, 8], strides = [1, 1]} : vector<32x128xf32> to vector<32x8xf32>
    %109 = vector.extract_strided_slice %39 {offsets = [0, 80], sizes = [32, 8], strides = [1, 1]} : vector<32x128xf32> to vector<32x8xf32>
    %cst_42 = arith.constant dense<0.000000e+00> : vector<32x32xf32>
    %110 = tpu.matmul %107, %108, %cst_42 {dimension_numbers = #tpu.dot_dimension_numbers<[1], [1], [0], [0], [0, 0, 1, 0], [], []>} : vector<32x8xf32>, vector<32x8xf32>, vector<32x32xf32> -> vector<32x32xf32>
    %cst_43 = arith.constant 0.353553385 : f32
    %111 = vector.broadcast %cst_43 : f32 to vector<32x32xf32>
    %112 = arith.mulf %110, %111 : vector<32x32xf32>
    %113 = arith.addf %112, %3 : vector<32x32xf32>
    %cst_44 = arith.constant dense<0xFF800000> : vector<32xf32>
    %114 = vector.multi_reduction <maximumf>, %113, %cst_44 [1] : vector<32x32xf32> to vector<32xf32>
    %115 = vector.shape_cast %114 : vector<32xf32> to vector<32x1xf32>
    %116 = vector.broadcast %115 : vector<32x1xf32> to vector<32x32xf32>
    %117 = arith.subf %113, %116 : vector<32x32xf32>
    %118 = math.exp %117 : vector<32x32xf32>
    %cst_45 = arith.constant dense<0.000000e+00> : vector<32xf32>
    %119 = vector.multi_reduction <add>, %118, %cst_45 [1] : vector<32x32xf32> to vector<32xf32>
    %120 = vector.shape_cast %119 : vector<32xf32> to vector<32x1xf32>
    %121 = vector.broadcast %120 : vector<32x1xf32> to vector<32x32xf32>
    %122 = arith.divf %118, %121 : vector<32x32xf32>
    %c2 = arith.constant 2 : index
    %123 = memref.load %arg5[%c2] : memref<4xf32, #tpu.memory_space<smem>>
    %cst_46 = arith.constant 1.000000e+00 : f32
    %124 = arith.subf %cst_46, %123 : f32
    %125 = vector.broadcast %124 : f32 to vector<32x32xf32>
    %126 = arith.mulf %125, %122 : vector<32x32xf32>
    %c2_47 = arith.constant 2 : index
    %c0_48 = arith.constant 0 : index
    %c0_49 = arith.constant 0 : index
    %127 = vector.load %arg4[%c2_47, %c0_48, %c0_49] : memref<4x32x32xf32, #tpu.memory_space<vmem>>, vector<1x32x32xf32>
    %128 = vector.shape_cast %127 : vector<1x32x32xf32> to vector<32x32xf32>
    %129 = vector.broadcast %123 : f32 to vector<32x32xf32>
    %130 = arith.mulf %129, %128 : vector<32x32xf32>
    %131 = arith.addf %126, %130 : vector<32x32xf32>
    %cst_50 = arith.constant dense<0.000000e+00> : vector<32xf32>
    %132 = vector.multi_reduction <add>, %131, %cst_50 [1] : vector<32x32xf32> to vector<32xf32>
    %133 = vector.shape_cast %132 : vector<32xf32> to vector<32x1xf32>
    %134 = vector.broadcast %133 : vector<32x1xf32> to vector<32x32xf32>
    %135 = arith.divf %131, %134 : vector<32x32xf32>
    %cst_51 = arith.constant dense<0.000000e+00> : vector<32x8xf32>
    %136 = tpu.matmul %135, %109, %cst_51 {dimension_numbers = #tpu.dot_dimension_numbers<[1], [0], [0], [1], [0, 0, 1, 1], [], []>} : vector<32x32xf32>, vector<32x8xf32>, vector<32x8xf32> -> vector<32x8xf32>
    %137 = vector.extract_strided_slice %11 {offsets = [16, 0], sizes = [8, 32], strides = [1, 1]} : vector<32x32xf32> to vector<8x32xf32>
    %cst_52 = arith.constant dense<0.000000e+00> : vector<32x32xf32>
    %138 = tpu.matmul %136, %137, %cst_52 {dimension_numbers = #tpu.dot_dimension_numbers<[1], [0], [0], [1], [0, 0, 1, 1], [], []>} : vector<32x8xf32>, vector<8x32xf32>, vector<32x32xf32> -> vector<32x32xf32>
    %139 = arith.addf %106, %138 : vector<32x32xf32>
    %140 = vector.extract_strided_slice %39 {offsets = [0, 24], sizes = [32, 8], strides = [1, 1]} : vector<32x128xf32> to vector<32x8xf32>
    %141 = vector.extract_strided_slice %39 {offsets = [0, 56], sizes = [32, 8], strides = [1, 1]} : vector<32x128xf32> to vector<32x8xf32>
    %142 = vector.extract_strided_slice %39 {offsets = [0, 88], sizes = [32, 8], strides = [1, 1]} : vector<32x128xf32> to vector<32x8xf32>
    %cst_53 = arith.constant dense<0.000000e+00> : vector<32x32xf32>
    %143 = tpu.matmul %140, %141, %cst_53 {dimension_numbers = #tpu.dot_dimension_numbers<[1], [1], [0], [0], [0, 0, 1, 0], [], []>} : vector<32x8xf32>, vector<32x8xf32>, vector<32x32xf32> -> vector<32x32xf32>
    %cst_54 = arith.constant 0.353553385 : f32
    %144 = vector.broadcast %cst_54 : f32 to vector<32x32xf32>
    %145 = arith.mulf %143, %144 : vector<32x32xf32>
    %146 = arith.addf %145, %3 : vector<32x32xf32>
    %cst_55 = arith.constant dense<0xFF800000> : vector<32xf32>
    %147 = vector.multi_reduction <maximumf>, %146, %cst_55 [1] : vector<32x32xf32> to vector<32xf32>
    %148 = vector.shape_cast %147 : vector<32xf32> to vector<32x1xf32>
    %149 = vector.broadcast %148 : vector<32x1xf32> to vector<32x32xf32>
    %150 = arith.subf %146, %149 : vector<32x32xf32>
    %151 = math.exp %150 : vector<32x32xf32>
    %cst_56 = arith.constant dense<0.000000e+00> : vector<32xf32>
    %152 = vector.multi_reduction <add>, %151, %cst_56 [1] : vector<32x32xf32> to vector<32xf32>
    %153 = vector.shape_cast %152 : vector<32xf32> to vector<32x1xf32>
    %154 = vector.broadcast %153 : vector<32x1xf32> to vector<32x32xf32>
    %155 = arith.divf %151, %154 : vector<32x32xf32>
    %c3 = arith.constant 3 : index
    %156 = memref.load %arg5[%c3] : memref<4xf32, #tpu.memory_space<smem>>
    %cst_57 = arith.constant 1.000000e+00 : f32
    %157 = arith.subf %cst_57, %156 : f32
    %158 = vector.broadcast %157 : f32 to vector<32x32xf32>
    %159 = arith.mulf %158, %155 : vector<32x32xf32>
    %c3_58 = arith.constant 3 : index
    %c0_59 = arith.constant 0 : index
    %c0_60 = arith.constant 0 : index
    %160 = vector.load %arg4[%c3_58, %c0_59, %c0_60] : memref<4x32x32xf32, #tpu.memory_space<vmem>>, vector<1x32x32xf32>
    %161 = vector.shape_cast %160 : vector<1x32x32xf32> to vector<32x32xf32>
    %162 = vector.broadcast %156 : f32 to vector<32x32xf32>
    %163 = arith.mulf %162, %161 : vector<32x32xf32>
    %164 = arith.addf %159, %163 : vector<32x32xf32>
    %cst_61 = arith.constant dense<0.000000e+00> : vector<32xf32>
    %165 = vector.multi_reduction <add>, %164, %cst_61 [1] : vector<32x32xf32> to vector<32xf32>
    %166 = vector.shape_cast %165 : vector<32xf32> to vector<32x1xf32>
    %167 = vector.broadcast %166 : vector<32x1xf32> to vector<32x32xf32>
    %168 = arith.divf %164, %167 : vector<32x32xf32>
    %cst_62 = arith.constant dense<0.000000e+00> : vector<32x8xf32>
    %169 = tpu.matmul %168, %142, %cst_62 {dimension_numbers = #tpu.dot_dimension_numbers<[1], [0], [0], [1], [0, 0, 1, 1], [], []>} : vector<32x32xf32>, vector<32x8xf32>, vector<32x8xf32> -> vector<32x8xf32>
    %170 = vector.extract_strided_slice %11 {offsets = [24, 0], sizes = [8, 32], strides = [1, 1]} : vector<32x32xf32> to vector<8x32xf32>
    %cst_63 = arith.constant dense<0.000000e+00> : vector<32x32xf32>
    %171 = tpu.matmul %169, %170, %cst_63 {dimension_numbers = #tpu.dot_dimension_numbers<[1], [0], [0], [1], [0, 0, 1, 1], [], []>} : vector<32x8xf32>, vector<8x32xf32>, vector<32x32xf32> -> vector<32x32xf32>
    %172 = arith.addf %139, %171 : vector<32x32xf32>
    %173 = arith.addf %2, %172 : vector<32x32xf32>
    %174 = vector.broadcast %9 : vector<1x32xf32> to vector<32x32xf32>
    %175 = arith.addf %173, %174 : vector<32x32xf32>
    %cst_64 = arith.constant dense<0.000000e+00> : vector<32xf32>
    %176 = vector.multi_reduction <add>, %175, %cst_64 [1] : vector<32x32xf32> to vector<32xf32>
    %177 = vector.shape_cast %176 : vector<32xf32> to vector<32x1xf32>
    %cst_65 = arith.constant 3.200000e+01 : f32
    %178 = vector.broadcast %cst_65 : f32 to vector<32x1xf32>
    %179 = arith.divf %177, %178 : vector<32x1xf32>
    %180 = vector.broadcast %179 : vector<32x1xf32> to vector<32x32xf32>
    %181 = arith.subf %175, %180 : vector<32x32xf32>
    %182 = arith.mulf %181, %181 : vector<32x32xf32>
    %cst_66 = arith.constant dense<0.000000e+00> : vector<32xf32>
    %183 = vector.multi_reduction <add>, %182, %cst_66 [1] : vector<32x32xf32> to vector<32xf32>
    %184 = vector.shape_cast %183 : vector<32xf32> to vector<32x1xf32>
    %cst_67 = arith.constant 3.200000e+01 : f32
    %185 = vector.broadcast %cst_67 : f32 to vector<32x1xf32>
    %186 = arith.divf %184, %185 : vector<32x1xf32>
    %187 = vector.broadcast %179 : vector<32x1xf32> to vector<32x32xf32>
    %188 = arith.subf %175, %187 : vector<32x32xf32>
    %cst_68 = arith.constant 9.99999974E-6 : f32
    %189 = vector.broadcast %cst_68 : f32 to vector<32x1xf32>
    %190 = arith.addf %186, %189 : vector<32x1xf32>
    %191 = math.rsqrt %190 : vector<32x1xf32>
    %192 = vector.broadcast %191 : vector<32x1xf32> to vector<32x32xf32>
    %193 = arith.mulf %188, %192 : vector<32x32xf32>
    %194 = vector.broadcast %7 : vector<1x32xf32> to vector<32x32xf32>
    %195 = arith.mulf %193, %194 : vector<32x32xf32>
    %196 = vector.broadcast %8 : vector<1x32xf32> to vector<32x32xf32>
    %197 = arith.addf %195, %196 : vector<32x32xf32>
    %cst_69 = arith.constant dense<0.000000e+00> : vector<32x128xf32>
    %198 = tpu.matmul %197, %14, %cst_69 {dimension_numbers = #tpu.dot_dimension_numbers<[1], [0], [0], [1], [0, 0, 1, 1], [], []>} : vector<32x32xf32>, vector<32x128xf32>, vector<32x128xf32> -> vector<32x128xf32>
    %199 = vector.broadcast %16 : vector<1x128xf32> to vector<32x128xf32>
    %200 = arith.addf %198, %199 : vector<32x128xf32>
    %cst_70 = arith.constant 5.000000e-01 : f32
    %201 = vector.broadcast %cst_70 : f32 to vector<32x128xf32>
    %202 = arith.mulf %201, %200 : vector<32x128xf32>
    %cst_71 = arith.constant 0.707106769 : f32
    %203 = vector.broadcast %cst_71 : f32 to vector<32x128xf32>
    %204 = arith.mulf %200, %203 : vector<32x128xf32>
    %cst_72 = arith.constant 0.000000e+00 : f32
    %205 = vector.broadcast %cst_72 : f32 to vector<32x128xf32>
    %206 = arith.cmpf oge, %204, %205 : vector<32x128xf32>
    %cst_73 = arith.constant 1.000000e+00 : f32
    %cst_74 = arith.constant -1.000000e+00 : f32
    %207 = vector.broadcast %cst_73 : f32 to vector<32x128xf32>
    %208 = vector.broadcast %cst_74 : f32 to vector<32x128xf32>
    %209 = arith.select %206, %207, %208 : vector<32x128xi1>, vector<32x128xf32>
    %210 = math.absf %204 : vector<32x128xf32>
    %cst_75 = arith.constant 0.327591091 : f32
    %211 = vector.broadcast %cst_75 : f32 to vector<32x128xf32>
    %212 = arith.mulf %211, %210 : vector<32x128xf32>
    %cst_76 = arith.constant 1.000000e+00 : f32
    %213 = vector.broadcast %cst_76 : f32 to vector<32x128xf32>
    %214 = arith.addf %213, %212 : vector<32x128xf32>
    %cst_77 = arith.constant 1.000000e+00 : f32
    %215 = vector.broadcast %cst_77 : f32 to vector<32x128xf32>
    %216 = arith.divf %215, %214 : vector<32x128xf32>
    %cst_78 = arith.constant 1.06140542 : f32
    %217 = vector.broadcast %cst_78 : f32 to vector<32x128xf32>
    %218 = arith.mulf %217, %216 : vector<32x128xf32>
    %cst_79 = arith.constant -1.45315206 : f32
    %219 = vector.broadcast %cst_79 : f32 to vector<32x128xf32>
    %220 = arith.addf %218, %219 : vector<32x128xf32>
    %221 = arith.mulf %220, %216 : vector<32x128xf32>
    %cst_80 = arith.constant 1.42141378 : f32
    %222 = vector.broadcast %cst_80 : f32 to vector<32x128xf32>
    %223 = arith.addf %221, %222 : vector<32x128xf32>
    %224 = arith.mulf %223, %216 : vector<32x128xf32>
    %cst_81 = arith.constant -0.284496725 : f32
    %225 = vector.broadcast %cst_81 : f32 to vector<32x128xf32>
    %226 = arith.addf %224, %225 : vector<32x128xf32>
    %227 = arith.mulf %226, %216 : vector<32x128xf32>
    %cst_82 = arith.constant 0.254829586 : f32
    %228 = vector.broadcast %cst_82 : f32 to vector<32x128xf32>
    %229 = arith.addf %227, %228 : vector<32x128xf32>
    %230 = arith.mulf %229, %216 : vector<32x128xf32>
    %cst_83 = arith.constant 0.000000e+00 : f32
    %231 = vector.broadcast %cst_83 : f32 to vector<32x128xf32>
    %232 = arith.subf %231, %210 : vector<32x128xf32>
    %233 = arith.mulf %232, %210 : vector<32x128xf32>
    %234 = math.exp %233 : vector<32x128xf32>
    %235 = arith.mulf %230, %234 : vector<32x128xf32>
    %cst_84 = arith.constant 1.000000e+00 : f32
    %236 = vector.broadcast %cst_84 : f32 to vector<32x128xf32>
    %237 = arith.subf %236, %235 : vector<32x128xf32>
    %238 = arith.mulf %209, %237 : vector<32x128xf32>
    %cst_85 = arith.constant 1.000000e+00 : f32
    %239 = vector.broadcast %cst_85 : f32 to vector<32x128xf32>
    %240 = arith.addf %239, %238 : vector<32x128xf32>
    %241 = arith.mulf %202, %240 : vector<32x128xf32>
    %cst_86 = arith.constant dense<0.000000e+00> : vector<32x32xf32>
    %242 = tpu.matmul %241, %12, %cst_86 {dimension_numbers = #tpu.dot_dimension_numbers<[1], [0], [0], [1], [0, 0, 1, 1], [], []>} : vector<32x128xf32>, vector<128x32xf32>, vector<32x32xf32> -> vector<32x32xf32>
    %243 = arith.addf %175, %242 : vector<32x32xf32>
    %244 = vector.broadcast %10 : vector<1x32xf32> to vector<32x32xf32>
    %245 = arith.addf %243, %244 : vector<32x32xf32>
    %c296 = arith.constant 296 : index
    %c0_87 = arith.constant 0 : index
    %246 = vector.load %arg2[%c296, %c0_87] : memref<472x32xf32, #tpu.memory_space<vmem>>, vector<8x32xf32>
    %247 = vector.extract_strided_slice %246 {offsets = [0, 0], sizes = [1, 32], strides = [1, 1]} : vector<8x32xf32> to vector<1x32xf32>
    %248 = vector.extract_strided_slice %246 {offsets = [1, 0], sizes = [1, 32], strides = [1, 1]} : vector<8x32xf32> to vector<1x32xf32>
    %249 = vector.extract_strided_slice %246 {offsets = [2, 0], sizes = [1, 32], strides = [1, 1]} : vector<8x32xf32> to vector<1x32xf32>
    %250 = vector.extract_strided_slice %246 {offsets = [3, 0], sizes = [1, 32], strides = [1, 1]} : vector<8x32xf32> to vector<1x32xf32>
    %251 = vector.extract_strided_slice %246 {offsets = [4, 0], sizes = [1, 32], strides = [1, 1]} : vector<8x32xf32> to vector<1x32xf32>
    %252 = vector.extract_strided_slice %246 {offsets = [5, 0], sizes = [1, 32], strides = [1, 1]} : vector<8x32xf32> to vector<1x32xf32>
    %c304 = arith.constant 304 : index
    %c0_88 = arith.constant 0 : index
    %253 = vector.load %arg2[%c304, %c0_88] : memref<472x32xf32, #tpu.memory_space<vmem>>, vector<32x32xf32>
    %c336 = arith.constant 336 : index
    %c0_89 = arith.constant 0 : index
    %254 = vector.load %arg2[%c336, %c0_89] : memref<472x32xf32, #tpu.memory_space<vmem>>, vector<128x32xf32>
    %c72 = arith.constant 72 : index
    %c0_90 = arith.constant 0 : index
    %255 = vector.load %arg3[%c72, %c0_90] : memref<184x128xf32, #tpu.memory_space<vmem>>, vector<32x128xf32>
    %c104 = arith.constant 104 : index
    %c0_91 = arith.constant 0 : index
    %256 = vector.load %arg3[%c104, %c0_91] : memref<184x128xf32, #tpu.memory_space<vmem>>, vector<32x128xf32>
    %c136_92 = arith.constant 136 : index
    %c0_93 = arith.constant 0 : index
    %257 = vector.load %arg3[%c136_92, %c0_93] : memref<184x128xf32, #tpu.memory_space<vmem>>, vector<8x128xf32>
    %258 = vector.extract_strided_slice %257 {offsets = [0, 0], sizes = [1, 128], strides = [1, 1]} : vector<8x128xf32> to vector<1x128xf32>
    %cst_94 = arith.constant dense<0.000000e+00> : vector<32xf32>
    %259 = vector.multi_reduction <add>, %245, %cst_94 [1] : vector<32x32xf32> to vector<32xf32>
    %260 = vector.shape_cast %259 : vector<32xf32> to vector<32x1xf32>
    %cst_95 = arith.constant 3.200000e+01 : f32
    %261 = vector.broadcast %cst_95 : f32 to vector<32x1xf32>
    %262 = arith.divf %260, %261 : vector<32x1xf32>
    %263 = vector.broadcast %262 : vector<32x1xf32> to vector<32x32xf32>
    %264 = arith.subf %245, %263 : vector<32x32xf32>
    %265 = arith.mulf %264, %264 : vector<32x32xf32>
    %cst_96 = arith.constant dense<0.000000e+00> : vector<32xf32>
    %266 = vector.multi_reduction <add>, %265, %cst_96 [1] : vector<32x32xf32> to vector<32xf32>
    %267 = vector.shape_cast %266 : vector<32xf32> to vector<32x1xf32>
    %cst_97 = arith.constant 3.200000e+01 : f32
    %268 = vector.broadcast %cst_97 : f32 to vector<32x1xf32>
    %269 = arith.divf %267, %268 : vector<32x1xf32>
    %270 = vector.broadcast %262 : vector<32x1xf32> to vector<32x32xf32>
    %271 = arith.subf %245, %270 : vector<32x32xf32>
    %cst_98 = arith.constant 9.99999974E-6 : f32
    %272 = vector.broadcast %cst_98 : f32 to vector<32x1xf32>
    %273 = arith.addf %269, %272 : vector<32x1xf32>
    %274 = math.rsqrt %273 : vector<32x1xf32>
    %275 = vector.broadcast %274 : vector<32x1xf32> to vector<32x32xf32>
    %276 = arith.mulf %271, %275 : vector<32x32xf32>
    %277 = vector.broadcast %247 : vector<1x32xf32> to vector<32x32xf32>
    %278 = arith.mulf %276, %277 : vector<32x32xf32>
    %279 = vector.broadcast %248 : vector<1x32xf32> to vector<32x32xf32>
    %280 = arith.addf %278, %279 : vector<32x32xf32>
    %cst_99 = arith.constant dense<0.000000e+00> : vector<32x128xf32>
    %281 = tpu.matmul %280, %255, %cst_99 {dimension_numbers = #tpu.dot_dimension_numbers<[1], [0], [0], [1], [0, 0, 1, 1], [], []>} : vector<32x32xf32>, vector<32x128xf32>, vector<32x128xf32> -> vector<32x128xf32>
    %cst_100 = arith.constant 0.000000e+00 : f32
    %282 = vector.broadcast %cst_100 : f32 to vector<32x32xf32>
    %283 = vector.extract_strided_slice %281 {offsets = [0, 0], sizes = [32, 8], strides = [1, 1]} : vector<32x128xf32> to vector<32x8xf32>
    %284 = vector.extract_strided_slice %281 {offsets = [0, 32], sizes = [32, 8], strides = [1, 1]} : vector<32x128xf32> to vector<32x8xf32>
    %285 = vector.extract_strided_slice %281 {offsets = [0, 64], sizes = [32, 8], strides = [1, 1]} : vector<32x128xf32> to vector<32x8xf32>
    %cst_101 = arith.constant dense<0.000000e+00> : vector<32x32xf32>
    %286 = tpu.matmul %283, %284, %cst_101 {dimension_numbers = #tpu.dot_dimension_numbers<[1], [1], [0], [0], [0, 0, 1, 0], [], []>} : vector<32x8xf32>, vector<32x8xf32>, vector<32x32xf32> -> vector<32x32xf32>
    %cst_102 = arith.constant 0.353553385 : f32
    %287 = vector.broadcast %cst_102 : f32 to vector<32x32xf32>
    %288 = arith.mulf %286, %287 : vector<32x32xf32>
    %289 = arith.addf %288, %3 : vector<32x32xf32>
    %cst_103 = arith.constant dense<0xFF800000> : vector<32xf32>
    %290 = vector.multi_reduction <maximumf>, %289, %cst_103 [1] : vector<32x32xf32> to vector<32xf32>
    %291 = vector.shape_cast %290 : vector<32xf32> to vector<32x1xf32>
    %292 = vector.broadcast %291 : vector<32x1xf32> to vector<32x32xf32>
    %293 = arith.subf %289, %292 : vector<32x32xf32>
    %294 = math.exp %293 : vector<32x32xf32>
    %cst_104 = arith.constant dense<0.000000e+00> : vector<32xf32>
    %295 = vector.multi_reduction <add>, %294, %cst_104 [1] : vector<32x32xf32> to vector<32xf32>
    %296 = vector.shape_cast %295 : vector<32xf32> to vector<32x1xf32>
    %297 = vector.broadcast %296 : vector<32x1xf32> to vector<32x32xf32>
    %298 = arith.divf %294, %297 : vector<32x32xf32>
    %cst_105 = arith.constant dense<0.000000e+00> : vector<32x8xf32>
    %299 = tpu.matmul %298, %285, %cst_105 {dimension_numbers = #tpu.dot_dimension_numbers<[1], [0], [0], [1], [0, 0, 1, 1], [], []>} : vector<32x32xf32>, vector<32x8xf32>, vector<32x8xf32> -> vector<32x8xf32>
    %300 = vector.extract_strided_slice %253 {offsets = [0, 0], sizes = [8, 32], strides = [1, 1]} : vector<32x32xf32> to vector<8x32xf32>
    %cst_106 = arith.constant dense<0.000000e+00> : vector<32x32xf32>
    %301 = tpu.matmul %299, %300, %cst_106 {dimension_numbers = #tpu.dot_dimension_numbers<[1], [0], [0], [1], [0, 0, 1, 1], [], []>} : vector<32x8xf32>, vector<8x32xf32>, vector<32x32xf32> -> vector<32x32xf32>
    %302 = arith.addf %282, %301 : vector<32x32xf32>
    %303 = vector.extract_strided_slice %281 {offsets = [0, 8], sizes = [32, 8], strides = [1, 1]} : vector<32x128xf32> to vector<32x8xf32>
    %304 = vector.extract_strided_slice %281 {offsets = [0, 40], sizes = [32, 8], strides = [1, 1]} : vector<32x128xf32> to vector<32x8xf32>
    %305 = vector.extract_strided_slice %281 {offsets = [0, 72], sizes = [32, 8], strides = [1, 1]} : vector<32x128xf32> to vector<32x8xf32>
    %cst_107 = arith.constant dense<0.000000e+00> : vector<32x32xf32>
    %306 = tpu.matmul %303, %304, %cst_107 {dimension_numbers = #tpu.dot_dimension_numbers<[1], [1], [0], [0], [0, 0, 1, 0], [], []>} : vector<32x8xf32>, vector<32x8xf32>, vector<32x32xf32> -> vector<32x32xf32>
    %cst_108 = arith.constant 0.353553385 : f32
    %307 = vector.broadcast %cst_108 : f32 to vector<32x32xf32>
    %308 = arith.mulf %306, %307 : vector<32x32xf32>
    %309 = arith.addf %308, %3 : vector<32x32xf32>
    %cst_109 = arith.constant dense<0xFF800000> : vector<32xf32>
    %310 = vector.multi_reduction <maximumf>, %309, %cst_109 [1] : vector<32x32xf32> to vector<32xf32>
    %311 = vector.shape_cast %310 : vector<32xf32> to vector<32x1xf32>
    %312 = vector.broadcast %311 : vector<32x1xf32> to vector<32x32xf32>
    %313 = arith.subf %309, %312 : vector<32x32xf32>
    %314 = math.exp %313 : vector<32x32xf32>
    %cst_110 = arith.constant dense<0.000000e+00> : vector<32xf32>
    %315 = vector.multi_reduction <add>, %314, %cst_110 [1] : vector<32x32xf32> to vector<32xf32>
    %316 = vector.shape_cast %315 : vector<32xf32> to vector<32x1xf32>
    %317 = vector.broadcast %316 : vector<32x1xf32> to vector<32x32xf32>
    %318 = arith.divf %314, %317 : vector<32x32xf32>
    %cst_111 = arith.constant dense<0.000000e+00> : vector<32x8xf32>
    %319 = tpu.matmul %318, %305, %cst_111 {dimension_numbers = #tpu.dot_dimension_numbers<[1], [0], [0], [1], [0, 0, 1, 1], [], []>} : vector<32x32xf32>, vector<32x8xf32>, vector<32x8xf32> -> vector<32x8xf32>
    %320 = vector.extract_strided_slice %253 {offsets = [8, 0], sizes = [8, 32], strides = [1, 1]} : vector<32x32xf32> to vector<8x32xf32>
    %cst_112 = arith.constant dense<0.000000e+00> : vector<32x32xf32>
    %321 = tpu.matmul %319, %320, %cst_112 {dimension_numbers = #tpu.dot_dimension_numbers<[1], [0], [0], [1], [0, 0, 1, 1], [], []>} : vector<32x8xf32>, vector<8x32xf32>, vector<32x32xf32> -> vector<32x32xf32>
    %322 = arith.addf %302, %321 : vector<32x32xf32>
    %323 = vector.extract_strided_slice %281 {offsets = [0, 16], sizes = [32, 8], strides = [1, 1]} : vector<32x128xf32> to vector<32x8xf32>
    %324 = vector.extract_strided_slice %281 {offsets = [0, 48], sizes = [32, 8], strides = [1, 1]} : vector<32x128xf32> to vector<32x8xf32>
    %325 = vector.extract_strided_slice %281 {offsets = [0, 80], sizes = [32, 8], strides = [1, 1]} : vector<32x128xf32> to vector<32x8xf32>
    %cst_113 = arith.constant dense<0.000000e+00> : vector<32x32xf32>
    %326 = tpu.matmul %323, %324, %cst_113 {dimension_numbers = #tpu.dot_dimension_numbers<[1], [1], [0], [0], [0, 0, 1, 0], [], []>} : vector<32x8xf32>, vector<32x8xf32>, vector<32x32xf32> -> vector<32x32xf32>
    %cst_114 = arith.constant 0.353553385 : f32
    %327 = vector.broadcast %cst_114 : f32 to vector<32x32xf32>
    %328 = arith.mulf %326, %327 : vector<32x32xf32>
    %329 = arith.addf %328, %3 : vector<32x32xf32>
    %cst_115 = arith.constant dense<0xFF800000> : vector<32xf32>
    %330 = vector.multi_reduction <maximumf>, %329, %cst_115 [1] : vector<32x32xf32> to vector<32xf32>
    %331 = vector.shape_cast %330 : vector<32xf32> to vector<32x1xf32>
    %332 = vector.broadcast %331 : vector<32x1xf32> to vector<32x32xf32>
    %333 = arith.subf %329, %332 : vector<32x32xf32>
    %334 = math.exp %333 : vector<32x32xf32>
    %cst_116 = arith.constant dense<0.000000e+00> : vector<32xf32>
    %335 = vector.multi_reduction <add>, %334, %cst_116 [1] : vector<32x32xf32> to vector<32xf32>
    %336 = vector.shape_cast %335 : vector<32xf32> to vector<32x1xf32>
    %337 = vector.broadcast %336 : vector<32x1xf32> to vector<32x32xf32>
    %338 = arith.divf %334, %337 : vector<32x32xf32>
    %cst_117 = arith.constant dense<0.000000e+00> : vector<32x8xf32>
    %339 = tpu.matmul %338, %325, %cst_117 {dimension_numbers = #tpu.dot_dimension_numbers<[1], [0], [0], [1], [0, 0, 1, 1], [], []>} : vector<32x32xf32>, vector<32x8xf32>, vector<32x8xf32> -> vector<32x8xf32>
    %340 = vector.extract_strided_slice %253 {offsets = [16, 0], sizes = [8, 32], strides = [1, 1]} : vector<32x32xf32> to vector<8x32xf32>
    %cst_118 = arith.constant dense<0.000000e+00> : vector<32x32xf32>
    %341 = tpu.matmul %339, %340, %cst_118 {dimension_numbers = #tpu.dot_dimension_numbers<[1], [0], [0], [1], [0, 0, 1, 1], [], []>} : vector<32x8xf32>, vector<8x32xf32>, vector<32x32xf32> -> vector<32x32xf32>
    %342 = arith.addf %322, %341 : vector<32x32xf32>
    %343 = vector.extract_strided_slice %281 {offsets = [0, 24], sizes = [32, 8], strides = [1, 1]} : vector<32x128xf32> to vector<32x8xf32>
    %344 = vector.extract_strided_slice %281 {offsets = [0, 56], sizes = [32, 8], strides = [1, 1]} : vector<32x128xf32> to vector<32x8xf32>
    %345 = vector.extract_strided_slice %281 {offsets = [0, 88], sizes = [32, 8], strides = [1, 1]} : vector<32x128xf32> to vector<32x8xf32>
    %cst_119 = arith.constant dense<0.000000e+00> : vector<32x32xf32>
    %346 = tpu.matmul %343, %344, %cst_119 {dimension_numbers = #tpu.dot_dimension_numbers<[1], [1], [0], [0], [0, 0, 1, 0], [], []>} : vector<32x8xf32>, vector<32x8xf32>, vector<32x32xf32> -> vector<32x32xf32>
    %cst_120 = arith.constant 0.353553385 : f32
    %347 = vector.broadcast %cst_120 : f32 to vector<32x32xf32>
    %348 = arith.mulf %346, %347 : vector<32x32xf32>
    %349 = arith.addf %348, %3 : vector<32x32xf32>
    %cst_121 = arith.constant dense<0xFF800000> : vector<32xf32>
    %350 = vector.multi_reduction <maximumf>, %349, %cst_121 [1] : vector<32x32xf32> to vector<32xf32>
    %351 = vector.shape_cast %350 : vector<32xf32> to vector<32x1xf32>
    %352 = vector.broadcast %351 : vector<32x1xf32> to vector<32x32xf32>
    %353 = arith.subf %349, %352 : vector<32x32xf32>
    %354 = math.exp %353 : vector<32x32xf32>
    %cst_122 = arith.constant dense<0.000000e+00> : vector<32xf32>
    %355 = vector.multi_reduction <add>, %354, %cst_122 [1] : vector<32x32xf32> to vector<32xf32>
    %356 = vector.shape_cast %355 : vector<32xf32> to vector<32x1xf32>
    %357 = vector.broadcast %356 : vector<32x1xf32> to vector<32x32xf32>
    %358 = arith.divf %354, %357 : vector<32x32xf32>
    %cst_123 = arith.constant dense<0.000000e+00> : vector<32x8xf32>
    %359 = tpu.matmul %358, %345, %cst_123 {dimension_numbers = #tpu.dot_dimension_numbers<[1], [0], [0], [1], [0, 0, 1, 1], [], []>} : vector<32x32xf32>, vector<32x8xf32>, vector<32x8xf32> -> vector<32x8xf32>
    %360 = vector.extract_strided_slice %253 {offsets = [24, 0], sizes = [8, 32], strides = [1, 1]} : vector<32x32xf32> to vector<8x32xf32>
    %cst_124 = arith.constant dense<0.000000e+00> : vector<32x32xf32>
    %361 = tpu.matmul %359, %360, %cst_124 {dimension_numbers = #tpu.dot_dimension_numbers<[1], [0], [0], [1], [0, 0, 1, 1], [], []>} : vector<32x8xf32>, vector<8x32xf32>, vector<32x32xf32> -> vector<32x32xf32>
    %362 = arith.addf %342, %361 : vector<32x32xf32>
    %363 = arith.addf %245, %362 : vector<32x32xf32>
    %364 = vector.broadcast %251 : vector<1x32xf32> to vector<32x32xf32>
    %365 = arith.addf %363, %364 : vector<32x32xf32>
    %cst_125 = arith.constant dense<0.000000e+00> : vector<32xf32>
    %366 = vector.multi_reduction <add>, %365, %cst_125 [1] : vector<32x32xf32> to vector<32xf32>
    %367 = vector.shape_cast %366 : vector<32xf32> to vector<32x1xf32>
    %cst_126 = arith.constant 3.200000e+01 : f32
    %368 = vector.broadcast %cst_126 : f32 to vector<32x1xf32>
    %369 = arith.divf %367, %368 : vector<32x1xf32>
    %370 = vector.broadcast %369 : vector<32x1xf32> to vector<32x32xf32>
    %371 = arith.subf %365, %370 : vector<32x32xf32>
    %372 = arith.mulf %371, %371 : vector<32x32xf32>
    %cst_127 = arith.constant dense<0.000000e+00> : vector<32xf32>
    %373 = vector.multi_reduction <add>, %372, %cst_127 [1] : vector<32x32xf32> to vector<32xf32>
    %374 = vector.shape_cast %373 : vector<32xf32> to vector<32x1xf32>
    %cst_128 = arith.constant 3.200000e+01 : f32
    %375 = vector.broadcast %cst_128 : f32 to vector<32x1xf32>
    %376 = arith.divf %374, %375 : vector<32x1xf32>
    %377 = vector.broadcast %369 : vector<32x1xf32> to vector<32x32xf32>
    %378 = arith.subf %365, %377 : vector<32x32xf32>
    %cst_129 = arith.constant 9.99999974E-6 : f32
    %379 = vector.broadcast %cst_129 : f32 to vector<32x1xf32>
    %380 = arith.addf %376, %379 : vector<32x1xf32>
    %381 = math.rsqrt %380 : vector<32x1xf32>
    %382 = vector.broadcast %381 : vector<32x1xf32> to vector<32x32xf32>
    %383 = arith.mulf %378, %382 : vector<32x32xf32>
    %384 = vector.broadcast %249 : vector<1x32xf32> to vector<32x32xf32>
    %385 = arith.mulf %383, %384 : vector<32x32xf32>
    %386 = vector.broadcast %250 : vector<1x32xf32> to vector<32x32xf32>
    %387 = arith.addf %385, %386 : vector<32x32xf32>
    %cst_130 = arith.constant dense<0.000000e+00> : vector<32x128xf32>
    %388 = tpu.matmul %387, %256, %cst_130 {dimension_numbers = #tpu.dot_dimension_numbers<[1], [0], [0], [1], [0, 0, 1, 1], [], []>} : vector<32x32xf32>, vector<32x128xf32>, vector<32x128xf32> -> vector<32x128xf32>
    %389 = vector.broadcast %258 : vector<1x128xf32> to vector<32x128xf32>
    %390 = arith.addf %388, %389 : vector<32x128xf32>
    %cst_131 = arith.constant 5.000000e-01 : f32
    %391 = vector.broadcast %cst_131 : f32 to vector<32x128xf32>
    %392 = arith.mulf %391, %390 : vector<32x128xf32>
    %cst_132 = arith.constant 0.707106769 : f32
    %393 = vector.broadcast %cst_132 : f32 to vector<32x128xf32>
    %394 = arith.mulf %390, %393 : vector<32x128xf32>
    %cst_133 = arith.constant 0.000000e+00 : f32
    %395 = vector.broadcast %cst_133 : f32 to vector<32x128xf32>
    %396 = arith.cmpf oge, %394, %395 : vector<32x128xf32>
    %cst_134 = arith.constant 1.000000e+00 : f32
    %cst_135 = arith.constant -1.000000e+00 : f32
    %397 = vector.broadcast %cst_134 : f32 to vector<32x128xf32>
    %398 = vector.broadcast %cst_135 : f32 to vector<32x128xf32>
    %399 = arith.select %396, %397, %398 : vector<32x128xi1>, vector<32x128xf32>
    %400 = math.absf %394 : vector<32x128xf32>
    %cst_136 = arith.constant 0.327591091 : f32
    %401 = vector.broadcast %cst_136 : f32 to vector<32x128xf32>
    %402 = arith.mulf %401, %400 : vector<32x128xf32>
    %cst_137 = arith.constant 1.000000e+00 : f32
    %403 = vector.broadcast %cst_137 : f32 to vector<32x128xf32>
    %404 = arith.addf %403, %402 : vector<32x128xf32>
    %cst_138 = arith.constant 1.000000e+00 : f32
    %405 = vector.broadcast %cst_138 : f32 to vector<32x128xf32>
    %406 = arith.divf %405, %404 : vector<32x128xf32>
    %cst_139 = arith.constant 1.06140542 : f32
    %407 = vector.broadcast %cst_139 : f32 to vector<32x128xf32>
    %408 = arith.mulf %407, %406 : vector<32x128xf32>
    %cst_140 = arith.constant -1.45315206 : f32
    %409 = vector.broadcast %cst_140 : f32 to vector<32x128xf32>
    %410 = arith.addf %408, %409 : vector<32x128xf32>
    %411 = arith.mulf %410, %406 : vector<32x128xf32>
    %cst_141 = arith.constant 1.42141378 : f32
    %412 = vector.broadcast %cst_141 : f32 to vector<32x128xf32>
    %413 = arith.addf %411, %412 : vector<32x128xf32>
    %414 = arith.mulf %413, %406 : vector<32x128xf32>
    %cst_142 = arith.constant -0.284496725 : f32
    %415 = vector.broadcast %cst_142 : f32 to vector<32x128xf32>
    %416 = arith.addf %414, %415 : vector<32x128xf32>
    %417 = arith.mulf %416, %406 : vector<32x128xf32>
    %cst_143 = arith.constant 0.254829586 : f32
    %418 = vector.broadcast %cst_143 : f32 to vector<32x128xf32>
    %419 = arith.addf %417, %418 : vector<32x128xf32>
    %420 = arith.mulf %419, %406 : vector<32x128xf32>
    %cst_144 = arith.constant 0.000000e+00 : f32
    %421 = vector.broadcast %cst_144 : f32 to vector<32x128xf32>
    %422 = arith.subf %421, %400 : vector<32x128xf32>
    %423 = arith.mulf %422, %400 : vector<32x128xf32>
    %424 = math.exp %423 : vector<32x128xf32>
    %425 = arith.mulf %420, %424 : vector<32x128xf32>
    %cst_145 = arith.constant 1.000000e+00 : f32
    %426 = vector.broadcast %cst_145 : f32 to vector<32x128xf32>
    %427 = arith.subf %426, %425 : vector<32x128xf32>
    %428 = arith.mulf %399, %427 : vector<32x128xf32>
    %cst_146 = arith.constant 1.000000e+00 : f32
    %429 = vector.broadcast %cst_146 : f32 to vector<32x128xf32>
    %430 = arith.addf %429, %428 : vector<32x128xf32>
    %431 = arith.mulf %392, %430 : vector<32x128xf32>
    %cst_147 = arith.constant dense<0.000000e+00> : vector<32x32xf32>
    %432 = tpu.matmul %431, %254, %cst_147 {dimension_numbers = #tpu.dot_dimension_numbers<[1], [0], [0], [1], [0, 0, 1, 1], [], []>} : vector<32x128xf32>, vector<128x32xf32>, vector<32x32xf32> -> vector<32x32xf32>
    %433 = arith.addf %365, %432 : vector<32x32xf32>
    %434 = vector.broadcast %252 : vector<1x32xf32> to vector<32x32xf32>
    %435 = arith.addf %433, %434 : vector<32x32xf32>
    %c464 = arith.constant 464 : index
    %c0_148 = arith.constant 0 : index
    %436 = vector.load %arg2[%c464, %c0_148] : memref<472x32xf32, #tpu.memory_space<vmem>>, vector<8x32xf32>
    %437 = vector.extract_strided_slice %436 {offsets = [0, 0], sizes = [1, 32], strides = [1, 1]} : vector<8x32xf32> to vector<1x32xf32>
    %438 = vector.extract_strided_slice %436 {offsets = [1, 0], sizes = [1, 32], strides = [1, 1]} : vector<8x32xf32> to vector<1x32xf32>
    %439 = vector.extract_strided_slice %436 {offsets = [2, 0], sizes = [1, 32], strides = [1, 1]} : vector<8x32xf32> to vector<1x32xf32>
    %440 = vector.extract_strided_slice %436 {offsets = [3, 0], sizes = [1, 32], strides = [1, 1]} : vector<8x32xf32> to vector<1x32xf32>
    %c144 = arith.constant 144 : index
    %c0_149 = arith.constant 0 : index
    %441 = vector.load %arg3[%c144, %c0_149] : memref<184x128xf32, #tpu.memory_space<vmem>>, vector<32x128xf32>
    %c176 = arith.constant 176 : index
    %c0_150 = arith.constant 0 : index
    %442 = vector.load %arg3[%c176, %c0_150] : memref<184x128xf32, #tpu.memory_space<vmem>>, vector<8x128xf32>
    %443 = vector.extract_strided_slice %442 {offsets = [0, 0], sizes = [1, 128], strides = [1, 1]} : vector<8x128xf32> to vector<1x128xf32>
    %cst_151 = arith.constant dense<0.000000e+00> : vector<32xf32>
    %444 = vector.multi_reduction <add>, %435, %cst_151 [1] : vector<32x32xf32> to vector<32xf32>
    %445 = vector.shape_cast %444 : vector<32xf32> to vector<32x1xf32>
    %cst_152 = arith.constant 3.200000e+01 : f32
    %446 = vector.broadcast %cst_152 : f32 to vector<32x1xf32>
    %447 = arith.divf %445, %446 : vector<32x1xf32>
    %448 = vector.broadcast %447 : vector<32x1xf32> to vector<32x32xf32>
    %449 = arith.subf %435, %448 : vector<32x32xf32>
    %450 = arith.mulf %449, %449 : vector<32x32xf32>
    %cst_153 = arith.constant dense<0.000000e+00> : vector<32xf32>
    %451 = vector.multi_reduction <add>, %450, %cst_153 [1] : vector<32x32xf32> to vector<32xf32>
    %452 = vector.shape_cast %451 : vector<32xf32> to vector<32x1xf32>
    %cst_154 = arith.constant 3.200000e+01 : f32
    %453 = vector.broadcast %cst_154 : f32 to vector<32x1xf32>
    %454 = arith.divf %452, %453 : vector<32x1xf32>
    %455 = vector.broadcast %447 : vector<32x1xf32> to vector<32x32xf32>
    %456 = arith.subf %435, %455 : vector<32x32xf32>
    %cst_155 = arith.constant 9.99999974E-6 : f32
    %457 = vector.broadcast %cst_155 : f32 to vector<32x1xf32>
    %458 = arith.addf %454, %457 : vector<32x1xf32>
    %459 = math.rsqrt %458 : vector<32x1xf32>
    %460 = vector.broadcast %459 : vector<32x1xf32> to vector<32x32xf32>
    %461 = arith.mulf %456, %460 : vector<32x32xf32>
    %462 = vector.broadcast %437 : vector<1x32xf32> to vector<32x32xf32>
    %463 = arith.mulf %461, %462 : vector<32x32xf32>
    %464 = vector.broadcast %438 : vector<1x32xf32> to vector<32x32xf32>
    %465 = arith.addf %463, %464 : vector<32x32xf32>
    %cst_156 = arith.constant dense<0.000000e+00> : vector<32xf32>
    %466 = vector.multi_reduction <add>, %465, %cst_156 [1] : vector<32x32xf32> to vector<32xf32>
    %467 = vector.shape_cast %466 : vector<32xf32> to vector<32x1xf32>
    %cst_157 = arith.constant 3.200000e+01 : f32
    %468 = vector.broadcast %cst_157 : f32 to vector<32x1xf32>
    %469 = arith.divf %467, %468 : vector<32x1xf32>
    %470 = vector.broadcast %469 : vector<32x1xf32> to vector<32x32xf32>
    %471 = arith.subf %465, %470 : vector<32x32xf32>
    %472 = arith.mulf %471, %471 : vector<32x32xf32>
    %cst_158 = arith.constant dense<0.000000e+00> : vector<32xf32>
    %473 = vector.multi_reduction <add>, %472, %cst_158 [1] : vector<32x32xf32> to vector<32xf32>
    %474 = vector.shape_cast %473 : vector<32xf32> to vector<32x1xf32>
    %cst_159 = arith.constant 3.200000e+01 : f32
    %475 = vector.broadcast %cst_159 : f32 to vector<32x1xf32>
    %476 = arith.divf %474, %475 : vector<32x1xf32>
    %477 = vector.broadcast %469 : vector<32x1xf32> to vector<32x32xf32>
    %478 = arith.subf %465, %477 : vector<32x32xf32>
    %cst_160 = arith.constant 9.99999974E-6 : f32
    %479 = vector.broadcast %cst_160 : f32 to vector<32x1xf32>
    %480 = arith.addf %476, %479 : vector<32x1xf32>
    %481 = math.rsqrt %480 : vector<32x1xf32>
    %482 = vector.broadcast %481 : vector<32x1xf32> to vector<32x32xf32>
    %483 = arith.mulf %478, %482 : vector<32x32xf32>
    %484 = vector.broadcast %439 : vector<1x32xf32> to vector<32x32xf32>
    %485 = arith.mulf %483, %484 : vector<32x32xf32>
    %486 = vector.broadcast %440 : vector<1x32xf32> to vector<32x32xf32>
    %487 = arith.addf %485, %486 : vector<32x32xf32>
    %cst_161 = arith.constant dense<0.000000e+00> : vector<32x128xf32>
    %488 = tpu.matmul %487, %441, %cst_161 {dimension_numbers = #tpu.dot_dimension_numbers<[1], [0], [0], [1], [0, 0, 1, 1], [], []>} : vector<32x32xf32>, vector<32x128xf32>, vector<32x128xf32> -> vector<32x128xf32>
    %489 = vector.broadcast %443 : vector<1x128xf32> to vector<32x128xf32>
    %490 = arith.addf %488, %489 : vector<32x128xf32>
    %c0_162 = arith.constant 0 : index
    %c0_163 = arith.constant 0 : index
    %491 = vector.load %arg6[%c0_162, %c0_163] : memref<32x128xf32, #tpu.memory_space<vmem>>, vector<32x128xf32>
    tpu.vector_store %arg6[%c0_162, %c0_163], %490 {strides = array<i32>} : memref<32x128xf32, #tpu.memory_space<vmem>>, vector<32x128xf32>,
    return
  }
}

</mosaic_0001>

<bundles_post_ra>
// kernel: network_forward.1
= control target key start
LH: loop header
LB: loop body
LE: loop exit
PB: predicated region body
PF: predicated region fallthrough
CT: control target
= control target key end

     0   :  { %11 = vsyncpa [#allocation3], 0  ;;  %s4359_s24 = smov [#allocation2]   ;;  %s6223_s0 = inlined_call_operand.vmem [shape: f32[32,128], index: 0, kind: input, shape index: {}]   ;;  %s6224_s1 = inlined_call_operand.vmem [shape: f32[32,32], index: 1, kind: input, shape index: {}]   ;;  %s6225_s2 = inlined_call_operand.vmem [shape: f32[472,32], index: 2, kind: input, shape index: {}]   ;;  %s6226_s3 = inlined_call_operand.vmem [shape: f32[184,128], index: 3, kind: input, shape index: {}]   ;;  %s6227_s4 = inlined_call_operand.vmem [shape: f32[4,32,32], index: 4, kind: input, shape index: {}]   ;;  %s6228_s5 = inlined_call_operand.vmem [shape: f32[4], index: 5, kind: input, shape index: {}]   ;;  %s6229_s6 = inlined_call_operand.vmem [shape: f32[32,128], index: 6, kind: output, shape index: {}]  }
   0x1   :  { %s27_s23 = sshll.u32 %s6228_s5, 4  ;;  %s28_s23 = int_to_ptr.vmem [resolvable:$true] %s27_s23 }
   0x2   :  { %30 = dma.vmem_to_smem %s28_s23, 16, %s4359_s24, [#allocation3]  }
   0x3   :  { %4357 = dma.done.wait [#allocation3], 16  }
   0x4   :  { %4358 = vsyncadd [#allocation3], 4294967280 }
   0x5   :  { %35 = sfence }
   0x6   :  { %v55_v0 = vld [vmem:[%s6225_s2 + $0x78] sm:$0xff]  ;;  %v54_v1 = vld [vmem:[%s6225_s2 + $0x70] sm:$0xff]  ;;  %v53_v2 = vld [vmem:[%s6225_s2 + $0x68] sm:$0xff]  ;;  %vm119_vm0 = vcmask 261120   ;;  %v4360_v28 = vmov 32.0   ;;  %s4361_s24 = smov 96  }
   0x7   :  { %56 = vmatpush.msra.mxu0 %v55_v0  ;;  %v52_v3 = vld [vmem:[%s6225_s2 + $0x60] sm:$0xff]  ;;  %v51_v4 = vld [vmem:[%s6225_s2 + $0x58] sm:$0xff]  ;;  %v50_v5 = vld [vmem:[%s6225_s2 + $0x50] sm:$0xff]  ;;  %4096 = vrcp.f32 %v4360_v28  ;;  %vm278_vm14 = vcmask 64512   ;;  %s4362_s8 = smov 64   ;;  %s4363_s9 = smov 88  }
   0x8   :  { %v49_v6 = vld [vmem:[%s6225_s2 + $0x48] sm:$0xff]  ;;  %v48_v7 = vld [vmem:[%s6225_s2 + $0x40] sm:$0xff]  ;;  %v47_v8 = vld [vmem:[%s6225_s2 + $0x38] sm:$0xff]  ;;  %s4364_s10 = smov 120   ;;  %s4365_s11 = smov 80  }
   0x9   :  { %57 = vmatpush.msra.mxu0 %v54_v1  ;;  %v46_v9 = vld [vmem:[%s6225_s2 + $0x30] sm:$0xff]  ;;  %v45_v10 = vld [vmem:[%s6225_s2 + $0x28] sm:$0xff]  ;;  %v44_v11 = vld [vmem:[%s6225_s2 + $0x20] sm:$0xff]  ;;  %s4366_s12 = smov 72   ;;  %s4367_s13 = smov 112  }
   0xa   :  { %v43_v12 = vld [vmem:[%s6225_s2 + $0x18] sm:$0xff]  ;;  %v42_v13 = vld [vmem:[%s6225_s2 + $0x10] sm:$0xff]  ;;  %v41_v14 = vld [vmem:[%s6225_s2 + $0x8] sm:$0xff]  ;;  %s4368_s14 = smov 104   ;;  %s3858_s27 = sld [smem:[#allocation2 + $0x1]] }
   0xb   :  { %58 = vmatpush.msra.mxu0 %v53_v2  ;;  %v40_v15 = vld [vmem:[%s6225_s2] sm:$0xff]  ;;  %v37_v17 = vld [vmem:[%s6223_s0 + $0x8] sm:$0xff]  ;;  %v38_v18 = vld [vmem:[%s6223_s0 + $0x10] sm:$0xff]  ;;  %s4369_s20 = smov 56   ;;  %s4944_s21 = sld [smem:[#allocation2 + $0x3]] }
   0xc   :  { %v36_v16 = vld [vmem:[%s6223_s0] sm:$0xff]  ;;  %v39_v19 = vld [vmem:[%s6223_s0 + $0x18] sm:$0xff]  ;;  %v112_v56 = vld [vmem:[%s6226_s3 + $0x10] sm:$0xff]  ;;  %s428_s0 = sld [smem:[#allocation2]]  ;;  %s4370_s30 = smov 48  }
   0xd   :  { %59 = vmatpush.msra.mxu0 %v52_v3  ;;  %v4097_v29 = vpop.eup %4096  ;;  %v113_v55 = vld [vmem:[%s6226_s3 + $0x18] sm:$0xff]  ;;  %v111_v57 = vld [vmem:[%s6226_s3 + $0x8] sm:$0xff]  ;;  %v110_v58 = vld [vmem:[%s6226_s3] sm:$0xff]  ;;  %s4948_s22 = sld [smem:[#allocation2 + $0x2]]  ;;  %s4371_s16 = smov 40  }
   0xe   :  { %v133_v30 = vmul.f32 32.0, %v4097_v29  ;;  %vm137_vm1 = vweird.f32 %v4097_v29  ;;  %249 = vmatpush.msra.mxu1 %v113_v55  ;;  %3997 = vmatpush.msra.mxu3 %v113_v55 }
   0xf   :  { %60 = vmatpush.msra.mxu0 %v51_v4 }
  0x10   :  { %v134_v31 = vsub.f32 1.0, %v133_v30  ;;  %250 = vmatpush.msra.mxu1 %v112_v56  ;;  %3998 = vmatpush.msra.mxu3 %v112_v56  ;;  %s739_s28 = ssub.f32 1.0, %s3858_s27 }
  0x11   :  { %61 = vmatpush.msra.mxu0 %v50_v5  ;;  %s1488_s23 = ssub.f32 1.0, %s4944_s21 }
  0x12   :  { %v135_v32 = vmul.f32 %v4097_v29, %v134_v31  ;;  %251 = vmatpush.msra.mxu1 %v111_v57  ;;  %3999 = vmatpush.msra.mxu3 %v111_v57  ;;  %s429_s15 = ssub.f32 1.0, %s428_s0 }
  0x13   :  { %62 = vmatpush.msra.mxu0 %v49_v6 }
  0x14   :  { %v136_v33 = vadd.f32 %v4097_v29, %v135_v32  ;;  %252 = vmatpush.msra.mxu1 %v110_v58  ;;  %4000 = vmatpush.msra.mxu3 %v110_v58 }
  0x15   :  { %63 = vmatpush.msra.mxu0 %v48_v7 }
  0x16   :  { %v4487_v34 = vsel %vm137_vm1, %v4097_v29, %v136_v33 }
  0x17   :  { %64 = vmatpush.msra.mxu0 %v47_v8  ;;  %v89_v8 = vld [vmem:[%s6225_s2 + $0x80] sm:$0xff] }
  0x19   :  { %65 = vmatpush.msra.mxu0 %v46_v9 }
  0x1b   :  { %66 = vmatpush.msra.mxu0 %v45_v10 }
  0x1d   :  { %67 = vmatpush.msra.mxu0 %v44_v11 }
  0x1f   :  { %68 = vmatpush.msra.mxu0 %v43_v12 }
  0x21   :  { %69 = vmatpush.msra.mxu0 %v42_v13  ;;  %v215_v13 = vperm.slane %v89_v8, 0 }
  0x23   :  { %70 = vmatpush.msra.mxu0 %v41_v14 }
  0x25   :  { %71 = vmatpush.msra.mxu0 %v40_v15 }
  0x26   :  { %72 = vmatmul.f32.vlgmr.msra.gmra.mxu0 %v36_v16 }
  0x2e   :  { %75 = vmatmul.f32.gmra.mxu0 %v37_v17  ;;  %v220_v17 = vperm.slane %v89_v8, 1 }
  0x36   :  { %78 = vmatmul.f32.gmra.mxu0 %v38_v18 }
  0x3e   :  { %81 = vmatmul.f32.gmra.mxu0 %v39_v19 }
  0xa3   :  { %v4471_v20 = vpop.f32.mrf.mxu0 }
  0xa4   :  { %v120_v21 = vsel %vm119_vm0, %v4471_v20, 0.0 }
  0xa5   :  { %121 = vadd.xlane.f32.xlu0 %v120_v21 }
  0xab   :  { %v4475_v22 = vpop.f32.mrf.mxu0 }
  0xac   :  { %v123_v23 = vsel %vm119_vm0, %v4475_v22, 0.0 }
  0xad   :  { %124 = vadd.xlane.f32.xlu1 %v123_v23 }
  0xb3   :  { %v4479_v24 = vpop.f32.mrf.mxu0 }
  0xb4   :  { %v126_v25 = vsel %vm119_vm0, %v4479_v24, 0.0 }
  0xb5   :  { %127 = vadd.xlane.f32.xlu1 %v126_v25 }
  0xbb   :  { %v4483_v26 = vpop.f32.mrf.mxu0 }
  0xbc   :  { %v129_v27 = vsel %vm119_vm0, %v4483_v26, 0.0 }
  0xbd   :  { %130 = vadd.xlane.f32.xlu0 %v129_v27 }
 0x118   :  { %v122_v35 = vpop.xlane.xlu0 %121 }
 0x119   :  { %v139_v36 = vmul.f32 %v4487_v34, %v122_v35 }
 0x11b   :  { %v143_v37 = vsub.f32 %v4471_v20, %v139_v36 }
 0x11d   :  { %v147_v38 = vmul.f32 %v143_v37, %v143_v37 }
 0x11f   :  { %v151_v39 = vsel %vm119_vm0, %v147_v38, 0.0 }
 0x120   :  { %152 = vadd.xlane.f32.xlu2 %v151_v39  ;;  %v125_v40 = vpop.xlane.xlu1 %124 }
 0x121   :  { %v140_v41 = vmul.f32 %v4487_v34, %v125_v40 }
 0x123   :  { %v4494_v42 = vsub.f32 %v4475_v22, %v140_v41 }
 0x125   :  { %v148_v43 = vmul.f32 %v4494_v42, %v4494_v42 }
 0x127   :  { %v154_v44 = vsel %vm119_vm0, %v148_v43, 0.0 }
 0x128   :  { %v128_v45 = vpop.xlane.xlu1 %127  ;;  %155 = vadd.xlane.f32.xlu0 %v154_v44 }
 0x129   :  { %v141_v46 = vmul.f32 %v4487_v34, %v128_v45 }
 0x12b   :  { %v4501_v47 = vsub.f32 %v4479_v24, %v141_v46 }
 0x12d   :  { %v149_v48 = vmul.f32 %v4501_v47, %v4501_v47 }
 0x12f   :  { %v157_v49 = vsel %vm119_vm0, %v149_v48, 0.0 }
 0x130   :  { %158 = vadd.xlane.f32.xlu1 %v157_v49  ;;  %v131_v50 = vpop.xlane.xlu0 %130 }
 0x131   :  { %v142_v51 = vmul.f32 %v4487_v34, %v131_v50 }
 0x133   :  { %v4508_v52 = vsub.f32 %v4483_v26, %v142_v51 }
 0x135   :  { %v150_v53 = vmul.f32 %v4508_v52, %v4508_v52 }
 0x137   :  { %v160_v54 = vsel %vm119_vm0, %v150_v53, 0.0 }
 0x138   :  { %161 = vadd.xlane.f32.xlu2 %v160_v54 }
 0x193   :  { %v153_v59 = vpop.xlane.xlu2 %152 }
 0x194   :  { %v163_v60 = vmul.f32 %v153_v59, %v4487_v34 }
 0x196   :  { %v167_v61 = vadd.f32 1e-05, %v163_v60 }
 0x198   :  { %4098 = vrsqrt.f32 %v167_v61  ;;  %vm177_vm3 = vweird.f32 %v167_v61 }
 0x19b   :  { %v156_v62 = vpop.xlane.xlu0 %155 }
 0x19c   :  { %v164_v63 = vmul.f32 %v156_v62, %v4487_v34 }
 0x19e   :  { %v4099_v0 = vpop.eup %4098  ;;  %v168_v1 = vadd.f32 1e-05, %v164_v63 }
 0x19f   :  { %v172_v2 = vmul.f32 %v4099_v0, %v167_v61  ;;  %vm178_vm2 = vweird.f32 %v4099_v0 }
 0x1a0   :  { %4100 = vrsqrt.f32 %v168_v1  ;;  %vm179_vm4 = vmor %vm177_vm3, %vm178_vm2  ;;  %vm187_vm6 = vweird.f32 %v168_v1 }
 0x1a1   :  { %v173_v3 = vmul.f32 %v4099_v0, %v172_v2 }
 0x1a3   :  { %v174_v4 = vmul.f32 0.5, %v173_v3  ;;  %v159_v5 = vpop.xlane.xlu1 %158 }
 0x1a4   :  { %v165_v6 = vmul.f32 %v159_v5, %v4487_v34  ;;  %v4577_v5 = vld [vmem:[%s6224_s1 + $0x8] sm:$0xff] }
 0x1a5   :  { %v175_v7 = vsub.f32 1.5, %v174_v4 }
 0x1a6   :  { %v4101_v9 = vpop.eup %4100  ;;  %v169_v10 = vadd.f32 1e-05, %v165_v6 }
 0x1a7   :  { %v176_v11 = vmul.f32 %v4099_v0, %v175_v7  ;;  %v182_v12 = vmul.f32 %v4101_v9, %v168_v1  ;;  %vm188_vm5 = vweird.f32 %v4101_v9 }
 0x1a8   :  { %4102 = vrsqrt.f32 %v169_v10  ;;  %vm189_vm7 = vmor %vm187_vm6, %vm188_vm5  ;;  %vm197_vm9 = vweird.f32 %v169_v10 }
 0x1a9   :  { %v183_v14 = vmul.f32 %v4101_v9, %v182_v12  ;;  %v180_v15 = vsel %vm179_vm4, %v4099_v0, %v176_v11  ;;  %v4570_v0 = vld [vmem:[%s6224_s1] sm:$0xff] }
 0x1aa   :  { %v211_v16 = vmul.f32 %v180_v15, %v143_v37  ;;  %v4591_v15 = vld [vmem:[%s6224_s1 + $0x18] sm:$0xff] }
 0x1ab   :  { %v184_v18 = vmul.f32 0.5, %v183_v14  ;;  %v162_v19 = vpop.xlane.xlu2 %161 }
 0x1ac   :  { %v166_v21 = vmul.f32 %v162_v19, %v4487_v34  ;;  %v216_v23 = vmul.f32 %v215_v13, %v211_v16 }
 0x1ad   :  { %v185_v25 = vsub.f32 1.5, %v184_v18 }
 0x1ae   :  { %v4103_v27 = vpop.eup %4102  ;;  %v170_v28 = vadd.f32 1e-05, %v166_v21  ;;  %v221_v29 = vadd.f32 %v220_v17, %v216_v23 }
 0x1af   :  { %v186_v30 = vmul.f32 %v4101_v9, %v185_v25  ;;  %v192_v31 = vmul.f32 %v4103_v27, %v169_v10  ;;  %vm198_vm8 = vweird.f32 %v4103_v27  ;;  %v4584_v10 = vld [vmem:[%s6224_s1 + $0x10] sm:$0xff] }
 0x1b0   :  { %4104 = vrsqrt.f32 %v170_v28  ;;  %3834 = vmatmul.msk.f32.vlgmr.msra.gmra.mxu1 %vm119_vm0, %v221_v29  ;;  %vm199_vm10 = vmor %vm197_vm9, %vm198_vm8  ;;  %vm207_vm12 = vweird.f32 %v170_v28 }
 0x1b1   :  { %v193_v32 = vmul.f32 %v4103_v27, %v192_v31  ;;  %v190_v33 = vsel %vm189_vm7, %v4101_v9, %v186_v30 }
 0x1b2   :  { %v212_v35 = vmul.f32 %v190_v33, %v4494_v42 }
 0x1b3   :  { %v194_v36 = vmul.f32 0.5, %v193_v32 }
 0x1b4   :  { %v217_v37 = vmul.f32 %v215_v13, %v212_v35 }
 0x1b5   :  { %v195_v38 = vsub.f32 1.5, %v194_v36 }
 0x1b6   :  { %v4105_v39 = vpop.eup %4104  ;;  %v222_v40 = vadd.f32 %v220_v17, %v217_v37 }
 0x1b7   :  { %v196_v41 = vmul.f32 %v4103_v27, %v195_v38  ;;  %v202_v43 = vmul.f32 %v4105_v39, %v170_v28  ;;  %vm208_vm11 = vweird.f32 %v4105_v39 }
 0x1b8   :  { %3835 = vmatmul.msk.f32.gmra.mxu1 %vm119_vm0, %v222_v40  ;;  %vm209_vm13 = vmor %vm207_vm12, %vm208_vm11 }
 0x1b9   :  { %v203_v44 = vmul.f32 %v4105_v39, %v202_v43  ;;  %v200_v45 = vsel %vm199_vm10, %v4103_v27, %v196_v41 }
 0x1ba   :  { %v213_v46 = vmul.f32 %v200_v45, %v4501_v47 }
 0x1bb   :  { %v204_v48 = vmul.f32 0.5, %v203_v44 }
 0x1bc   :  { %v218_v49 = vmul.f32 %v215_v13, %v213_v46 }
 0x1bd   :  { %v205_v50 = vsub.f32 1.5, %v204_v48 }
 0x1be   :  { %v223_v42 = vadd.f32 %v220_v17, %v218_v49 }
 0x1bf   :  { %v206_v51 = vmul.f32 %v4105_v39, %v205_v50 }
 0x1c0   :  { %3836 = vmatmul.msk.f32.gmra.mxu1 %vm119_vm0, %v223_v42 }
 0x1c1   :  { %v210_v53 = vsel %vm209_vm13, %v4105_v39, %v206_v51 }
 0x1c2   :  { %v214_v54 = vmul.f32 %v210_v53, %v4508_v52 }
 0x1c4   :  { %v219_v55 = vmul.f32 %v215_v13, %v214_v54 }
 0x1c6   :  { %v224_v56 = vadd.f32 %v220_v17, %v219_v55 }
 0x1c8   :  { %3837 = vmatmul.msk.f32.vlgmr.msra.gmra.mxu3 %vm119_vm0, %v224_v56 }
 0x22d   :  { %v4539_v57 = vpop.f32.mrf.mxu1 }
 0x235   :  { %v4541_v47 = vpop.f32.mrf.mxu1 }
 0x236   :  { %272 = vrot.lane.b32.xlu1 %v4541_v47, %s4361_s24 }
 0x23d   :  { %v4545_v58 = vpop.f32.mrf.mxu1 }
 0x23e   :  { %274 = vrot.lane.b32.xlu0 %v4545_v58, %s4361_s24 }
 0x24b   :  { %v4549_v59 = vpop.f32.mrf.mxu3 }
 0x24c   :  { %276 = vrot.lane.b32.xlu2 %v4549_v59, %s4361_s24  ;;  %v4613_v45 = vpack.i.bf16 %v4545_v58, %v4549_v59 }
 0x254   :  { %270 = vrot.lane.b32.xlu2 %v4539_v57, %s4361_s24 }
 0x2a6   :  { %v277_v52 = vpop.permute.xlu2 %276 }
 0x2a7   :  { %3838 = vmatpush.xpose.msk.msra.mxu2 %vm278_vm14, %v277_v52 }
 0x2a8   :  { %v273_v61 = vpop.permute.xlu1 %272 }
 0x2ae   :  { %v271_v62 = vpop.permute.xlu2 %270 }
 0x2b0   :  { %v275_v60 = vpop.permute.xlu0 %274 }
 0x2b1   :  { %3839 = vmatpush.xpose.msk.msra.mxu2 %vm278_vm14, %v275_v60  ;;  %v435_v60 = vld [vmem:[%s6227_s4] sm:$0xff] }
 0x2b5   :  { %3840 = vmatpush.xpose.msk.msra.mxu2 %vm278_vm14, %v273_v61  ;;  %v4638_v61 = vstv %s428_s0 }
 0x2b9   :  { %3841 = vmatpush.xpose.msk.msra.mxu2 %vm278_vm14, %v271_v62 }
 0x2bc   :  { %3842 = vmatmul.msk.f32.vlgmr.msra.gmra.mxu2 %vm278_vm14, %v4539_v57 }
 0x2c4   :  { %3843 = vmatmul.msk.f32.gmra.mxu2 %vm278_vm14, %v4541_v47 }
 0x2cc   :  { %3844 = vmatmul.msk.f32.gmra.mxu2 %vm278_vm14, %v4545_v58 }
 0x2d4   :  { %3845 = vmatmul.msk.f32.gmra.mxu2 %vm278_vm14, %v4549_v59 }
 0x33f   :  { %v312_v63 = vpop.f32.mrf.mxu2 }
 0x340   :  { %v324_v1 = vmul.f32 0.35355338, %v312_v63 }
 0x342   :  { %v328_v2 = vadd.f32 %v324_v1, %v4570_v0 }
 0x344   :  { %v332_v3 = vsel %vm119_vm0, %v328_v2, -inf }
 0x345   :  { %333 = vmax.xlane.f32.xlu0 %v332_v3  ;;  %v4640_v3 = vstv %s429_s15 }
 0x347   :  { %v315_v4 = vpop.f32.mrf.mxu2 }
 0x348   :  { %v325_v6 = vmul.f32 0.35355338, %v315_v4 }
 0x34a   :  { %v329_v7 = vadd.f32 %v325_v6, %v4577_v5 }
 0x34c   :  { %v335_v8 = vsel %vm119_vm0, %v329_v7, -inf }
 0x34d   :  { %336 = vmax.xlane.f32.xlu2 %v335_v8 }
 0x34f   :  { %v318_v9 = vpop.f32.mrf.mxu2 }
 0x350   :  { %v326_v11 = vmul.f32 0.35355338, %v318_v9 }
 0x352   :  { %v330_v12 = vadd.f32 %v326_v11, %v4584_v10 }
 0x354   :  { %v338_v13 = vsel %vm119_vm0, %v330_v12, -inf }
 0x355   :  { %339 = vmax.xlane.f32.xlu1 %v338_v13 }
 0x357   :  { %v321_v14 = vpop.f32.mrf.mxu2 }
 0x358   :  { %v327_v16 = vmul.f32 0.35355338, %v321_v14 }
 0x35a   :  { %v331_v17 = vadd.f32 %v327_v16, %v4591_v15 }
 0x35c   :  { %v341_v18 = vsel %vm119_vm0, %v331_v17, -inf }
 0x35d   :  { %342 = vmax.xlane.f32.xlu0 %v341_v18  ;;  %v436_v18 = vld [vmem:[%s6227_s4 + $0x8] sm:$0xff] }
 0x3b8   :  { %v334_v19 = vpop.xlane.xlu0 %333 }
 0x3b9   :  { %v344_v21 = vsub.f32 %v328_v2, %v334_v19 }
 0x3bb   :  { %v348_v23 = vmul.f32 1.442695, %v344_v21 }
 0x3bd   :  { %4106 = vpow2.f32 %v348_v23 }
 0x3c0   :  { %v337_v25 = vpop.xlane.xlu2 %336 }
 0x3c1   :  { %v345_v27 = vsub.f32 %v329_v7, %v337_v25  ;;  %v440_v7 = vmul.f32 %v4638_v61, %v435_v60 }
 0x3c3   :  { %v4595_v28 = vpop.eup %4106  ;;  %v350_v29 = vmul.f32 1.442695, %v345_v27 }
 0x3c4   :  { %v356_v30 = vsel %vm119_vm0, %v4595_v28, 0.0 }
 0x3c5   :  { %4108 = vpow2.f32 %v350_v29  ;;  %357 = vadd.xlane.f32.xlu2 %v356_v30  ;;  %v441_v30 = vmul.f32 %v4638_v61, %v436_v18 }
 0x3c8   :  { %v340_v31 = vpop.xlane.xlu1 %339 }
 0x3c9   :  { %v346_v32 = vsub.f32 %v330_v12, %v340_v31 }
 0x3cb   :  { %v4599_v33 = vpop.eup %4108  ;;  %v352_v35 = vmul.f32 1.442695, %v346_v32 }
 0x3cc   :  { %v359_v36 = vsel %vm119_vm0, %v4599_v33, 0.0 }
 0x3cd   :  { %4110 = vpow2.f32 %v352_v35  ;;  %360 = vadd.xlane.f32.xlu1 %v359_v36 }
 0x3d0   :  { %v343_v37 = vpop.xlane.xlu0 %342 }
 0x3d1   :  { %v347_v38 = vsub.f32 %v331_v17, %v343_v37 }
 0x3d3   :  { %v4603_v39 = vpop.eup %4110  ;;  %v354_v40 = vmul.f32 1.442695, %v347_v38 }
 0x3d4   :  { %v362_v41 = vsel %vm119_vm0, %v4603_v39, 0.0 }
 0x3d5   :  { %4112 = vpow2.f32 %v354_v40  ;;  %363 = vadd.xlane.f32.xlu0 %v362_v41 }
 0x3db   :  { %v4607_v43 = vpop.eup %4112 }
 0x3dc   :  { %v365_v44 = vsel %vm119_vm0, %v4607_v43, 0.0 }
 0x3dd   :  { %366 = vadd.xlane.f32.xlu2 %v365_v44  ;;  %v437_v44 = vld [vmem:[%s6227_s4 + $0x10] sm:$0xff] }
 0x3f5   :  { %4017 = vrot.lane.b32.xlu2 %v4613_v45, %s4362_s8 }
 0x3fd   :  { %585 = vrot.lane.b32.xlu2 %v4545_v58, %s4363_s9 }
 0x405   :  { %581 = vrot.lane.b32.xlu2 %v4539_v57, %s4363_s9 }
 0x40d   :  { %575 = vrot.lane.b32.xlu2 %v4541_v47, %s4364_s10 }
 0x415   :  { %980 = vrot.lane.b32.xlu2 %v4549_v59, %s4365_s11 }
 0x41d   :  { %1336 = vrot.lane.b32.xlu2 %v4549_v59, %s4366_s12 }
 0x425   :  { %966 = vrot.lane.b32.xlu2 %v4539_v57, %s4367_s13 }
 0x42d   :  { %968 = vrot.lane.b32.xlu2 %v4541_v47, %s4367_s13 }
 0x435   :  { %1324 = vrot.lane.b32.xlu2 %v4541_v47, %s4368_s14 }
 0x438   :  { %v358_v46 = vpop.xlane.xlu2 %357 }
 0x439   :  { %4114 = vrcp.f32 %v358_v46  ;;  %v379_v51 = vand.u32 2147483648, %v358_v46  ;;  %v377_v54 = vand.u32 2147483647, %v358_v46  ;;  %vm373_vm1 = vweird.f32 %v358_v46 }
 0x43b   :  { %v380_v52 = vor.u32 1.1754944e-38, %v379_v51  ;;  %vm378_vm3 = vcmp.eq.f32.partialorder %v377_v54, 8.507059e+37  ;;  %v442_v54 = vmul.f32 %v4638_v61, %v437_v44 }
 0x43d   :  { %1328 = vrot.lane.b32.xlu2 %v4549_v59, %s4368_s14 }
 0x43f   :  { %v4115_v48 = vpop.eup %4114 }
 0x440   :  { %v369_v49 = vmul.f32 %v4115_v48, %v358_v46  ;;  %v361_v50 = vpop.xlane.xlu1 %360  ;;  %vm374_vm15 = vweird.f32 %v4115_v48 }
 0x441   :  { %4116 = vrcp.f32 %v361_v50  ;;  %vm375_vm2 = vmor %vm373_vm1, %vm374_vm15  ;;  %v394_v8 = vand.u32 2147483648, %v361_v50  ;;  %v392_v12 = vand.u32 2147483647, %v361_v50  ;;  %vm388_vm5 = vweird.f32 %v361_v50 }
 0x442   :  { %v370_v42 = vsub.f32 1.0, %v369_v49 }
 0x443   :  { %v395_v17 = vor.u32 1.1754944e-38, %v394_v8  ;;  %vm393_vm7 = vcmp.eq.f32.partialorder %v392_v12, 8.507059e+37 }
 0x444   :  { %v371_v53 = vmul.f32 %v4115_v48, %v370_v42 }
 0x446   :  { %v372_v55 = vadd.f32 %v4115_v48, %v371_v53 }
 0x447   :  { %v4117_v56 = vpop.eup %4116 }
 0x448   :  { %v384_v62 = vmul.f32 %v4117_v56, %v361_v50  ;;  %v364_v63 = vpop.xlane.xlu0 %363  ;;  %v376_v1 = vsel %vm375_vm2, %v4115_v48, %v372_v55  ;;  %vm389_vm4 = vweird.f32 %v4117_v56 }
 0x449   :  { %4118 = vrcp.f32 %v364_v63  ;;  %v381_v2 = vsel %vm378_vm3, %v380_v52, %v376_v1  ;;  %vm390_vm6 = vmor %vm388_vm5, %vm389_vm4  ;;  %v409_v31 = vand.u32 2147483648, %v364_v63  ;;  %v407_v36 = vand.u32 2147483647, %v364_v63 }
 0x44a   :  { %v385_v4 = vsub.f32 1.0, %v384_v62  ;;  %v382_v6 = vmul.f32 %v4595_v28, %v381_v2  ;;  %vm403_vm9 = vweird.f32 %v364_v63 }
 0x44b   :  { %v410_v41 = vor.u32 1.1754944e-38, %v409_v31  ;;  %vm408_vm11 = vcmp.eq.f32.partialorder %v407_v36, 8.507059e+37 }
 0x44c   :  { %v386_v9 = vmul.f32 %v4117_v56, %v385_v4  ;;  %v431_v11 = vmul.f32 %v4640_v3, %v382_v6  ;;  %v438_v4 = vld [vmem:[%s6227_s4 + $0x18] sm:$0xff] }
 0x44d   :  { %v443_v12 = vmul.f32 %v4638_v61, %v438_v4 }
 0x44e   :  { %v4645_v13 = vadd.f32 %v440_v7, %v431_v11  ;;  %v387_v14 = vadd.f32 %v4117_v56, %v386_v9 }
 0x44f   :  { %v4119_v16 = vpop.eup %4118 }
 0x450   :  { %v399_v19 = vmul.f32 %v4119_v16, %v364_v63  ;;  %v367_v21 = vpop.xlane.xlu2 %366  ;;  %v448_v23 = vsel %vm119_vm0, %v4645_v13, 0.0  ;;  %v391_v25 = vsel %vm390_vm6, %v4117_v56, %v387_v14  ;;  %vm404_vm8 = vweird.f32 %v4119_v16  ;;  %v4668_v63 = vld [vmem:[%s6225_s2 + $0x88] sm:$0xff] }
 0x451   :  { %4120 = vrcp.f32 %v367_v21  ;;  %449 = vadd.xlane.f32.xlu1 %v448_v23  ;;  %v396_v27 = vsel %vm393_vm7, %v395_v17, %v391_v25  ;;  %vm405_vm10 = vmor %vm403_vm9, %vm404_vm8  ;;  %v424_v55 = vand.u32 2147483648, %v367_v21  ;;  %v422_v62 = vand.u32 2147483647, %v367_v21  ;;  %952 = vmatpush.msrb.mxu0 %v4668_v63 }
 0x452   :  { %v400_v28 = vsub.f32 1.0, %v399_v19  ;;  %v397_v29 = vmul.f32 %v4599_v33, %v396_v27  ;;  %vm418_vm13 = vweird.f32 %v367_v21  ;;  %v4691_v19 = vpack.i.bf16 %v4539_v57, %v4541_v47 }
 0x453   :  { %v425_v2 = vor.u32 1.1754944e-38, %v424_v55  ;;  %vm423_vm1 = vcmp.eq.f32.partialorder %v422_v62, 8.507059e+37 }
 0x454   :  { %v401_v32 = vmul.f32 %v4119_v16, %v400_v28  ;;  %v432_v35 = vmul.f32 %v4640_v3, %v397_v29 }
 0x456   :  { %v4655_v37 = vadd.f32 %v441_v30, %v432_v35  ;;  %v402_v38 = vadd.f32 %v4119_v16, %v401_v32 }
 0x457   :  { %v4121_v40 = vpop.eup %4120 }
 0x458   :  { %v414_v33 = vmul.f32 %v4121_v40, %v367_v21  ;;  %v4018_v46 = vpop.permute.xlu2 %4017  ;;  %v451_v48 = vsel %vm119_vm0, %v4655_v37, 0.0  ;;  %v406_v49 = vsel %vm405_vm10, %v4119_v16, %v402_v38  ;;  %vm419_vm12 = vweird.f32 %v4121_v40 }
 0x459   :  { %452 = vadd.xlane.f32.xlu0 %v451_v48  ;;  %v4019_v50 = vunpack.i.l.bf16 %v4018_v46  ;;  %v411_v42 = vsel %vm408_vm11, %v410_v41, %v406_v49  ;;  %v4020_v56 = vunpack.i.h.bf16 %v4018_v46  ;;  %vm420_vm15 = vmor %vm418_vm13, %vm419_vm12 }
 0x45a   :  { %v415_v51 = vsub.f32 1.0, %v414_v33  ;;  %v412_v53 = vmul.f32 %v4603_v39, %v411_v42 }
 0x45b   :  { %556 = vmatpush.msrb.mxu3 %v4019_v50 }
 0x45c   :  { %v416_v52 = vmul.f32 %v4121_v40, %v415_v51  ;;  %v433_v60 = vmul.f32 %v4640_v3, %v412_v53 }
 0x45d   :  { %557 = vmatpush.msrb.mxu3 %v4020_v56 }
 0x45e   :  { %v4670_v1 = vadd.f32 %v442_v54, %v433_v60  ;;  %v417_v39 = vadd.f32 %v4121_v40, %v416_v52 }
 0x460   :  { %v4676_v6 = vpop.permute.xlu2 %585  ;;  %v454_v7 = vsel %vm119_vm0, %v4670_v1, 0.0  ;;  %v421_v8 = vsel %vm420_vm15, %v4121_v40, %v417_v39 }
 0x461   :  { %455 = vadd.xlane.f32.xlu1 %v454_v7  ;;  %v426_v9 = vsel %vm423_vm1, %v425_v2, %v421_v8 }
 0x462   :  { %v427_v11 = vmul.f32 %v4607_v43, %v426_v9 }
 0x464   :  { %v434_v14 = vmul.f32 %v4640_v3, %v427_v11 }
 0x466   :  { %v4683_v16 = vadd.f32 %v443_v12, %v434_v14 }
 0x468   :  { %v4685_v17 = vpop.permute.xlu2 %581  ;;  %v457_v18 = vsel %vm119_vm0, %v4683_v16, 0.0 }
 0x469   :  { %458 = vadd.xlane.f32.xlu1 %v457_v18 }
 0x46d   :  { %4022 = vrot.lane.b32.xlu0 %v4691_v19, %s4362_s8 }
 0x470   :  { %v4695_v43 = vpop.permute.xlu2 %575 }
 0x475   :  { %583 = vrot.lane.b32.xlu0 %v4541_v47, %s4363_s9 }
 0x478   :  { %v4699_v61 = vpop.permute.xlu2 %980 }
 0x47d   :  { %573 = vrot.lane.b32.xlu0 %v4539_v57, %s4364_s10 }
 0x480   :  { %v1337_v3 = vpop.permute.xlu2 %1336 }
 0x481   :  { %3896 = vmatpush.xpose.msk.msra.mxu0 %vm278_vm14, %v1337_v3 }
 0x482   :  { %587 = vrot.lane.b32.xlu1 %v4549_v59, %s4363_s9 }
 0x485   :  { %577 = vrot.lane.b32.xlu0 %v4545_v58, %s4364_s10 }
 0x48a   :  { %579 = vrot.lane.b32.xlu1 %v4549_v59, %s4364_s10 }
 0x48d   :  { %978 = vrot.lane.b32.xlu0 %v4545_v58, %s4365_s11 }
 0x492   :  { %976 = vrot.lane.b32.xlu1 %v4541_v47, %s4365_s11 }
 0x495   :  { %974 = vrot.lane.b32.xlu0 %v4539_v57, %s4365_s11 }
 0x49a   :  { %1334 = vrot.lane.b32.xlu1 %v4545_v58, %s4366_s12 }
 0x49d   :  { %1332 = vrot.lane.b32.xlu0 %v4541_v47, %s4366_s12 }
 0x4a2   :  { %1330 = vrot.lane.b32.xlu1 %v4539_v57, %s4366_s12 }
 0x4a5   :  { %1322 = vrot.lane.b32.xlu0 %v4539_v57, %s4368_s14 }
 0x4aa   :  { %970 = vrot.lane.b32.xlu1 %v4545_v58, %s4367_s13 }
 0x4ad   :  { %972 = vrot.lane.b32.xlu0 %v4549_v59, %s4367_s13 }
 0x4b2   :  { %1326 = vrot.lane.b32.xlu1 %v4545_v58, %s4368_s14 }
 0x4c4   :  { %v450_v21 = vpop.xlane.xlu1 %449 }
 0x4c5   :  { %4122 = vrcp.f32 %v450_v21  ;;  %v471_v35 = vand.u32 2147483648, %v450_v21  ;;  %vm465_vm3 = vweird.f32 %v450_v21  ;;  %v469_v36 = vand.u32 2147483647, %v450_v21 }
 0x4c7   :  { %v472_v44 = vor.u32 1.1754944e-38, %v471_v35  ;;  %vm470_vm5 = vcmp.eq.f32.partialorder %v469_v36, 8.507059e+37 }
 0x4cb   :  { %v4123_v23 = vpop.eup %4122 }
 0x4cc   :  { %v453_v25 = vpop.xlane.xlu0 %452  ;;  %v461_v47 = vmul.f32 %v4123_v23, %v450_v21  ;;  %vm466_vm2 = vweird.f32 %v4123_v23 }
 0x4cd   :  { %4124 = vrcp.f32 %v453_v25  ;;  %vm467_vm4 = vmor %vm465_vm3, %vm466_vm2  ;;  %v486_v51 = vand.u32 2147483648, %v453_v25  ;;  %vm480_vm7 = vweird.f32 %v453_v25  ;;  %v484_v55 = vand.u32 2147483647, %v453_v25 }
 0x4ce   :  { %v462_v27 = vsub.f32 1.0, %v461_v47 }
 0x4cf   :  { %v487_v62 = vor.u32 1.1754944e-38, %v486_v51  ;;  %vm485_vm9 = vcmp.eq.f32.partialorder %v484_v55, 8.507059e+37 }
 0x4d0   :  { %v463_v30 = vmul.f32 %v4123_v23, %v462_v27 }
 0x4d2   :  { %v464_v32 = vadd.f32 %v4123_v23, %v463_v30 }
 0x4d3   :  { %v4125_v28 = vpop.eup %4124 }
 0x4d4   :  { %v456_v29 = vpop.xlane.xlu1 %455  ;;  %v476_v57 = vmul.f32 %v4125_v28, %v453_v25  ;;  %v468_v40 = vsel %vm467_vm4, %v4123_v23, %v464_v32  ;;  %vm481_vm6 = vweird.f32 %v4125_v28 }
 0x4d5   :  { %4126 = vrcp.f32 %v456_v29  ;;  %v473_v48 = vsel %vm470_vm5, %v472_v44, %v468_v40  ;;  %vm482_vm8 = vmor %vm480_vm7, %vm481_vm6  ;;  %v501_v8 = vand.u32 2147483648, %v456_v29  ;;  %vm495_vm11 = vweird.f32 %v456_v29 }
 0x4d6   :  { %v477_v31 = vsub.f32 1.0, %v476_v57  ;;  %v474_v54 = vmul.f32 %v473_v48, %v4645_v13  ;;  %v499_v13 = vand.u32 2147483647, %v456_v29 }
 0x4d7   :  { %v502_v14 = vor.u32 1.1754944e-38, %v501_v8 }
 0x4d8   :  { %v478_v41 = vmul.f32 %v4125_v28, %v477_v31  ;;  %vm500_vm13 = vcmp.eq.f32.partialorder %v499_v13, 8.507059e+37 }
 0x4da   :  { %v479_v50 = vadd.f32 %v4125_v28, %v478_v41 }
 0x4db   :  { %v4127_v59 = vpop.eup %4126 }
 0x4dc   :  { %v459_v58 = vpop.xlane.xlu1 %458  ;;  %v491_v38 = vmul.f32 %v4127_v59, %v456_v29  ;;  %v483_v52 = vsel %vm482_vm8, %v4125_v28, %v479_v50  ;;  %vm496_vm10 = vweird.f32 %v4127_v59 }
 0x4dd   :  { %4128 = vrcp.f32 %v459_v58  ;;  %v488_v2 = vsel %vm485_vm9, %v487_v62, %v483_v52  ;;  %vm497_vm12 = vmor %vm495_vm11, %vm496_vm10  ;;  %v516_v23 = vand.u32 2147483648, %v459_v58  ;;  %vm510_vm1 = vweird.f32 %v459_v58 }
 0x4de   :  { %v492_v49 = vsub.f32 1.0, %v491_v38  ;;  %v489_v9 = vmul.f32 %v488_v2, %v4655_v37  ;;  %v514_v47 = vand.u32 2147483647, %v459_v58 }
 0x4df   :  { %v4023_v33 = vpop.permute.xlu0 %4022  ;;  %v517_v28 = vor.u32 1.1754944e-38, %v516_v23 }
 0x4e0   :  { %v4024_v46 = vunpack.i.l.bf16 %v4023_v33  ;;  %v4025_v42 = vunpack.i.h.bf16 %v4023_v33  ;;  %v493_v60 = vmul.f32 %v4127_v59, %v492_v49  ;;  %vm515_vm3 = vcmp.eq.f32.partialorder %v514_v47, 8.507059e+37 }
 0x4e2   :  { %558 = vmatpush.msrb.mxu3 %v4024_v46  ;;  %v494_v7 = vadd.f32 %v4127_v59, %v493_v60 }
 0x4e3   :  { %v4129_v53 = vpop.eup %4128 }
 0x4e4   :  { %559 = vmatpush.msrb.mxu3 %v4025_v42  ;;  %v506_v56 = vmul.f32 %v4129_v53, %v459_v58  ;;  %v498_v11 = vsel %vm497_vm12, %v4127_v59, %v494_v7  ;;  %vm511_vm15 = vweird.f32 %v4129_v53 }
 0x4e5   :  { %3846 = vmatmul.msk.f32.vlgmr.msrb.gmra.mxu3 %vm119_vm0, %v474_v54  ;;  %v503_v3 = vsel %vm500_vm13, %v502_v14, %v498_v11  ;;  %vm512_vm2 = vmor %vm510_vm1, %vm511_vm15 }
 0x4e6   :  { %v507_v4 = vsub.f32 1.0, %v506_v56  ;;  %v504_v25 = vmul.f32 %v503_v3, %v4670_v1 }
 0x4e7   :  { %v584_v39 = vpop.permute.xlu0 %583 }
 0x4e8   :  { %v508_v12 = vmul.f32 %v4129_v53, %v507_v4 }
 0x4ea   :  { %v509_v21 = vadd.f32 %v4129_v53, %v508_v12 }
 0x4ec   :  { %v513_v37 = vsel %vm512_vm2, %v4129_v53, %v509_v21 }
 0x4ed   :  { %3847 = vmatmul.msk.f32.gmra.mxu3 %vm119_vm0, %v489_v9  ;;  %v518_v30 = vsel %vm515_vm3, %v517_v28, %v513_v37 }
 0x4ee   :  { %v519_v57 = vmul.f32 %v518_v30, %v4683_v16 }
 0x4ef   :  { %v574_v18 = vpop.permute.xlu0 %573 }
 0x4f4   :  { %v588_v27 = vpop.permute.xlu1 %587 }
 0x4f5   :  { %3848 = vmatmul.msk.f32.gmra.mxu3 %vm119_vm0, %v504_v25  ;;  %3850 = vmatpush.xpose.msk.msrb.mxu1 %vm278_vm14, %v588_v27 }
 0x4f7   :  { %v578_v29 = vpop.permute.xlu0 %577 }
 0x4f9   :  { %3851 = vmatpush.xpose.msk.msrb.mxu1 %vm278_vm14, %v4676_v6 }
 0x4fc   :  { %v580_v31 = vpop.permute.xlu1 %579 }
 0x4fd   :  { %3849 = vmatmul.msk.f32.gmra.mxu3 %vm119_vm0, %v519_v57  ;;  %3852 = vmatpush.xpose.msk.msrb.mxu1 %vm278_vm14, %v584_v39 }
 0x4ff   :  { %v979_v1 = vpop.permute.xlu0 %978 }
 0x501   :  { %3853 = vmatpush.xpose.msk.msrb.mxu1 %vm278_vm14, %v4685_v17 }
 0x504   :  { %v977_v32 = vpop.permute.xlu1 %976  ;;  %3854 = vmatmul.msk.f32.vlgmr.msrb.gmra.mxu1 %vm278_vm14, %v574_v18 }
 0x505   :  { %4001 = vmatpush.msra.mxu1 %v4668_v63 }
 0x507   :  { %3875 = vmatpush.xpose.msk.msrb.mxu1 %vm278_vm14, %v4699_v61  ;;  %v975_v6 = vpop.permute.xlu0 %974 }
 0x50b   :  { %3876 = vmatpush.xpose.msk.msrb.mxu1 %vm278_vm14, %v979_v1 }
 0x50c   :  { %v1335_v16 = vpop.permute.xlu1 %1334  ;;  %3855 = vmatmul.msk.f32.gmra.mxu1 %vm278_vm14, %v4695_v43  ;;  %v967_v43 = vpop.permute.xlu2 %966 }
 0x50d   :  { %3897 = vmatpush.xpose.msk.msra.mxu0 %vm278_vm14, %v1335_v16 }
 0x50f   :  { %3877 = vmatpush.xpose.msk.msrb.mxu1 %vm278_vm14, %v977_v32  ;;  %v1333_v17 = vpop.permute.xlu0 %1332 }
 0x511   :  { %3898 = vmatpush.xpose.msk.msra.mxu0 %vm278_vm14, %v1333_v17 }
 0x513   :  { %3878 = vmatpush.xpose.msk.msrb.mxu1 %vm278_vm14, %v975_v6 }
 0x514   :  { %v1331_v63 = vpop.permute.xlu1 %1330  ;;  %3856 = vmatmul.msk.f32.gmra.mxu1 %vm278_vm14, %v578_v29  ;;  %v969_v59 = vpop.permute.xlu2 %968 }
 0x515   :  { %3899 = vmatpush.xpose.msk.msra.mxu0 %vm278_vm14, %v1331_v63 }
 0x517   :  { %v1323_v36 = vpop.permute.xlu0 %1322 }
 0x51c   :  { %3857 = vmatmul.msk.f32.gmra.mxu1 %vm278_vm14, %v580_v31  ;;  %v971_v38 = vpop.permute.xlu1 %970  ;;  %v1325_v40 = vpop.permute.xlu2 %1324 }
 0x51f   :  { %v973_v7 = vpop.permute.xlu0 %972 }
 0x524   :  { %v1327_v49 = vpop.permute.xlu1 %1326  ;;  %v1329_v54 = vpop.permute.xlu2 %1328 }
 0x568   :  { %v561_v61 = vpop.f32.mrf.mxu3 }
 0x569   :  { %3871 = vmatmul.msk.f32.vlgmr.msrb.gmra.mxu0 %vm278_vm14, %v561_v61 }
 0x570   :  { %v564_v35 = vpop.f32.mrf.mxu3 }
 0x571   :  { %3872 = vmatmul.msk.f32.gmra.mxu0 %vm278_vm14, %v564_v35 }
 0x578   :  { %v567_v58 = vpop.f32.mrf.mxu3 }
 0x579   :  { %3873 = vmatmul.msk.f32.vlgmr.msra.gmra.mxu1 %vm278_vm14, %v567_v58  ;;  %3900 = vmatmul.msk.f32.vlgmr.msra.gmra.mxu0 %vm278_vm14, %v1323_v36 }
 0x580   :  { %v570_v41 = vpop.f32.mrf.mxu3 }
 0x581   :  { %v622_v44 = vpop.f32.mrf.mxu1  ;;  %3874 = vmatmul.msk.f32.gmra.mxu1 %vm278_vm14, %v570_v41  ;;  %3901 = vmatmul.msk.f32.gmra.mxu0 %vm278_vm14, %v1325_v40 }
 0x582   :  { %v634_v33 = vmul.f32 0.35355338, %v622_v44 }
 0x584   :  { %v638_v46 = vadd.f32 %v634_v33, %v4570_v0 }
 0x586   :  { %v642_v48 = vsel %vm119_vm0, %v638_v46, -inf }
 0x587   :  { %643 = vmax.xlane.f32.xlu0 %v642_v48 }
 0x589   :  { %v625_v50 = vpop.f32.mrf.mxu1  ;;  %3879 = vmatmul.msk.f32.vlgmr.msrb.gmra.mxu1 %vm278_vm14, %v967_v43  ;;  %3902 = vmatmul.msk.f32.gmra.mxu0 %vm278_vm14, %v1327_v49 }
 0x58a   :  { %v635_v42 = vmul.f32 0.35355338, %v625_v50 }
 0x58c   :  { %v639_v51 = vadd.f32 %v635_v42, %v4577_v5 }
 0x58e   :  { %v645_v53 = vsel %vm119_vm0, %v639_v51, -inf }
 0x58f   :  { %646 = vmax.xlane.f32.xlu1 %v645_v53 }
 0x591   :  { %v628_v55 = vpop.f32.mrf.mxu1  ;;  %3880 = vmatmul.msk.f32.gmra.mxu1 %vm278_vm14, %v969_v59  ;;  %3903 = vmatmul.msk.f32.gmra.mxu0 %vm278_vm14, %v1329_v54 }
 0x592   :  { %v636_v56 = vmul.f32 0.35355338, %v628_v55 }
 0x594   :  { %v640_v52 = vadd.f32 %v636_v56, %v4584_v10 }
 0x596   :  { %v648_v60 = vsel %vm119_vm0, %v640_v52, -inf }
 0x597   :  { %649 = vmax.xlane.f32.xlu2 %v648_v60 }
 0x599   :  { %v631_v62 = vpop.f32.mrf.mxu1  ;;  %3881 = vmatmul.msk.f32.gmra.mxu1 %vm278_vm14, %v971_v38 }
 0x59a   :  { %v637_v39 = vmul.f32 0.35355338, %v631_v62 }
 0x59c   :  { %v641_v2 = vadd.f32 %v637_v39, %v4591_v15 }
 0x59e   :  { %v651_v4 = vsel %vm119_vm0, %v641_v2, -inf }
 0x59f   :  { %652 = vmax.xlane.f32.xlu0 %v651_v4 }
 0x5a1   :  { %3882 = vmatmul.msk.f32.gmra.mxu1 %vm278_vm14, %v973_v7 }
 0x5e6   :  { %v4778_v8 = vpop.f32.mrf.mxu0 }
 0x5ee   :  { %v4782_v12 = vpop.f32.mrf.mxu0 }
 0x5f6   :  { %v4780_v9 = vpop.f32.mrf.mxu1  ;;  %v1371_v37 = vpop.f32.mrf.mxu0 }
 0x5f7   :  { %v1383_v40 = vmul.f32 0.35355338, %v1371_v37 }
 0x5fa   :  { %v644_v13 = vpop.xlane.xlu0 %643 }
 0x5fb   :  { %v654_v11 = vsub.f32 %v638_v46, %v644_v13  ;;  %v4813_v46 = vadd.f32 %v1383_v40, %v4570_v0 }
 0x5fd   :  { %v658_v14 = vmul.f32 1.442695, %v654_v11  ;;  %v1391_v42 = vsel %vm119_vm0, %v4813_v46, -inf }
 0x5fe   :  { %v4784_v18 = vpop.f32.mrf.mxu1  ;;  %v1374_v16 = vpop.f32.mrf.mxu0 }
 0x5ff   :  { %4130 = vpow2.f32 %v658_v14  ;;  %v1384_v35 = vmul.f32 0.35355338, %v1374_v16 }
 0x601   :  { %v4804_v36 = vadd.f32 %v1384_v35, %v4577_v5 }
 0x602   :  { %v647_v3 = vpop.xlane.xlu1 %646 }
 0x603   :  { %v655_v21 = vsub.f32 %v639_v51, %v647_v3  ;;  %v1394_v33 = vsel %vm119_vm0, %v4804_v36, -inf  ;;  %v3859_v3 = vld [vmem:[%s6227_s4 + $0x20] sm:$0xff] }
 0x605   :  { %v4786_v23 = vpop.eup %4130  ;;  %v660_v25 = vmul.f32 1.442695, %v655_v21  ;;  %v4830_v21 = vstv %s3858_s27  ;;  %s1132_s27 = ssub.f32 1.0, %s4948_s22 }
 0x606   :  { %v1015_v47 = vpop.f32.mrf.mxu1  ;;  %v666_v27 = vsel %vm119_vm0, %v4786_v23, 0.0  ;;  %v1377_v58 = vpop.f32.mrf.mxu0 }
 0x607   :  { %4132 = vpow2.f32 %v660_v25  ;;  %v1027_v28 = vmul.f32 0.35355338, %v1015_v47  ;;  %667 = vadd.xlane.f32.xlu0 %v666_v27  ;;  %v1385_v41 = vmul.f32 0.35355338, %v1377_v58  ;;  %v4832_v27 = vstv %s739_s28  ;;  %v3860_v58 = vld [vmem:[%s6227_s4 + $0x28] sm:$0xff] }
 0x609   :  { %v4791_v29 = vadd.f32 %v1027_v28, %v4570_v0  ;;  %v4816_v48 = vadd.f32 %v1385_v41, %v4584_v10  ;;  %v751_v28 = vmul.f32 %v3859_v3, %v4830_v21 }
 0x60a   :  { %v650_v30 = vpop.xlane.xlu2 %649 }
 0x60b   :  { %v656_v57 = vsub.f32 %v640_v52, %v650_v30  ;;  %v1035_v31 = vsel %vm119_vm0, %v4791_v29, -inf  ;;  %v1397_v51 = vsel %vm119_vm0, %v4816_v48, -inf }
 0x60c   :  { %1036 = vmax.xlane.f32.xlu1 %v1035_v31 }
 0x60d   :  { %v4795_v1 = vpop.eup %4132  ;;  %v662_v32 = vmul.f32 1.442695, %v656_v57 }
 0x60e   :  { %v669_v6 = vsel %vm119_vm0, %v4795_v1, 0.0  ;;  %v1018_v49 = vpop.f32.mrf.mxu1 }
 0x60f   :  { %4134 = vpow2.f32 %v662_v32  ;;  %670 = vadd.xlane.f32.xlu0 %v669_v6  ;;  %v1028_v50 = vmul.f32 0.35355338, %v1018_v49 }
 0x611   :  { %v4823_v53 = vadd.f32 %v1028_v50, %v4577_v5  ;;  %v752_v50 = vmul.f32 %v3860_v58, %v4830_v21 }
 0x612   :  { %v653_v17 = vpop.xlane.xlu0 %652 }
 0x613   :  { %v657_v63 = vsub.f32 %v641_v2, %v653_v17  ;;  %v1038_v0 = vsel %vm119_vm0, %v4823_v53, -inf }
 0x615   :  { %v4799_v61 = vpop.eup %4134  ;;  %v664_v43 = vmul.f32 1.442695, %v657_v63 }
 0x616   :  { %v672_v59 = vsel %vm119_vm0, %v4799_v61, 0.0 }
 0x617   :  { %4136 = vpow2.f32 %v664_v43  ;;  %673 = vadd.xlane.f32.xlu2 %v672_v59 }
 0x61d   :  { %v4806_v38 = vpop.eup %4136 }
 0x61e   :  { %v675_v44 = vsel %vm119_vm0, %v4806_v38, 0.0 }
 0x61f   :  { %676 = vadd.xlane.f32.xlu0 %v675_v44  ;;  %1395 = vmax.xlane.f32.xlu2 %v1394_v33 }
 0x627   :  { %1392 = vmax.xlane.f32.xlu0 %v1391_v42  ;;  %1398 = vmax.xlane.f32.xlu2 %v1397_v51 }
 0x62f   :  { %1039 = vmax.xlane.f32.xlu2 %v1038_v0 }
 0x67a   :  { %v668_v54 = vpop.xlane.xlu0 %667 }
 0x67b   :  { %4138 = vrcp.f32 %v668_v54  ;;  %v689_v39 = vand.u32 2147483648, %v668_v54  ;;  %v687_v2 = vand.u32 2147483647, %v668_v54  ;;  %vm683_vm5 = vweird.f32 %v668_v54 }
 0x67d   :  { %v690_v7 = vor.u32 1.1754944e-38, %v689_v39  ;;  %vm688_vm7 = vcmp.eq.f32.partialorder %v687_v2, 8.507059e+37 }
 0x681   :  { %v4139_v55 = vpop.eup %4138 }
 0x682   :  { %v679_v56 = vmul.f32 %v4139_v55, %v668_v54  ;;  %v671_v52 = vpop.xlane.xlu0 %670  ;;  %vm684_vm4 = vweird.f32 %v4139_v55  ;;  %v1380_v54 = vpop.f32.mrf.mxu0 }
 0x683   :  { %4140 = vrcp.f32 %v671_v52  ;;  %vm685_vm6 = vmor %vm683_vm5, %vm684_vm4  ;;  %v704_v57 = vand.u32 2147483648, %v671_v52  ;;  %v702_v31 = vand.u32 2147483647, %v671_v52  ;;  %vm698_vm9 = vweird.f32 %v671_v52 }
 0x684   :  { %v680_v60 = vsub.f32 1.0, %v679_v56  ;;  %v1386_v2 = vmul.f32 0.35355338, %v1380_v54 }
 0x685   :  { %v705_v63 = vor.u32 1.1754944e-38, %v704_v57  ;;  %vm703_vm11 = vcmp.eq.f32.partialorder %v702_v31, 8.507059e+37 }
 0x686   :  { %v681_v62 = vmul.f32 %v4139_v55, %v680_v60 }
 0x688   :  { %v682_v4 = vadd.f32 %v4139_v55, %v681_v62 }
 0x689   :  { %v4141_v5 = vpop.eup %4140 }
 0x68a   :  { %v694_v13 = vmul.f32 %v4141_v5, %v671_v52  ;;  %v674_v11 = vpop.xlane.xlu2 %673  ;;  %v686_v14 = vsel %vm685_vm6, %v4139_v55, %v682_v4  ;;  %vm699_vm8 = vweird.f32 %v4141_v5 }
 0x68b   :  { %4142 = vrcp.f32 %v674_v11  ;;  %v691_v47 = vsel %vm688_vm7, %v690_v7, %v686_v14  ;;  %vm700_vm10 = vmor %vm698_vm9, %vm699_vm8  ;;  %v719_v52 = vand.u32 2147483648, %v674_v11  ;;  %vm713_vm13 = vweird.f32 %v674_v11 }
 0x68c   :  { %v695_v25 = vsub.f32 1.0, %v694_v13  ;;  %v692_v37 = vmul.f32 %v4786_v23, %v691_v47  ;;  %v717_v60 = vand.u32 2147483647, %v674_v11  ;;  %v1021_v47 = vpop.f32.mrf.mxu1 }
 0x68d   :  { %v720_v14 = vor.u32 1.1754944e-38, %v719_v52  ;;  %v3862_v52 = vld [vmem:[%s6227_s4 + $0x38] sm:$0xff] }
 0x68e   :  { %v696_v30 = vmul.f32 %v4141_v5, %v695_v25  ;;  %v741_v32 = vmul.f32 %v4832_v27, %v692_v37  ;;  %vm718_vm1 = vcmp.eq.f32.partialorder %v717_v60, 8.507059e+37 }
 0x690   :  { %v697_v6 = vadd.f32 %v4141_v5, %v696_v30  ;;  %v4837_v17 = vadd.f32 %v751_v28, %v741_v32 }
 0x691   :  { %v4143_v16 = vpop.eup %4142 }
 0x692   :  { %v709_v43 = vmul.f32 %v4143_v16, %v674_v11  ;;  %v4839_v35 = vpop.xlane.xlu0 %676  ;;  %v1396_v59 = vpop.xlane.xlu2 %1395  ;;  %v701_v23 = vsel %vm700_vm10, %v4141_v5, %v697_v6  ;;  %v759_v44 = vsel %vm119_vm0, %v4837_v17, 0.0  ;;  %vm714_vm12 = vweird.f32 %v4143_v16 }
 0x693   :  { %4144 = vrcp.f32 %v4839_v35  ;;  %v1404_v41 = vsub.f32 %v4804_v36, %v1396_v59  ;;  %v706_v33 = vsel %vm703_vm11, %v705_v63, %v701_v23  ;;  %760 = vadd.xlane.f32.xlu2 %v759_v44  ;;  %vm4856_vm15 = vmor %vm713_vm13, %vm714_vm12  ;;  %v734_v31 = vand.u32 2147483648, %v4839_v35  ;;  %v3861_v23 = vld [vmem:[%s6227_s4 + $0x30] sm:$0xff] }
 0x694   :  { %v710_v40 = vsub.f32 1.0, %v709_v43  ;;  %v707_v49 = vmul.f32 %v4795_v1, %v706_v33  ;;  %vm728_vm3 = vweird.f32 %v4839_v35  ;;  %v732_v32 = vand.u32 2147483647, %v4839_v35 }
 0x695   :  { %v1409_v51 = vmul.f32 1.442695, %v1404_v41  ;;  %v1029_v63 = vmul.f32 0.35355338, %v1021_v47  ;;  %v1037_v41 = vpop.xlane.xlu1 %1036  ;;  %v753_v33 = vmul.f32 %v3861_v23, %v4830_v21 }
 0x696   :  { %v711_v42 = vmul.f32 %v4143_v16, %v710_v40  ;;  %v742_v0 = vmul.f32 %v4832_v27, %v707_v49  ;;  %vm733_vm5 = vcmp.eq.f32.partialorder %v732_v32, 8.507059e+37 }
 0x697   :  { %4146 = vpow2.f32 %v1409_v51  ;;  %v1033_v49 = vadd.f32 %v1029_v63, %v4584_v10  ;;  %v1047_v51 = vsub.f32 %v4791_v29, %v1037_v41 }
 0x698   :  { %v712_v55 = vadd.f32 %v4143_v16, %v711_v42  ;;  %v4851_v36 = vadd.f32 %v752_v50, %v742_v0  ;;  %v1024_v42 = vpop.f32.mrf.mxu1 }
 0x699   :  { %v4145_v56 = vpop.eup %4144 }
 0x69a   :  { %v724_v62 = vmul.f32 %v4145_v56, %v4839_v35  ;;  %v1393_v39 = vpop.xlane.xlu0 %1392  ;;  %v4854_v1 = vpop.xlane.xlu2 %1398  ;;  %v762_v7 = vsel %vm119_vm0, %v4851_v36, 0.0  ;;  %v716_v11 = vsel %vm4856_vm15, %v4143_v16, %v712_v55  ;;  %vm729_vm2 = vweird.f32 %v4145_v56 }
 0x69b   :  { %v1403_v5 = vsub.f32 %v4813_v46, %v1393_v39  ;;  %763 = vadd.xlane.f32.xlu1 %v762_v7  ;;  %v4870_v46 = vadd.f32 %v1386_v2, %v4591_v15  ;;  %v721_v30 = vsel %vm718_vm1, %v720_v14, %v716_v11  ;;  %vm4876_vm4 = vmor %vm728_vm3, %vm729_vm2  ;;  %v1030_v55 = vmul.f32 0.35355338, %v1024_v42  ;;  %v4338_v2 = vld [vmem:[%s6224_s1 + $0x18] sm:$0xff] }
 0x69c   :  { %v725_v13 = vsub.f32 1.0, %v724_v62  ;;  %v722_v16 = vmul.f32 %v4799_v61, %v721_v30  ;;  %v735_v61 = vor.u32 1.1754944e-38, %v734_v31  ;;  %v1051_v62 = vmul.f32 1.442695, %v1047_v51 }
 0x69d   :  { %v1407_v3 = vmul.f32 1.442695, %v1403_v5  ;;  %v4865_v25 = vpop.eup %4146  ;;  %v1400_v59 = vsel %vm119_vm0, %v4870_v46, -inf  ;;  %v1034_v4 = vadd.f32 %v4338_v2, %v1030_v55  ;;  %v1405_v5 = vsub.f32 %v4816_v48, %v4854_v1 }
 0x69e   :  { %v726_v37 = vmul.f32 %v4145_v56, %v725_v13  ;;  %v1418_v28 = vsel %vm119_vm0, %v4865_v25, 0.0  ;;  %v743_v44 = vmul.f32 %v4832_v27, %v722_v16 }
 0x69f   :  { %4148 = vpow2.f32 %v1407_v3  ;;  %1419 = vadd.xlane.f32.xlu2 %v1418_v28  ;;  %v1044_v13 = vsel %vm119_vm0, %v1034_v4, -inf  ;;  %v1411_v11 = vmul.f32 1.442695, %v1405_v5  ;;  %v3905_v5 = vld [vmem:[%s6227_s4 + $0x60] sm:$0xff] }
 0x6a0   :  { %v727_v57 = vadd.f32 %v4145_v56, %v726_v37  ;;  %v4896_v0 = vadd.f32 %v753_v33, %v743_v44 }
 0x6a2   :  { %v1040_v6 = vpop.xlane.xlu2 %1039  ;;  %v731_v35 = vsel %vm4876_vm4, %v4145_v56, %v727_v57  ;;  %v1041_v56 = vsel %vm119_vm0, %v1033_v49, -inf  ;;  %v765_v10 = vsel %vm119_vm0, %v4896_v0, 0.0 }
 0x6a3   :  { %v1048_v15 = vsub.f32 %v4823_v53, %v1040_v6  ;;  %1401 = vmax.xlane.f32.xlu1 %v1400_v59  ;;  %v736_v50 = vsel %vm733_vm5, %v735_v61, %v731_v35 }
 0x6a4   :  { %v737_v54 = vmul.f32 %v4806_v38, %v736_v50  ;;  %v754_v38 = vmul.f32 %v3862_v52, %v4830_v21 }
 0x6a5   :  { %v4888_v58 = vpop.eup %4148  ;;  %v1053_v40 = vmul.f32 1.442695, %v1048_v15 }
 0x6a6   :  { %v1415_v53 = vsel %vm119_vm0, %v4888_v58, 0.0  ;;  %v744_v39 = vmul.f32 %v4832_v27, %v737_v54 }
 0x6a7   :  { %4150 = vpow2.f32 %v1053_v40  ;;  %1416 = vadd.xlane.f32.xlu0 %v1415_v53 }
 0x6a8   :  { %4152 = vpow2.f32 %v1051_v62  ;;  %v4916_v7 = vadd.f32 %v754_v38, %v744_v39 }
 0x6a9   :  { %4154 = vpow2.f32 %v1411_v11 }
 0x6aa   :  { %v768_v21 = vsel %vm119_vm0, %v4916_v7, 0.0 }
 0x6ab   :  { %1042 = vmax.xlane.f32.xlu1 %v1041_v56 }
 0x6ad   :  { %v4903_v60 = vpop.eup %4150 }
 0x6ae   :  { %v1062_v29 = vsel %vm119_vm0, %v4903_v60, 0.0  ;;  %v4921_v27 = vpop.eup %4152 }
 0x6af   :  { %766 = vadd.xlane.f32.xlu0 %v765_v10  ;;  %1063 = vadd.xlane.f32.xlu2 %v1062_v29  ;;  %v1059_v14 = vsel %vm119_vm0, %v4921_v27, 0.0  ;;  %v4925_v3 = vpop.eup %4154 }
 0x6b0   :  { %v1421_v48 = vsel %vm119_vm0, %v4925_v3, 0.0 }
 0x6b3   :  { %1045 = vmax.xlane.f32.xlu1 %v1044_v13 }
 0x6b7   :  { %769 = vadd.xlane.f32.xlu0 %v768_v21  ;;  %v4960_v21 = vstv %s1488_s23 }
 0x6bb   :  { %1060 = vadd.xlane.f32.xlu1 %v1059_v14  ;;  %v4963_v14 = vstv %s4944_s21 }
 0x6c3   :  { %1422 = vadd.xlane.f32.xlu1 %v1421_v48 }
 0x6c7   :  { %4027 = vrot.lane.b32.xlu2 %v4613_v45, %s4369_s20 }
 0x6dc   :  { %4032 = vrot.lane.b32.xlu1 %v4691_v19, %s4369_s20 }
 0x706   :  { %v4935_v47 = vpop.xlane.xlu2 %760 }
 0x707   :  { %vm776_vm1 = vweird.f32 %v4935_v47 }
 0x70e   :  { %v4933_v1 = vpop.xlane.xlu1 %763 }
 0x70f   :  { %vm791_vm5 = vweird.f32 %v4933_v1 }
 0x712   :  { %v4938_v30 = vpop.xlane.xlu2 %1419 }
 0x716   :  { %v1402_v37 = vpop.xlane.xlu1 %1401 }
 0x717   :  { %v1406_v28 = vsub.f32 %v4870_v46, %v1402_v37 }
 0x719   :  { %v1413_v57 = vmul.f32 1.442695, %v1406_v28  ;;  %v1500_v28 = vmul.f32 %v3905_v5, %v4963_v14 }
 0x71a   :  { %v1417_v31 = vpop.xlane.xlu0 %1416 }
 0x71b   :  { %4156 = vrcp.f32 %v1417_v31  ;;  %v1438_v61 = vand.u32 2147483648, %v1417_v31  ;;  %vm1432_vm7 = vweird.f32 %v1417_v31  ;;  %v1436_v53 = vand.u32 2147483647, %v1417_v31 }
 0x71c   :  { %4158 = vpow2.f32 %v1413_v57 }
 0x71d   :  { %v1439_v54 = vor.u32 1.1754944e-38, %v1438_v61  ;;  %vm1437_vm9 = vcmp.eq.f32.partialorder %v1436_v53, 8.507059e+37 }
 0x71e   :  { %v1043_v32 = vpop.xlane.xlu1 %1042 }
 0x71f   :  { %v1049_v6 = vsub.f32 %v1033_v49, %v1043_v32  ;;  %v4974_v32 = vstv %s4948_s22 }
 0x721   :  { %v4157_v16 = vpop.eup %4156  ;;  %v1055_v15 = vmul.f32 1.442695, %v1049_v6 }
 0x722   :  { %v4940_v63 = vpop.eup %4158  ;;  %v1428_v43 = vmul.f32 %v4157_v16, %v1417_v31  ;;  %v1064_v59 = vpop.xlane.xlu2 %1063  ;;  %vm1433_vm6 = vweird.f32 %v4157_v16  ;;  %v3885_v31 = vld [vmem:[%s6227_s4 + $0x48] sm:$0xff] }
 0x723   :  { %4160 = vpow2.f32 %v1055_v15  ;;  %v1424_v46 = vsel %vm119_vm0, %v4940_v63, 0.0  ;;  %vm1434_vm8 = vmor %vm1432_vm7, %vm1433_vm6  ;;  %v1097_v29 = vand.u32 2147483648, %v1064_v59  ;;  %vm1091_vm11 = vweird.f32 %v1064_v59  ;;  %v4993_v53 = vpop.xlane.xlu0 %766 }
 0x724   :  { %v1429_v23 = vsub.f32 1.0, %v1428_v43  ;;  %4162 = vrcp.f32 %v1064_v59  ;;  %1425 = vadd.xlane.f32.xlu0 %v1424_v46  ;;  %v4977_v43 = vstv %s1132_s27  ;;  %v1145_v15 = vmul.f32 %v3885_v31, %v4974_v32 }
 0x726   :  { %v1430_v35 = vmul.f32 %v4157_v16, %v1429_v23  ;;  %v1046_v40 = vpop.xlane.xlu1 %1045 }
 0x727   :  { %v1050_v44 = vsub.f32 %v1034_v4, %v1046_v40  ;;  %v1095_v4 = vand.u32 2147483647, %v1064_v59 }
 0x728   :  { %v1431_v41 = vadd.f32 %v4157_v16, %v1430_v35 }
 0x729   :  { %v4946_v33 = vpop.eup %4160  ;;  %v1057_v49 = vmul.f32 1.442695, %v1050_v44  ;;  %vm1096_vm13 = vcmp.eq.f32.partialorder %v1095_v4, 8.507059e+37 }
 0x72a   :  { %v4028_v50 = vpop.permute.xlu2 %4027  ;;  %v1435_v42 = vsel %vm1434_vm8, %v4157_v16, %v1431_v41  ;;  %v4163_v51 = vpop.eup %4162  ;;  %v1065_v52 = vsel %vm119_vm0, %v4946_v33, 0.0 }
 0x72b   :  { %v1087_v55 = vmul.f32 %v4163_v51, %v1064_v59  ;;  %4164 = vpow2.f32 %v1057_v49  ;;  %v4029_v56 = vunpack.i.l.bf16 %v4028_v50  ;;  %v1440_v62 = vsel %vm1437_vm9, %v1439_v54, %v1435_v42  ;;  %1066 = vadd.xlane.f32.xlu1 %v1065_v52 }
 0x72c   :  { %v4030_v39 = vunpack.i.h.bf16 %v4028_v50  ;;  %v1441_v38 = vmul.f32 %v4888_v58, %v1440_v62  ;;  %vm1092_vm10 = vweird.f32 %v4163_v51  ;;  %v1098_v58 = vor.u32 1.1754944e-38, %v1097_v29 }
 0x72d   :  { %v1088_v10 = vsub.f32 1.0, %v1087_v55  ;;  %867 = vmatpush.msra.mxu3 %v4029_v56  ;;  %vm1093_vm12 = vmor %vm1091_vm11, %vm1092_vm10  ;;  %4166 = vrcp.f32 %v4935_v47  ;;  %v5002_v56 = vpop.xlane.xlu0 %769  ;;  %v782_v62 = vand.u32 2147483648, %v4935_v47  ;;  %v780_v29 = vand.u32 2147483647, %v4935_v47 }
 0x72e   :  { %v1490_v37 = vmul.f32 %v4960_v21, %v1441_v38  ;;  %4168 = vrcp.f32 %v4933_v1  ;;  %vm806_vm10 = vweird.f32 %v4993_v53  ;;  %vm1447_vm11 = vweird.f32 %v4938_v30 }
 0x72f   :  { %v1089_v2 = vmul.f32 %v4163_v51, %v1088_v10  ;;  %868 = vmatpush.msra.mxu3 %v4030_v39  ;;  %4170 = vrcp.f32 %v4993_v53  ;;  %v783_v4 = vor.u32 1.1754944e-38, %v782_v62  ;;  %vm781_vm3 = vcmp.eq.f32.partialorder %v780_v29, 8.507059e+37 }
 0x730   :  { %v4980_v59 = vadd.f32 %v1500_v28, %v1490_v37  ;;  %4172 = vrcp.f32 %v4938_v30 }
 0x731   :  { %v4957_v13 = vpop.eup %4164  ;;  %v1090_v11 = vadd.f32 %v4163_v51, %v1089_v2  ;;  %4174 = vrcp.f32 %v5002_v56 }
 0x732   :  { %v1068_v48 = vsel %vm119_vm0, %v4957_v13, 0.0  ;;  %v1508_v61 = vsel %vm119_vm0, %v4980_v59, 0.0 }
 0x733   :  { %1069 = vadd.xlane.f32.xlu0 %v1068_v48  ;;  %v1094_v57 = vsel %vm1093_vm12, %v4163_v51, %v1090_v11  ;;  %v4167_v46 = vpop.eup %4166 }
 0x734   :  { %v1099_v6 = vsel %vm1096_vm13, %v1098_v58, %v1094_v57  ;;  %v772_v40 = vmul.f32 %v4167_v46, %v4935_v47  ;;  %v4169_v49 = vpop.eup %4168  ;;  %vm777_vm15 = vweird.f32 %v4167_v46 }
 0x735   :  { %v1100_v16 = vmul.f32 %v4903_v60, %v1099_v6  ;;  %v4989_v60 = vpop.xlane.xlu1 %1060  ;;  %v787_v42 = vmul.f32 %v4169_v49, %v4933_v1  ;;  %v5004_v52 = vpop.eup %4170  ;;  %vm778_vm2 = vmor %vm776_vm1, %vm777_vm15  ;;  %vm792_vm4 = vweird.f32 %v4169_v49  ;;  %v797_v6 = vand.u32 2147483648, %v4933_v1 }
 0x736   :  { %v773_v44 = vsub.f32 1.0, %v772_v40  ;;  %v5007_v10 = vpop.eup %4172  ;;  %v802_v38 = vmul.f32 %v5004_v52, %v4993_v53  ;;  %4176 = vrcp.f32 %v4989_v60  ;;  %vm793_vm6 = vmor %vm791_vm5, %vm792_vm4  ;;  %vm807_vm8 = vweird.f32 %v5004_v52 }
 0x737   :  { %v1135_v23 = vmul.f32 %v4977_v43, %v1100_v16  ;;  %v788_v55 = vsub.f32 1.0, %v787_v42  ;;  %v1443_v5 = vmul.f32 %v5007_v10, %v4938_v30  ;;  %v5019_v28 = vpop.eup %4174  ;;  %vm1448_vm9 = vweird.f32 %v5007_v10  ;;  %vm808_vm12 = vmor %vm806_vm10, %vm807_vm8 }
 0x738   :  { %v774_v50 = vmul.f32 %v4167_v46, %v773_v44  ;;  %v803_v47 = vsub.f32 1.0, %v802_v38  ;;  %v798_v44 = vor.u32 1.1754944e-38, %v797_v6  ;;  %v1451_v38 = vand.u32 2147483647, %v4938_v30  ;;  %vm1449_vm13 = vmor %vm1447_vm11, %vm1448_vm9 }
 0x739   :  { %v4983_v35 = vadd.f32 %v1145_v15, %v1135_v23  ;;  %v789_v2 = vmul.f32 %v4169_v49, %v788_v55  ;;  %v1444_v57 = vsub.f32 1.0, %v1443_v5  ;;  %v795_v15 = vand.u32 2147483647, %v4933_v1 }
 0x73a   :  { %v775_v54 = vadd.f32 %v4167_v46, %v774_v50  ;;  %v1453_v55 = vand.u32 2147483648, %v4938_v30  ;;  %vm1452_vm1 = vcmp.eq.f32.partialorder %v1451_v38, 8.507059e+37  ;;  %v1080_v6 = vand.u32 2147483647, %v4989_v60 }
 0x73b   :  { %1509 = vadd.xlane.f32.xlu0 %v1508_v61  ;;  %v1155_v41 = vsel %vm119_vm0, %v4983_v35, 0.0  ;;  %v790_v37 = vadd.f32 %v4169_v49, %v789_v2  ;;  %v817_v61 = vmul.f32 %v5019_v28, %v5002_v56  ;;  %vm796_vm7 = vcmp.eq.f32.partialorder %v795_v15, 8.507059e+37  ;;  %v3906_v15 = vld [vmem:[%s6227_s4 + $0x68] sm:$0xff] }
 0x73c   :  { %1156 = vadd.xlane.f32.xlu2 %v1155_v41  ;;  %v779_v39 = vsel %vm778_vm2, %v4167_v46, %v775_v54  ;;  %v5025_v23 = vpop.eup %4176  ;;  %v804_v46 = vmul.f32 %v5004_v52, %v803_v47  ;;  %v1445_v41 = vmul.f32 %v5007_v10, %v1444_v57  ;;  %vm822_vm2 = vweird.f32 %v5019_v28 }
 0x73d   :  { %v4998_v51 = vpop.xlane.xlu1 %1422  ;;  %v784_v58 = vsel %vm781_vm3, %v783_v4, %v779_v39  ;;  %v794_v40 = vsel %vm793_vm6, %v4169_v49, %v790_v37  ;;  %v818_v50 = vsub.f32 1.0, %v817_v61  ;;  %v812_v49 = vand.u32 2147483648, %v4993_v53 }
 0x73e   :  { %v785_v16 = vmul.f32 %v784_v58, %v4837_v17  ;;  %v1072_v17 = vmul.f32 %v5025_v23, %v4989_v60  ;;  %v799_v1 = vsel %vm796_vm7, %v798_v44, %v794_v40  ;;  %v805_v42 = vadd.f32 %v5004_v52, %v804_v46 }
 0x73f   :  { %v1446_v54 = vadd.f32 %v5007_v10, %v1445_v41  ;;  %v800_v29 = vmul.f32 %v799_v1, %v4851_v36  ;;  %v810_v39 = vand.u32 2147483647, %v4993_v53  ;;  %v819_v2 = vmul.f32 %v5019_v28, %v818_v50 }
 0x740   :  { %v1073_v62 = vsub.f32 1.0, %v1072_v17  ;;  %v809_v4 = vsel %vm808_vm12, %v5004_v52, %v805_v42  ;;  %v813_v5 = vor.u32 1.1754944e-38, %v812_v49  ;;  %v1454_v58 = vor.u32 1.1754944e-38, %v1453_v55 }
 0x741   :  { %vm811_vm15 = vcmp.eq.f32.partialorder %v810_v39, 8.507059e+37  ;;  %vm821_vm3 = vweird.f32 %v5002_v56  ;;  %v827_v47 = vand.u32 2147483648, %v5002_v56  ;;  %vm1077_vm4 = vweird.f32 %v5025_v23 }
 0x742   :  { %v1074_v36 = vmul.f32 %v5025_v23, %v1073_v62  ;;  %v814_v53 = vsel %vm811_vm15, %v813_v5, %v809_v4  ;;  %v825_v37 = vand.u32 2147483647, %v5002_v56  ;;  %v1082_v57 = vand.u32 2147483648, %v4989_v60  ;;  %vm823_vm5 = vmor %vm821_vm3, %vm822_vm2 }
 0x743   :  { %vm1076_vm6 = vweird.f32 %v4989_v60  ;;  %v1501_v40 = vmul.f32 %v3906_v15, %v4963_v14  ;;  %vm1081_vm9 = vcmp.eq.f32.partialorder %v1080_v6, 8.507059e+37  ;;  %4178 = vrcp.f32 %v4998_v51 }
 0x744   :  { %4037 = vrot.lane.b32.xlu1 %v4613_v45, %s4370_s30  ;;  %v1075_v52 = vadd.f32 %v5025_v23, %v1074_v36  ;;  %vm1078_vm7 = vmor %vm1076_vm6, %vm1077_vm4  ;;  %vm826_vm8 = vcmp.eq.f32.partialorder %v825_v37, 8.507059e+37  ;;  %v1083_v46 = vor.u32 1.1754944e-38, %v1082_v57  ;;  %v91_v36 = vld [vmem:[%s6225_s2 + $0x90] sm:$0xff]  ;;  %v1468_v15 = vand.u32 2147483648, %v4998_v51 }
 0x745   :  { %911 = vmatpush.msrb.mxu2 %v91_v36 }
 0x746   :  { %v1079_v56 = vsel %vm1078_vm7, %v5025_v23, %v1075_v52  ;;  %v3884_v23 = vld [vmem:[%s6227_s4 + $0x40] sm:$0xff] }
 0x747   :  { %v1084_v60 = vsel %vm1081_vm9, %v1083_v46, %v1079_v56  ;;  %v1144_v50 = vmul.f32 %v3884_v23, %v4974_v32 }
 0x748   :  { %v1085_v44 = vmul.f32 %v4921_v27, %v1084_v60 }
 0x74a   :  { %v1134_v1 = vmul.f32 %v4977_v43, %v1085_v44 }
 0x74c   :  { %v5082_v42 = vadd.f32 %v1144_v50, %v1134_v1 }
 0x74e   :  { %v4033_v11 = vpop.permute.xlu1 %4032 }
 0x74f   :  { %v4034_v48 = vunpack.i.l.bf16 %v4033_v11  ;;  %4042 = vrot.lane.b32.xlu0 %v4691_v19, %s4370_s30  ;;  %v4035_v31 = vunpack.i.h.bf16 %v4033_v11  ;;  %v1450_v11 = vsel %vm1449_vm13, %v5007_v10, %v1446_v54  ;;  %v815_v10 = vmul.f32 %v814_v53, %v4896_v0  ;;  %v4179_v54 = vpop.eup %4178 }
 0x750   :  { %v1455_v30 = vsel %vm1452_vm1, %v1454_v58, %v1450_v11  ;;  %v828_v0 = vor.u32 1.1754944e-38, %v827_v47  ;;  %v1458_v55 = vmul.f32 %v4179_v54, %v4998_v51  ;;  %vm1463_vm15 = vweird.f32 %v4179_v54 }
 0x751   :  { %869 = vmatpush.msra.mxu3 %v4034_v48  ;;  %v820_v48 = vadd.f32 %v5019_v28, %v819_v2  ;;  %vm1462_vm1 = vweird.f32 %v4998_v51 }
 0x752   :  { %v1459_v39 = vsub.f32 1.0, %v1458_v55  ;;  %vm5101_vm2 = vmor %vm1462_vm1, %vm1463_vm15 }
 0x753   :  { %870 = vmatpush.msra.mxu3 %v4035_v31  ;;  %v1456_v31 = vmul.f32 %v4865_v25, %v1455_v30  ;;  %v3908_v30 = vld [vmem:[%s6227_s4 + $0x78] sm:$0xff] }
 0x754   :  { %3863 = vmatmul.msk.f32.vlgmr.msra.gmra.mxu3 %vm119_vm0, %v785_v16  ;;  %v824_v16 = vsel %vm823_vm5, %v5019_v28, %v820_v48  ;;  %v1460_v11 = vmul.f32 %v4179_v54, %v1459_v39  ;;  %v1503_v6 = vmul.f32 %v3908_v30, %v4963_v14 }
 0x755   :  { %v829_v61 = vsel %vm826_vm8, %v828_v0, %v824_v16  ;;  %v1491_v25 = vmul.f32 %v4960_v21, %v1456_v31  ;;  %v1466_v16 = vand.u32 2147483647, %v4998_v51  ;;  %v1469_v51 = vor.u32 1.1754944e-38, %v1468_v15 }
 0x756   :  { %v830_v41 = vmul.f32 %v829_v61, %v4916_v7  ;;  %v1152_v7 = vsel %vm119_vm0, %v5082_v42, 0.0 }
 0x757   :  { %v5071_v28 = vadd.f32 %v1501_v40, %v1491_v25  ;;  %vm1467_vm5 = vcmp.eq.f32.partialorder %v1466_v16, 8.507059e+37 }
 0x759   :  { %v1511_v17 = vsel %vm119_vm0, %v5071_v28, 0.0 }
 0x75c   :  { %3864 = vmatmul.msk.f32.gmra.mxu3 %vm119_vm0, %v800_v29 }
 0x764   :  { %3865 = vmatmul.msk.f32.gmra.mxu3 %vm119_vm0, %v815_v10  ;;  %v1461_v10 = vadd.f32 %v4179_v54, %v1460_v11 }
 0x76c   :  { %3866 = vmatmul.msk.f32.gmra.mxu3 %vm119_vm0, %v830_v41 }
 0x76e   :  { %1512 = vadd.xlane.f32.xlu1 %v1511_v17 }
 0x779   :  { %1153 = vadd.xlane.f32.xlu0 %v1152_v7  ;;  %v3886_v7 = vld [vmem:[%s6227_s4 + $0x50] sm:$0xff] }
 0x77a   :  { %v1146_v39 = vmul.f32 %v3886_v7, %v4974_v32 }
 0x78d   :  { %4047 = vrot.lane.b32.xlu0 %v4613_v45, %s4371_s16 }
 0x797   :  { %v1426_v27 = vpop.xlane.xlu0 %1425 }
 0x798   :  { %4180 = vrcp.f32 %v1426_v27  ;;  %v1483_v2 = vand.u32 2147483648, %v1426_v27  ;;  %v1481_v5 = vand.u32 2147483647, %v1426_v27  ;;  %vm1477_vm11 = vweird.f32 %v1426_v27 }
 0x79a   :  { %v1484_v48 = vor.u32 1.1754944e-38, %v1483_v2  ;;  %vm1482_vm13 = vcmp.eq.f32.partialorder %v1481_v5, 8.507059e+37  ;;  %v3887_v5 = vld [vmem:[%s6227_s4 + $0x58] sm:$0xff] }
 0x79b   :  { %v1147_v30 = vmul.f32 %v3887_v5, %v4974_v32 }
 0x79e   :  { %v4181_v49 = vpop.eup %4180  ;;  %v1067_v29 = vpop.xlane.xlu1 %1066 }
 0x79f   :  { %v1473_v62 = vmul.f32 %v4181_v49, %v1426_v27  ;;  %4182 = vrcp.f32 %v1067_v29  ;;  %vm1478_vm10 = vweird.f32 %v4181_v49  ;;  %v1112_v46 = vand.u32 2147483648, %v1067_v29 }
 0x7a0   :  { %vm1479_vm12 = vmor %vm1477_vm11, %vm1478_vm10  ;;  %v1110_v40 = vand.u32 2147483647, %v1067_v29  ;;  %vm1106_vm4 = vweird.f32 %v1067_v29 }
 0x7a1   :  { %v1474_v38 = vsub.f32 1.0, %v1473_v62  ;;  %v1113_v23 = vor.u32 1.1754944e-38, %v1112_v46 }
 0x7a2   :  { %vm1111_vm7 = vcmp.eq.f32.partialorder %v1110_v40, 8.507059e+37 }
 0x7a3   :  { %v1475_v4 = vmul.f32 %v4181_v49, %v1474_v38 }
 0x7a5   :  { %v1476_v58 = vadd.f32 %v4181_v49, %v1475_v4  ;;  %v4183_v53 = vpop.eup %4182 }
 0x7a6   :  { %v1070_v45 = vpop.xlane.xlu0 %1069  ;;  %v1102_v47 = vmul.f32 %v4183_v53, %v1067_v29  ;;  %vm1107_vm3 = vweird.f32 %v4183_v53 }
 0x7a7   :  { %4184 = vrcp.f32 %v1070_v45  ;;  %v1480_v52 = vsel %vm1479_vm12, %v4181_v49, %v1476_v58  ;;  %vm1108_vm6 = vmor %vm1106_vm4, %vm1107_vm3  ;;  %v1127_v27 = vand.u32 2147483648, %v1070_v45  ;;  %v1125_v49 = vand.u32 2147483647, %v1070_v45 }
 0x7a8   :  { %v1485_v37 = vsel %vm1482_vm13, %v1484_v48, %v1480_v52  ;;  %v1103_v57 = vsub.f32 1.0, %v1102_v47  ;;  %vm1121_vm9 = vweird.f32 %v1070_v45 }
 0x7a9   :  { %v1486_v31 = vmul.f32 %v4940_v63, %v1485_v37  ;;  %v1465_v63 = vsel %vm5101_vm2, %v4179_v54, %v1461_v10  ;;  %v1128_v2 = vor.u32 1.1754944e-38, %v1127_v27  ;;  %vm1126_vm11 = vcmp.eq.f32.partialorder %v1125_v49, 8.507059e+37 }
 0x7aa   :  { %v1104_v56 = vmul.f32 %v4183_v53, %v1103_v57  ;;  %v1470_v54 = vsel %vm1467_vm5, %v1469_v51, %v1465_v63 }
 0x7ab   :  { %v1493_v61 = vmul.f32 %v4960_v21, %v1486_v31  ;;  %v1471_v11 = vmul.f32 %v4925_v3, %v1470_v54 }
 0x7ac   :  { %v1105_v60 = vadd.f32 %v4183_v53, %v1104_v56 }
 0x7ad   :  { %v4185_v25 = vpop.eup %4184  ;;  %v5108_v44 = vadd.f32 %v1503_v6, %v1493_v61  ;;  %v1492_v10 = vmul.f32 %v4960_v21, %v1471_v11 }
 0x7ae   :  { %v1117_v41 = vmul.f32 %v4185_v25, %v1070_v45  ;;  %v1109_v50 = vsel %vm1108_vm6, %v4183_v53, %v1105_v60  ;;  %vm1122_vm8 = vweird.f32 %v4185_v25  ;;  %v5129_v47 = vpop.xlane.xlu0 %1509 }
 0x7af   :  { %v1517_v1 = vsel %vm119_vm0, %v5108_v44, 0.0  ;;  %v1114_v62 = vsel %vm1111_vm7, %v1113_v23, %v1109_v50  ;;  %vm1123_vm10 = vmor %vm1121_vm9, %vm1122_vm8  ;;  %v1157_v56 = vpop.xlane.xlu2 %1156  ;;  %vm1525_vm7 = vweird.f32 %v5129_v47 }
 0x7b0   :  { %v1118_v17 = vsub.f32 1.0, %v1117_v41  ;;  %1518 = vadd.xlane.f32.xlu1 %v1517_v1  ;;  %v1115_v29 = vmul.f32 %v4946_v33, %v1114_v62  ;;  %v3907_v33 = vld [vmem:[%s6227_s4 + $0x70] sm:$0xff]  ;;  %4186 = vrcp.f32 %v1157_v56  ;;  %v1190_v49 = vand.u32 2147483648, %v1157_v56 }
 0x7b1   :  { %v1502_v37 = vmul.f32 %v3907_v33, %v4963_v14  ;;  %vm1184_vm3 = vweird.f32 %v1157_v56 }
 0x7b2   :  { %v1119_v55 = vmul.f32 %v4185_v25, %v1118_v17  ;;  %v1136_v4 = vmul.f32 %v4977_v43, %v1115_v29  ;;  %v1191_v5 = vor.u32 1.1754944e-38, %v1190_v49 }
 0x7b4   :  { %v1120_v38 = vadd.f32 %v4185_v25, %v1119_v55  ;;  %v5125_v36 = vadd.f32 %v1146_v39, %v1136_v4  ;;  %v1188_v39 = vand.u32 2147483647, %v1157_v56 }
 0x7b6   :  { %v1124_v58 = vsel %vm1123_vm10, %v4185_v25, %v1120_v38  ;;  %v4038_v45 = vpop.permute.xlu1 %4037  ;;  %v1158_v3 = vsel %vm119_vm0, %v5125_v36, 0.0  ;;  %v4187_v25 = vpop.eup %4186  ;;  %vm1189_vm5 = vcmp.eq.f32.partialorder %v1188_v39, 8.507059e+37 }
 0x7b7   :  { %v1129_v53 = vsel %vm1126_vm11, %v1128_v2, %v1124_v58  ;;  %v4039_v52 = vunpack.i.l.bf16 %v4038_v45  ;;  %1159 = vadd.xlane.f32.xlu0 %v1158_v3  ;;  %v4040_v31 = vunpack.i.h.bf16 %v4038_v45  ;;  %v1180_v63 = vmul.f32 %v4187_v25, %v1157_v56 }
 0x7b8   :  { %v1130_v48 = vmul.f32 %v4957_v13, %v1129_v53  ;;  %v5138_v13 = vadd.f32 %v1502_v37, %v1492_v10  ;;  %vm1185_vm2 = vweird.f32 %v4187_v25 }
 0x7b9   :  { %1260 = vmatpush.msrb.mxu3 %v4039_v52  ;;  %vm1186_vm4 = vmor %vm1184_vm3, %vm1185_vm2 }
 0x7ba   :  { %v1137_v57 = vmul.f32 %v4977_v43, %v1130_v48  ;;  %v1514_v16 = vsel %vm119_vm0, %v5138_v13, 0.0 }
 0x7bb   :  { %1261 = vmatpush.msrb.mxu3 %v4040_v31 }
 0x7bc   :  { %v5136_v6 = vadd.f32 %v1147_v30, %v1137_v57  ;;  %v1529_v57 = vand.u32 2147483647, %v5129_v47 }
 0x7be   :  { %v1161_v32 = vsel %vm119_vm0, %v5136_v6, 0.0  ;;  %vm1530_vm9 = vcmp.eq.f32.partialorder %v1529_v57, 8.507059e+37 }
 0x7bf   :  { %1162 = vadd.xlane.f32.xlu2 %v1161_v32  ;;  %1515 = vadd.xlane.f32.xlu0 %v1514_v16 }
 0x7c1   :  { %v4043_v21 = vpop.permute.xlu0 %4042 }
 0x7c2   :  { %v4044_v14 = vunpack.i.l.bf16 %v4043_v21  ;;  %v4045_v15 = vunpack.i.h.bf16 %v4043_v21 }
 0x7c4   :  { %1262 = vmatpush.msrb.mxu3 %v4044_v14 }
 0x7c6   :  { %1263 = vmatpush.msrb.mxu3 %v4045_v15 }
 0x7d7   :  { %4052 = vrot.lane.b32.xlu2 %v4691_v19, %s4371_s16  ;;  %v872_v43 = vpop.f32.mrf.mxu3  ;;  %v1181_v19 = vsub.f32 1.0, %v1180_v63 }
 0x7d8   :  { %3867 = vmatmul.msk.f32.vlgmr.msrb.gmra.mxu2 %vm278_vm14, %v872_v43 }
 0x7d9   :  { %v1182_v17 = vmul.f32 %v4187_v25, %v1181_v19 }
 0x7db   :  { %v1183_v55 = vadd.f32 %v4187_v25, %v1182_v17 }
 0x7dd   :  { %v1187_v4 = vsel %vm1186_vm4, %v4187_v25, %v1183_v55 }
 0x7de   :  { %v1192_v58 = vsel %vm1189_vm5, %v1191_v5, %v1187_v4 }
 0x7df   :  { %v875_v0 = vpop.f32.mrf.mxu3  ;;  %v1193_v33 = vmul.f32 %v1192_v58, %v4983_v35  ;;  %v1531_v35 = vand.u32 2147483648, %v5129_v47 }
 0x7e0   :  { %3868 = vmatmul.msk.f32.gmra.mxu2 %vm278_vm14, %v875_v0 }
 0x7e1   :  { %v5156_v45 = vpop.xlane.xlu1 %1512  ;;  %v1532_v21 = vor.u32 1.1754944e-38, %v1531_v35 }
 0x7e2   :  { %vm1540_vm11 = vweird.f32 %v5156_v45  ;;  %v1546_v19 = vand.u32 2147483648, %v5156_v45 }
 0x7e7   :  { %v878_v46 = vpop.f32.mrf.mxu3 }
 0x7e8   :  { %3869 = vmatmul.msk.f32.gmra.mxu2 %vm278_vm14, %v878_v46 }
 0x7ec   :  { %v1154_v61 = vpop.xlane.xlu0 %1153 }
 0x7ed   :  { %4188 = vrcp.f32 %v1154_v61  ;;  %v1175_v23 = vand.u32 2147483648, %v1154_v61  ;;  %v1173_v50 = vand.u32 2147483647, %v1154_v61  ;;  %vm1169_vm13 = vweird.f32 %v1154_v61 }
 0x7ee   :  { %4190 = vrcp.f32 %v5129_v47 }
 0x7ef   :  { %v881_v40 = vpop.f32.mrf.mxu3  ;;  %v1176_v27 = vor.u32 1.1754944e-38, %v1175_v23  ;;  %vm1174_vm1 = vcmp.eq.f32.partialorder %v1173_v50, 8.507059e+37  ;;  %4192 = vrcp.f32 %v5156_v45  ;;  %v1544_v23 = vand.u32 2147483647, %v5156_v45 }
 0x7f0   :  { %3870 = vmatmul.msk.f32.gmra.mxu2 %vm278_vm14, %v881_v40 }
 0x7f3   :  { %v4189_v60 = vpop.eup %4188 }
 0x7f4   :  { %v1165_v41 = vmul.f32 %v4189_v60, %v1154_v61  ;;  %vm1170_vm12 = vweird.f32 %v4189_v60 }
 0x7f5   :  { %vm1171_vm15 = vmor %vm1169_vm13, %vm1170_vm12 }
 0x7f6   :  { %v1166_v51 = vsub.f32 1.0, %v1165_v41 }
 0x7f8   :  { %v1167_v1 = vmul.f32 %v4189_v60, %v1166_v51 }
 0x7fa   :  { %v1168_v7 = vadd.f32 %v4189_v60, %v1167_v1 }
 0x7fc   :  { %v1172_v54 = vsel %vm1171_vm15, %v4189_v60, %v1168_v7 }
 0x7fd   :  { %v1177_v62 = vsel %vm1174_vm1, %v1176_v27, %v1172_v54 }
 0x7fe   :  { %v1178_v29 = vmul.f32 %v1177_v62, %v5082_v42  ;;  %v4191_v42 = vpop.eup %4190 }
 0x7ff   :  { %v4048_v38 = vpop.permute.xlu0 %4047  ;;  %v1521_v53 = vmul.f32 %v4191_v42, %v5129_v47  ;;  %v5159_v52 = vpop.eup %4192  ;;  %vm1526_vm6 = vweird.f32 %v4191_v42 }
 0x800   :  { %v4049_v2 = vunpack.i.l.bf16 %v4048_v38  ;;  %3888 = vmatmul.msk.f32.vlgmr.msrb.gmra.mxu3 %vm119_vm0, %v1178_v29  ;;  %v4050_v11 = vunpack.i.h.bf16 %v4048_v38  ;;  %v1536_v37 = vmul.f32 %v5159_v52, %v5156_v45  ;;  %vm1527_vm8 = vmor %vm1525_vm7, %vm1526_vm6  ;;  %vm1541_vm13 = vweird.f32 %v5159_v52 }
 0x801   :  { %v1522_v48 = vsub.f32 1.0, %v1521_v53  ;;  %vm5185_vm3 = vmor %vm1540_vm11, %vm1541_vm13  ;;  %vm1545_vm7 = vcmp.eq.f32.partialorder %v1544_v23, 8.507059e+37 }
 0x802   :  { %1616 = vmatpush.msra.mxu1 %v4049_v2  ;;  %v1537_v14 = vsub.f32 1.0, %v1536_v37 }
 0x803   :  { %v1523_v30 = vmul.f32 %v4191_v42, %v1522_v48 }
 0x804   :  { %1617 = vmatpush.msra.mxu1 %v4050_v11  ;;  %v1538_v47 = vmul.f32 %v5159_v52, %v1537_v14 }
 0x805   :  { %v1524_v10 = vadd.f32 %v4191_v42, %v1523_v30 }
 0x807   :  { %v1528_v32 = vsel %vm1527_vm8, %v4191_v42, %v1524_v10 }
 0x808   :  { %3889 = vmatmul.msk.f32.gmra.mxu3 %vm119_vm0, %v1193_v33  ;;  %v1533_v56 = vsel %vm1530_vm9, %v1532_v21, %v1528_v32 }
 0x809   :  { %v1534_v60 = vmul.f32 %v1533_v56, %v4980_v59  ;;  %v1539_v59 = vadd.f32 %v5159_v52, %v1538_v47 }
 0x80b   :  { %v1543_v42 = vsel %vm5185_vm3, %v5159_v52, %v1539_v59 }
 0x823   :  { %v5166_v15 = vpop.xlane.xlu1 %1518 }
 0x824   :  { %vm1570_vm13 = vweird.f32 %v5166_v15 }
 0x82a   :  { %v1160_v3 = vpop.xlane.xlu0 %1159 }
 0x82b   :  { %4194 = vrcp.f32 %v1160_v3  ;;  %v1205_v61 = vand.u32 2147483648, %v1160_v3  ;;  %v1203_v25 = vand.u32 2147483647, %v1160_v3  ;;  %vm1199_vm12 = vweird.f32 %v1160_v3 }
 0x82d   :  { %v1206_v7 = vor.u32 1.1754944e-38, %v1205_v61  ;;  %vm1204_vm1 = vcmp.eq.f32.partialorder %v1203_v25, 8.507059e+37  ;;  %v92_v25 = vld [vmem:[%s6225_s2 + $0x98] sm:$0xff] }
 0x82e   :  { %1304 = vmatpush.msra.mxu2 %v92_v25 }
 0x831   :  { %v4195_v16 = vpop.eup %4194 }
 0x832   :  { %v1163_v31 = vpop.xlane.xlu2 %1162  ;;  %v1195_v43 = vmul.f32 %v4195_v16, %v1160_v3  ;;  %v5168_v0 = vpop.xlane.xlu0 %1515  ;;  %vm1200_vm10 = vweird.f32 %v4195_v16 }
 0x833   :  { %4196 = vrcp.f32 %v1163_v31  ;;  %vm1201_vm15 = vmor %vm1199_vm12, %vm1200_vm10  ;;  %v1220_v55 = vand.u32 2147483648, %v1163_v31  ;;  %v1218_v2 = vand.u32 2147483647, %v1163_v31  ;;  %vm1214_vm4 = vweird.f32 %v1163_v31 }
 0x834   :  { %4198 = vrcp.f32 %v5168_v0  ;;  %v1196_v46 = vsub.f32 1.0, %v1195_v43  ;;  %v1561_v37 = vand.u32 2147483648, %v5168_v0  ;;  %vm1555_vm9 = vweird.f32 %v5168_v0 }
 0x835   :  { %4200 = vrcp.f32 %v5166_v15  ;;  %v1221_v53 = vor.u32 1.1754944e-38, %v1220_v55  ;;  %vm1219_vm6 = vcmp.eq.f32.partialorder %v1218_v2, 8.507059e+37 }
 0x836   :  { %v1197_v63 = vmul.f32 %v4195_v16, %v1196_v46  ;;  %v1562_v21 = vor.u32 1.1754944e-38, %v1561_v37 }
 0x838   :  { %v1198_v1 = vadd.f32 %v4195_v16, %v1197_v63 }
 0x839   :  { %v4197_v40 = vpop.eup %4196 }
 0x83a   :  { %v1210_v41 = vmul.f32 %v4197_v40, %v1163_v31  ;;  %v4053_v51 = vpop.permute.xlu2 %4052  ;;  %v4199_v50 = vpop.eup %4198  ;;  %v1202_v29 = vsel %vm1201_vm15, %v4195_v16, %v1198_v1  ;;  %vm1215_vm2 = vweird.f32 %v4197_v40  ;;  %v1559_v31 = vand.u32 2147483647, %v5168_v0 }
 0x83b   :  { %v4054_v17 = vunpack.i.l.bf16 %v4053_v51  ;;  %v4201_v54 = vpop.eup %4200  ;;  %v1551_v49 = vmul.f32 %v4199_v50, %v5168_v0  ;;  %v4055_v62 = vunpack.i.h.bf16 %v4053_v51  ;;  %v1207_v38 = vsel %vm1204_vm1, %v1206_v7, %v1202_v29  ;;  %vm1216_vm5 = vmor %vm1214_vm4, %vm1215_vm2 }
 0x83c   :  { %v1211_v27 = vsub.f32 1.0, %v1210_v41  ;;  %v1208_v5 = vmul.f32 %v1207_v38, %v5125_v36  ;;  %v1566_v58 = vmul.f32 %v4201_v54, %v5166_v15  ;;  %v1547_v36 = vor.u32 1.1754944e-38, %v1546_v19 }
 0x83d   :  { %1618 = vmatpush.msra.mxu1 %v4054_v17  ;;  %v1552_v4 = vsub.f32 1.0, %v1551_v49  ;;  %vm1556_vm8 = vweird.f32 %v4199_v50  ;;  %vm1560_vm11 = vcmp.eq.f32.partialorder %v1559_v31, 8.507059e+37  ;;  %vm1571_vm12 = vweird.f32 %v4201_v54  ;;  %v5228_v49 = vld [vmem:[%s6225_s2 + $0x80] sm:$0xff] }
 0x83e   :  { %v1212_v39 = vmul.f32 %v4197_v40, %v1211_v27  ;;  %3890 = vmatmul.msk.f32.gmra.mxu3 %vm119_vm0, %v1208_v5  ;;  %v1548_v3 = vsel %vm1545_vm7, %v1547_v36, %v1543_v42  ;;  %v1567_v10 = vsub.f32 1.0, %v1566_v58  ;;  %vm1557_vm10 = vmor %vm1555_vm9, %vm1556_vm8  ;;  %v1574_v0 = vand.u32 2147483647, %v5166_v15 }
 0x83f   :  { %1619 = vmatpush.msra.mxu1 %v4055_v62  ;;  %v1553_v48 = vmul.f32 %v4199_v50, %v1552_v4  ;;  %v1549_v52 = vmul.f32 %v1548_v3, %v5071_v28  ;;  %vm1572_vm15 = vmor %vm1570_vm13, %vm1571_vm12  ;;  %v1682_v62 = vperm.slane %v5228_v49, 4 }
 0x840   :  { %3909 = vmatmul.msk.f32.vlgmr.msra.gmra.mxu1 %vm119_vm0, %v1534_v60  ;;  %v1213_v33 = vadd.f32 %v4197_v40, %v1212_v39  ;;  %v1568_v32 = vmul.f32 %v4201_v54, %v1567_v10  ;;  %vm1575_vm1 = vcmp.eq.f32.partialorder %v1574_v0, 8.507059e+37 }
 0x841   :  { %v1554_v35 = vadd.f32 %v4199_v50, %v1553_v48 }
 0x842   :  { %v1217_v45 = vsel %vm1216_vm5, %v4197_v40, %v1213_v33  ;;  %v1569_v43 = vadd.f32 %v4201_v54, %v1568_v32 }
 0x843   :  { %v1222_v30 = vsel %vm1219_vm6, %v1221_v53, %v1217_v45  ;;  %v1558_v16 = vsel %vm1557_vm10, %v4199_v50, %v1554_v35 }
 0x844   :  { %v1223_v57 = vmul.f32 %v1222_v30, %v5136_v6  ;;  %v1563_v14 = vsel %vm1560_vm11, %v1562_v21, %v1558_v16  ;;  %v1576_v6 = vand.u32 2147483648, %v5166_v15  ;;  %v1573_v56 = vsel %vm1572_vm15, %v4201_v54, %v1569_v43 }
 0x845   :  { %v1564_v28 = vmul.f32 %v1563_v14, %v5138_v13  ;;  %v93_v13 = vld [vmem:[%s6225_s2 + $0xa0] sm:$0xff] }
 0x846   :  { %3891 = vmatmul.msk.f32.gmra.mxu3 %vm119_vm0, %v1223_v57  ;;  %v1577_v46 = vor.u32 1.1754944e-38, %v1576_v6 }
 0x847   :  { %1660 = vmatpush.msra.mxu3 %v93_v13 }
 0x848   :  { %3910 = vmatmul.msk.f32.gmra.mxu1 %vm119_vm0, %v1549_v52  ;;  %v1578_v47 = vsel %vm1575_vm1, %v1577_v46, %v1573_v56 }
 0x849   :  { %v1579_v61 = vmul.f32 %v1578_v47, %v5108_v44 }
 0x850   :  { %3911 = vmatmul.msk.f32.gmra.mxu1 %vm119_vm0, %v1564_v28 }
 0x858   :  { %3912 = vmatmul.msk.f32.gmra.mxu1 %vm119_vm0, %v1579_v61 }
 0x85b   :  { %v913_v23 = vpop.f32.mrf.mxu2 }
 0x85c   :  { %v955_v27 = vadd.f32 %v4778_v8, %v913_v23  ;;  %v115_v23 = vld [vmem:[%s6226_s3 + $0x28] sm:$0xff] }
 0x863   :  { %v916_v17 = vpop.f32.mrf.mxu2 }
 0x864   :  { %v958_v38 = vadd.f32 %v4782_v12, %v916_v17  ;;  %v114_v17 = vld [vmem:[%s6226_s3 + $0x20] sm:$0xff] }
 0x86b   :  { %v919_v1 = vpop.f32.mrf.mxu2 }
 0x86c   :  { %v961_v42 = vadd.f32 %v4780_v9, %v919_v1 }
 0x873   :  { %v922_v50 = vpop.f32.mrf.mxu2 }
 0x874   :  { %v964_v3 = vadd.f32 %v4784_v18, %v922_v50 }
 0x883   :  { %v1265_v15 = vpop.f32.mrf.mxu3 }
 0x884   :  { %3892 = vmatmul.msk.f32.vlgmr.msra.gmra.mxu2 %vm278_vm14, %v1265_v15 }
 0x88b   :  { %v1268_v40 = vpop.f32.mrf.mxu3 }
 0x88c   :  { %3893 = vmatmul.msk.f32.gmra.mxu2 %vm278_vm14, %v1268_v40 }
 0x8bd   :  { %v1621_v63 = vpop.f32.mrf.mxu1 }
 0x8be   :  { %3913 = vmatmul.msk.f32.vlgmr.msra.gmra.mxu3 %vm278_vm14, %v1621_v63 }
 0x8c1   :  { %v1271_v44 = vpop.f32.mrf.mxu3 }
 0x8c2   :  { %3894 = vmatmul.msk.f32.gmra.mxu2 %vm278_vm14, %v1271_v44  ;;  %v117_v44 = vld [vmem:[%s6226_s3 + $0x38] sm:$0xff] }
 0x8c3   :  { %1810 = vmatpush.msrb.mxu2 %v117_v44 }
 0x8c5   :  { %v1624_v60 = vpop.f32.mrf.mxu1 }
 0x8c6   :  { %3914 = vmatmul.msk.f32.gmra.mxu3 %vm278_vm14, %v1624_v60 }
 0x8c9   :  { %v1274_v19 = vpop.f32.mrf.mxu3 }
 0x8ca   :  { %3895 = vmatmul.msk.f32.gmra.mxu2 %vm278_vm14, %v1274_v19 }
 0x8cd   :  { %v1627_v41 = vpop.f32.mrf.mxu1 }
 0x8ce   :  { %3915 = vmatmul.msk.f32.gmra.mxu3 %vm278_vm14, %v1627_v41  ;;  %v116_v41 = vld [vmem:[%s6226_s3 + $0x30] sm:$0xff] }
 0x8cf   :  { %1811 = vmatpush.msrb.mxu2 %v116_v41 }
 0x8d1   :  { %1812 = vmatpush.msrb.mxu2 %v115_v23 }
 0x8d3   :  { %1813 = vmatpush.msrb.mxu2 %v114_v17  ;;  %v109_v17 = vld [vmem:[%s6225_s2 + $0x120] sm:$0xff] }
 0x8d4   :  { %1987 = vmatpush.msrb.mxu0 %v109_v17 }
 0x8d5   :  { %v1630_v51 = vpop.f32.mrf.mxu1 }
 0x8d6   :  { %3916 = vmatmul.msk.f32.gmra.mxu3 %vm278_vm14, %v1630_v51 }
 0x907   :  { %v1306_v7 = vpop.f32.mrf.mxu2 }
 0x908   :  { %v1318_v59 = vadd.f32 %v1306_v7, %v955_v27 }
 0x90f   :  { %v1309_v29 = vpop.f32.mrf.mxu2 }
 0x910   :  { %v1319_v4 = vadd.f32 %v1309_v29, %v958_v38 }
 0x941   :  { %v1662_v54 = vpop.f32.mrf.mxu3 }
 0x942   :  { %v1674_v55 = vadd.f32 %v1662_v54, %v1318_v59 }
 0x944   :  { %v1678_v39 = vadd.f32 %v1674_v55, %v4471_v20 }
 0x945   :  { %v1312_v58 = vpop.f32.mrf.mxu2 }
 0x946   :  { %v5233_v2 = vadd.f32 %v1682_v62, %v1678_v39  ;;  %v1320_v53 = vadd.f32 %v1312_v58, %v961_v42 }
 0x948   :  { %v1687_v8 = vsel %vm119_vm0, %v5233_v2, 0.0 }
 0x949   :  { %v1665_v5 = vpop.f32.mrf.mxu3  ;;  %1688 = vadd.xlane.f32.xlu1 %v1687_v8 }
 0x94a   :  { %v1675_v11 = vadd.f32 %v1665_v5, %v1319_v4 }
 0x94c   :  { %v1679_v33 = vadd.f32 %v1675_v11, %v4475_v22  ;;  %v1775_v11 = vperm.slane %v5228_v49, 2 }
 0x94d   :  { %v1315_v30 = vpop.f32.mrf.mxu2 }
 0x94e   :  { %v5239_v36 = vadd.f32 %v1682_v62, %v1679_v33  ;;  %v1321_v35 = vadd.f32 %v1315_v30, %v964_v3 }
 0x950   :  { %v1690_v20 = vsel %vm119_vm0, %v5239_v36, 0.0 }
 0x951   :  { %v1668_v12 = vpop.f32.mrf.mxu3  ;;  %1691 = vadd.xlane.f32.xlu1 %v1690_v20 }
 0x952   :  { %v1676_v48 = vadd.f32 %v1668_v12, %v1320_v53  ;;  %v1780_v53 = vperm.slane %v5228_v49, 3 }
 0x954   :  { %v1680_v45 = vadd.f32 %v1676_v48, %v4479_v24 }
 0x956   :  { %v5245_v10 = vadd.f32 %v1682_v62, %v1680_v45 }
 0x958   :  { %v1693_v22 = vsel %vm119_vm0, %v5245_v10, 0.0 }
 0x959   :  { %v1671_v9 = vpop.f32.mrf.mxu3  ;;  %1694 = vadd.xlane.f32.xlu2 %v1693_v22 }
 0x95a   :  { %v1677_v37 = vadd.f32 %v1671_v9, %v1321_v35 }
 0x95c   :  { %v1681_v57 = vadd.f32 %v1677_v37, %v4483_v26 }
 0x95e   :  { %v5250_v52 = vadd.f32 %v1682_v62, %v1681_v57 }
 0x960   :  { %v1696_v31 = vsel %vm119_vm0, %v5250_v52, 0.0 }
 0x961   :  { %1697 = vadd.xlane.f32.xlu1 %v1696_v31 }
 0x9bc   :  { %v1689_v24 = vpop.xlane.xlu1 %1688 }
 0x9bd   :  { %v1699_v18 = vmul.f32 %v1689_v24, %v4487_v34 }
 0x9bf   :  { %v1703_v32 = vsub.f32 %v5233_v2, %v1699_v18 }
 0x9c1   :  { %v1707_v16 = vmul.f32 %v1703_v32, %v1703_v32 }
 0x9c3   :  { %v1711_v21 = vsel %vm119_vm0, %v1707_v16, 0.0 }
 0x9c4   :  { %v1692_v14 = vpop.xlane.xlu1 %1691  ;;  %1712 = vadd.xlane.f32.xlu1 %v1711_v21 }
 0x9c5   :  { %v1700_v43 = vmul.f32 %v1692_v14, %v4487_v34 }
 0x9c7   :  { %v5259_v26 = vsub.f32 %v5239_v36, %v1700_v43 }
 0x9c9   :  { %v1708_v6 = vmul.f32 %v5259_v26, %v5259_v26 }
 0x9cb   :  { %v1714_v28 = vsel %vm119_vm0, %v1708_v6, 0.0 }
 0x9cc   :  { %1715 = vadd.xlane.f32.xlu0 %v1714_v28  ;;  %v1695_v0 = vpop.xlane.xlu2 %1694 }
 0x9cd   :  { %v1701_v56 = vmul.f32 %v1695_v0, %v4487_v34 }
 0x9cf   :  { %v5266_v46 = vsub.f32 %v5245_v10, %v1701_v56 }
 0x9d1   :  { %v1709_v47 = vmul.f32 %v5266_v46, %v5266_v46 }
 0x9d3   :  { %v1717_v61 = vsel %vm119_vm0, %v1709_v47, 0.0 }
 0x9d4   :  { %1718 = vadd.xlane.f32.xlu1 %v1717_v61  ;;  %v1698_v25 = vpop.xlane.xlu1 %1697 }
 0x9d5   :  { %v1702_v13 = vmul.f32 %v1698_v25, %v4487_v34 }
 0x9d7   :  { %v5273_v15 = vsub.f32 %v5250_v52, %v1702_v13 }
 0x9d9   :  { %v1710_v40 = vmul.f32 %v5273_v15, %v5273_v15 }
 0x9db   :  { %v1720_v63 = vsel %vm119_vm0, %v1710_v40, 0.0 }
 0x9dc   :  { %1721 = vadd.xlane.f32.xlu0 %v1720_v63 }
 0xa37   :  { %v1713_v60 = vpop.xlane.xlu1 %1712 }
 0xa38   :  { %v1723_v19 = vmul.f32 %v1713_v60, %v4487_v34 }
 0xa3a   :  { %v1727_v51 = vadd.f32 1e-05, %v1723_v19 }
 0xa3c   :  { %4202 = vrsqrt.f32 %v1727_v51  ;;  %vm1737_vm3 = vweird.f32 %v1727_v51 }
 0xa3f   :  { %v1716_v1 = vpop.xlane.xlu0 %1715 }
 0xa40   :  { %v1724_v50 = vmul.f32 %v1716_v1, %v4487_v34  ;;  %v108_v1 = vld [vmem:[%s6225_s2 + $0x118] sm:$0xff] }
 0xa41   :  { %1988 = vmatpush.msrb.mxu0 %v108_v1 }
 0xa42   :  { %v4203_v7 = vpop.eup %4202  ;;  %v1728_v27 = vadd.f32 1e-05, %v1724_v50 }
 0xa43   :  { %v1732_v59 = vmul.f32 %v4203_v7, %v1727_v51  ;;  %vm1738_vm2 = vweird.f32 %v4203_v7 }
 0xa44   :  { %4204 = vrsqrt.f32 %v1728_v27  ;;  %vm1739_vm4 = vmor %vm1737_vm3, %vm1738_vm2  ;;  %vm1747_vm6 = vweird.f32 %v1728_v27 }
 0xa45   :  { %v1733_v54 = vmul.f32 %v4203_v7, %v1732_v59 }
 0xa47   :  { %v1734_v55 = vmul.f32 0.5, %v1733_v54  ;;  %v1719_v62 = vpop.xlane.xlu1 %1718 }
 0xa48   :  { %v1725_v29 = vmul.f32 %v1719_v62, %v4487_v34  ;;  %v105_v62 = vld [vmem:[%s6225_s2 + $0x100] sm:$0xff] }
 0xa49   :  { %v1735_v39 = vsub.f32 1.5, %v1734_v55  ;;  %v106_v55 = vld [vmem:[%s6225_s2 + $0x108] sm:$0xff] }
 0xa4a   :  { %v4205_v38 = vpop.eup %4204  ;;  %v1729_v4 = vadd.f32 1e-05, %v1725_v29 }
 0xa4b   :  { %v1736_v8 = vmul.f32 %v4203_v7, %v1735_v39  ;;  %v1742_v5 = vmul.f32 %v4205_v38, %v1728_v27  ;;  %vm1748_vm5 = vweird.f32 %v4205_v38  ;;  %v104_v39 = vld [vmem:[%s6225_s2 + $0xf8] sm:$0xff] }
 0xa4c   :  { %4206 = vrsqrt.f32 %v1729_v4  ;;  %vm1749_vm7 = vmor %vm1747_vm6, %vm1748_vm5  ;;  %vm1757_vm9 = vweird.f32 %v1729_v4 }
 0xa4d   :  { %v1740_v58 = vsel %vm1739_vm4, %v4203_v7, %v1736_v8  ;;  %v1743_v33 = vmul.f32 %v4205_v38, %v1742_v5  ;;  %v107_v7 = vld [vmem:[%s6225_s2 + $0x110] sm:$0xff] }
 0xa4e   :  { %v1771_v42 = vmul.f32 %v1740_v58, %v1703_v32  ;;  %1989 = vmatpush.msrb.mxu0 %v107_v7 }
 0xa4f   :  { %v1744_v20 = vmul.f32 0.5, %v1743_v33  ;;  %v1722_v12 = vpop.xlane.xlu0 %1721  ;;  %v102_v33 = vld [vmem:[%s6225_s2 + $0xe8] sm:$0xff] }
 0xa50   :  { %v1776_v48 = vmul.f32 %v1775_v11, %v1771_v42  ;;  %v1726_v45 = vmul.f32 %v1722_v12, %v4487_v34  ;;  %1990 = vmatpush.msrb.mxu0 %v106_v55  ;;  %v101_v12 = vld [vmem:[%s6225_s2 + $0xe0] sm:$0xff] }
 0xa51   :  { %v1745_v30 = vsub.f32 1.5, %v1744_v20 }
 0xa52   :  { %v4207_v3 = vpop.eup %4206  ;;  %v1730_v35 = vadd.f32 1e-05, %v1726_v45  ;;  %v1781_v22 = vadd.f32 %v1780_v53, %v1776_v48  ;;  %1991 = vmatpush.msrb.mxu0 %v105_v62 }
 0xa53   :  { %v1746_v9 = vmul.f32 %v4205_v38, %v1745_v30  ;;  %v1752_v37 = vmul.f32 %v4207_v3, %v1729_v4  ;;  %vm1758_vm8 = vweird.f32 %v4207_v3  ;;  %v103_v4 = vld [vmem:[%s6225_s2 + $0xf0] sm:$0xff] }
 0xa54   :  { %4208 = vrsqrt.f32 %v1730_v35  ;;  %3917 = vmatmul.msk.f32.vlgmr.msrb.gmra.mxu2 %vm119_vm0, %v1781_v22  ;;  %vm1759_vm10 = vmor %vm1757_vm9, %vm1758_vm8  ;;  %vm1767_vm12 = vweird.f32 %v1730_v35  ;;  %1992 = vmatpush.msrb.mxu0 %v104_v39 }
 0xa55   :  { %v1750_v57 = vsel %vm1749_vm7, %v4205_v38, %v1746_v9  ;;  %v1753_v31 = vmul.f32 %v4207_v3, %v1752_v37  ;;  %v99_v9 = vld [vmem:[%s6225_s2 + $0xd0] sm:$0xff] }
 0xa56   :  { %v1772_v24 = vmul.f32 %v1750_v57, %v5259_v26  ;;  %1993 = vmatpush.msrb.mxu0 %v103_v4  ;;  %v98_v57 = vld [vmem:[%s6225_s2 + $0xc8] sm:$0xff] }
 0xa57   :  { %v1754_v18 = vmul.f32 0.5, %v1753_v31 }
 0xa58   :  { %v1777_v32 = vmul.f32 %v1775_v11, %v1772_v24  ;;  %1994 = vmatpush.msrb.mxu0 %v102_v33 }
 0xa59   :  { %v1755_v16 = vsub.f32 1.5, %v1754_v18 }
 0xa5a   :  { %v4209_v21 = vpop.eup %4208  ;;  %v1782_v14 = vadd.f32 %v1780_v53, %v1777_v32  ;;  %1995 = vmatpush.msrb.mxu0 %v101_v12 }
 0xa5b   :  { %v1756_v43 = vmul.f32 %v4207_v3, %v1755_v16  ;;  %v1762_v6 = vmul.f32 %v4209_v21, %v1730_v35  ;;  %vm1768_vm11 = vweird.f32 %v4209_v21 }
 0xa5c   :  { %3918 = vmatmul.msk.f32.gmra.mxu2 %vm119_vm0, %v1782_v14  ;;  %vm1769_vm13 = vmor %vm1767_vm12, %vm1768_vm11 }
 0xa5d   :  { %v1760_v28 = vsel %vm1759_vm10, %v4207_v3, %v1756_v43  ;;  %v1763_v0 = vmul.f32 %v4209_v21, %v1762_v6  ;;  %v100_v3 = vld [vmem:[%s6225_s2 + $0xd8] sm:$0xff] }
 0xa5e   :  { %v1773_v56 = vmul.f32 %v1760_v28, %v5266_v46  ;;  %v118_v46 = vld [vmem:[%s6226_s3 + $0x40] sm:$0xff]  ;;  %1996 = vmatpush.msrb.mxu0 %v100_v3 }
 0xa5f   :  { %v1764_v47 = vmul.f32 0.5, %v1763_v0  ;;  %v1785_v19 = vperm.slane %v118_v46, 0 }
 0xa60   :  { %v1778_v61 = vmul.f32 %v1775_v11, %v1773_v56  ;;  %1997 = vmatpush.msrb.mxu0 %v99_v9  ;;  %v96_v56 = vld [vmem:[%s6225_s2 + $0xb8] sm:$0xff] }
 0xa61   :  { %v1765_v25 = vsub.f32 1.5, %v1764_v47 }
 0xa62   :  { %v1783_v26 = vadd.f32 %v1780_v53, %v1778_v61  ;;  %1998 = vmatpush.msrb.mxu0 %v98_v57 }
 0xa63   :  { %v1766_v13 = vmul.f32 %v4209_v21, %v1765_v25 }
 0xa64   :  { %3919 = vmatmul.msk.f32.gmra.mxu2 %vm119_vm0, %v1783_v26  ;;  %v95_v26 = vld [vmem:[%s6225_s2 + $0xb0] sm:$0xff] }
 0xa65   :  { %v1770_v40 = vsel %vm1769_vm13, %v4209_v21, %v1766_v13  ;;  %v97_v21 = vld [vmem:[%s6225_s2 + $0xc0] sm:$0xff] }
 0xa66   :  { %v1774_v63 = vmul.f32 %v1770_v40, %v5273_v15  ;;  %1999 = vmatpush.msrb.mxu0 %v97_v21 }
 0xa68   :  { %v1779_v44 = vmul.f32 %v1775_v11, %v1774_v63  ;;  %2000 = vmatpush.msrb.mxu0 %v96_v56 }
 0xa6a   :  { %v1784_v60 = vadd.f32 %v1780_v53, %v1779_v44  ;;  %v94_v44 = vld [vmem:[%s6225_s2 + $0xa8] sm:$0xff]  ;;  %2001 = vmatpush.msrb.mxu0 %v95_v26 }
 0xa6c   :  { %3920 = vmatmul.msk.f32.gmra.mxu2 %vm119_vm0, %v1784_v60  ;;  %2002 = vmatpush.msrb.mxu0 %v94_v44 }
 0xad7   :  { %v1815_v41 = vpop.f32.mrf.mxu2 }
 0xad8   :  { %v5306_v51 = vadd.f32 %v1815_v41, %v1785_v19 }
 0xada   :  { %v5309_v23 = vmul.f32 0.70710677, %v5306_v51 }
 0xadc   :  { %v5315_v15 = vand.u32 2147483647, %v5309_v23  ;;  %vm1835_vm12 = vcmp.ge.f32.partialorder %v5309_v23, 0.0 }
 0xade   :  { %v1847_v50 = vmul.f32 0.3275911, %v5315_v15  ;;  %v1951_v28 = vsub.f32 0.0, %v5315_v15 }
 0xadf   :  { %v1818_v27 = vpop.f32.mrf.mxu2 }
 0xae0   :  { %v1851_v59 = vadd.f32 1.0, %v1847_v50  ;;  %v5324_v54 = vadd.f32 %v1818_v27, %v1785_v19  ;;  %v1955_v63 = vmul.f32 %v1951_v28, %v5315_v15 }
 0xae2   :  { %4210 = vrcp.f32 %v1851_v59  ;;  %v5333_v29 = vmul.f32 0.70710677, %v5324_v54  ;;  %v1866_v45 = vand.u32 2147483648, %v1851_v59  ;;  %v1864_v22 = vand.u32 2147483647, %v1851_v59 }
 0xae3   :  { %vm1860_vm1 = vweird.f32 %v1851_v59 }
 0xae4   :  { %v5339_v38 = vand.u32 2147483647, %v5333_v29  ;;  %v1867_v18 = vor.u32 1.1754944e-38, %v1866_v45  ;;  %vm1865_vm3 = vcmp.eq.f32.partialorder %v1864_v22, 8.507059e+37 }
 0xae6   :  { %v1848_v8 = vmul.f32 0.3275911, %v5339_v38 }
 0xae7   :  { %v1821_v5 = vpop.f32.mrf.mxu2 }
 0xae8   :  { %v4211_v11 = vpop.eup %4210  ;;  %v5345_v58 = vadd.f32 %v1821_v5, %v1785_v19  ;;  %v5350_v53 = vadd.f32 1.0, %v1848_v8  ;;  %v1952_v8 = vsub.f32 0.0, %v5339_v38 }
 0xae9   :  { %v1856_v42 = vmul.f32 %v4211_v11, %v1851_v59  ;;  %vm1861_vm15 = vweird.f32 %v4211_v11  ;;  %v1959_v59 = vmul.f32 1.442695, %v1955_v63 }
 0xaea   :  { %v5353_v20 = vmul.f32 0.70710677, %v5345_v58  ;;  %4212 = vrcp.f32 %v5350_v53  ;;  %vm1862_vm2 = vmor %vm1860_vm1, %vm1861_vm15  ;;  %v1881_v46 = vand.u32 2147483648, %v5350_v53  ;;  %v1879_v17 = vand.u32 2147483647, %v5350_v53 }
 0xaeb   :  { %v1857_v48 = vsub.f32 1.0, %v1856_v42  ;;  %vm1875_vm5 = vweird.f32 %v5350_v53 }
 0xaec   :  { %v5360_v30 = vand.u32 2147483647, %v5353_v20  ;;  %v1882_v62 = vor.u32 1.1754944e-38, %v1881_v46  ;;  %vm1880_vm7 = vcmp.eq.f32.partialorder %v1879_v17, 8.507059e+37 }
 0xaed   :  { %v1858_v35 = vmul.f32 %v4211_v11, %v1857_v48 }
 0xaee   :  { %v1849_v37 = vmul.f32 0.3275911, %v5360_v30 }
 0xaef   :  { %v1859_v31 = vadd.f32 %v4211_v11, %v1858_v35  ;;  %v1824_v24 = vpop.f32.mrf.mxu2  ;;  %v1956_v35 = vmul.f32 %v1952_v8, %v5339_v38 }
 0xaf0   :  { %v5372_v32 = vadd.f32 1.0, %v1849_v37  ;;  %v5374_v16 = vadd.f32 %v1824_v24, %v1785_v19  ;;  %v4213_v14 = vpop.eup %4212  ;;  %v1953_v24 = vsub.f32 0.0, %v5360_v30 }
 0xaf1   :  { %v1863_v43 = vsel %vm1862_vm2, %v4211_v11, %v1859_v31  ;;  %v1871_v0 = vmul.f32 %v4213_v14, %v5350_v53  ;;  %vm1876_vm4 = vweird.f32 %v4213_v14 }
 0xaf2   :  { %v1868_v6 = vsel %vm1865_vm3, %v1867_v18, %v1863_v43  ;;  %4214 = vrcp.f32 %v5372_v32  ;;  %v5386_v61 = vmul.f32 0.70710677, %v5374_v16  ;;  %vm1877_vm6 = vmor %vm1875_vm5, %vm1876_vm4  ;;  %v1894_v11 = vand.u32 2147483647, %v5372_v32 }
 0xaf3   :  { %v1915_v47 = vmul.f32 1.0614054, %v1868_v6  ;;  %v1872_v25 = vsub.f32 1.0, %v1871_v0  ;;  %v1896_v33 = vand.u32 2147483648, %v5372_v32  ;;  %vm1890_vm9 = vweird.f32 %v5372_v32 }
 0xaf4   :  { %v5392_v40 = vand.u32 2147483647, %v5386_v61  ;;  %vm1895_vm11 = vcmp.eq.f32.partialorder %v1894_v11, 8.507059e+37  ;;  %vm1836_vm3 = vcmp.ge.f32.partialorder %v5333_v29, 0.0  ;;  %vm1837_vm4 = vcmp.ge.f32.partialorder %v5353_v20, 0.0 }
 0xaf5   :  { %v1919_v13 = vadd.f32 -1.4531521, %v1915_v47  ;;  %v1873_v60 = vmul.f32 %v4213_v14, %v1872_v25  ;;  %v1897_v22 = vor.u32 1.1754944e-38, %v1896_v33  ;;  %vm1838_vm5 = vcmp.ge.f32.partialorder %v5386_v61, 0.0 }
 0xaf6   :  { %v1850_v41 = vmul.f32 0.3275911, %v5392_v40 }
 0xaf7   :  { %v1923_v19 = vmul.f32 %v1919_v13, %v1868_v6  ;;  %v1874_v50 = vadd.f32 %v4213_v14, %v1873_v60  ;;  %v1957_v13 = vmul.f32 %v1953_v24, %v5360_v30 }
 0xaf8   :  { %v4215_v1 = vpop.eup %4214  ;;  %v5403_v27 = vadd.f32 1.0, %v1850_v41  ;;  %v4372_v41 = vmov -1.0  }
 0xaf9   :  { %v1927_v7 = vadd.f32 1.4214138, %v1923_v19  ;;  %v1886_v15 = vmul.f32 %v4215_v1, %v5372_v32  ;;  %v1878_v55 = vsel %vm1877_vm6, %v4213_v14, %v1874_v50  ;;  %vm1891_vm8 = vweird.f32 %v4215_v1 }
 0xafa   :  { %4216 = vrcp.f32 %v5403_v27  ;;  %v1883_v5 = vsel %vm1880_vm7, %v1882_v62, %v1878_v55  ;;  %vm1892_vm10 = vmor %vm1890_vm9, %vm1891_vm8  ;;  %v1961_v32 = vmul.f32 1.442695, %v1956_v35  ;;  %v1911_v26 = vand.u32 2147483648, %v5403_v27 }
 0xafb   :  { %v1931_v39 = vmul.f32 %v1927_v7, %v1868_v6  ;;  %v1887_v4 = vsub.f32 1.0, %v1886_v15  ;;  %v1916_v53 = vmul.f32 1.0614054, %v1883_v5  ;;  %4218 = vpow2.f32 %v1959_v59 }
 0xafc   :  { %v1909_v44 = vand.u32 2147483647, %v5403_v27  ;;  %v1839_v17 = vsel %vm1835_vm12, 1.0, %v4372_v41  ;;  %4220 = vpow2.f32 %v1961_v32  ;;  %vm1905_vm15 = vweird.f32 %v5403_v27 }
 0xafd   :  { %v1935_v42 = vadd.f32 -0.28449672, %v1931_v39  ;;  %v1888_v12 = vmul.f32 %v4215_v1, %v1887_v4  ;;  %v1920_v45 = vadd.f32 -1.4531521, %v1916_v53  ;;  %v1912_v15 = vor.u32 1.1754944e-38, %v1911_v26 }
 0xafe   :  { %v1963_v59 = vmul.f32 1.442695, %v1957_v13  ;;  %vm1910_vm2 = vcmp.eq.f32.partialorder %v1909_v44, 8.507059e+37  ;;  %v1841_v32 = vsel %vm1837_vm4, 1.0, %v4372_v41  ;;  %v1842_v44 = vsel %vm1838_vm5, 1.0, %v4372_v41 }
 0xaff   :  { %v1939_v48 = vmul.f32 %v1935_v42, %v1868_v6  ;;  %v1889_v3 = vadd.f32 %v4215_v1, %v1888_v12  ;;  %v1924_v57 = vmul.f32 %v1920_v45, %v1883_v5 }
 0xb00   :  { %v4217_v9 = vpop.eup %4216  ;;  %4222 = vpow2.f32 %v1963_v59 }
 0xb01   :  { %v1943_v37 = vadd.f32 0.2548296, %v1939_v48  ;;  %v1893_v31 = vsel %vm1892_vm10, %v4215_v1, %v1889_v3  ;;  %v1901_v18 = vmul.f32 %v4217_v9, %v5403_v27  ;;  %v1928_v43 = vadd.f32 1.4214138, %v1924_v57  ;;  %v4219_v0 = vpop.eup %4218 }
 0xb02   :  { %v1898_v21 = vsel %vm1895_vm11, %v1897_v22, %v1893_v31  ;;  %vm1906_vm13 = vweird.f32 %v4217_v9  ;;  %v4221_v53 = vpop.eup %4220 }
 0xb03   :  { %v1947_v14 = vmul.f32 %v1943_v37, %v1868_v6  ;;  %v1917_v28 = vmul.f32 1.0614054, %v1898_v21  ;;  %v1902_v38 = vsub.f32 1.0, %v1901_v18  ;;  %v1932_v47 = vmul.f32 %v1928_v43, %v1883_v5  ;;  %vm1907_vm1 = vmor %vm1905_vm15, %vm1906_vm13 }
 0xb04   :  { %v1827_v6 = vmul.f32 0.5, %v5306_v51  ;;  %v1954_v51 = vsub.f32 0.0, %v5392_v40 }
 0xb05   :  { %v1967_v56 = vmul.f32 %v4219_v0, %v1947_v14  ;;  %v1921_v25 = vadd.f32 -1.4531521, %v1917_v28  ;;  %v1903_v63 = vmul.f32 %v4217_v9, %v1902_v38  ;;  %v1936_v46 = vadd.f32 -0.28449672, %v1932_v47 }
 0xb06   :  { %v1958_v12 = vmul.f32 %v1954_v51, %v5392_v40  ;;  %v4223_v24 = vpop.eup %4222  ;;  %v1828_v14 = vmul.f32 0.5, %v5324_v54 }
 0xb07   :  { %v1971_v60 = vsub.f32 1.0, %v1967_v56  ;;  %v1925_v19 = vmul.f32 %v1921_v25, %v1898_v21  ;;  %v1904_v1 = vadd.f32 %v4217_v9, %v1903_v63  ;;  %v1940_v30 = vmul.f32 %v1936_v46, %v1883_v5 }
 0xb08   :  { %v1965_v57 = vmul.f32 1.442695, %v1958_v12 }
 0xb09   :  { %v1975_v50 = vmul.f32 %v1971_v60, %v1839_v17  ;;  %v1929_v7 = vadd.f32 1.4214138, %v1925_v19  ;;  %v1908_v55 = vsel %vm1907_vm1, %v4217_v9, %v1904_v1  ;;  %v1944_v39 = vadd.f32 0.2548296, %v1940_v30 }
 0xb0a   :  { %v1913_v8 = vsel %vm1910_vm2, %v1912_v15, %v1908_v55  ;;  %v1840_v9 = vsel %vm1836_vm3, 1.0, %v4372_v41  ;;  %4224 = vpow2.f32 %v1965_v57  ;;  %v1830_v60 = vmul.f32 0.5, %v5374_v16 }
 0xb0b   :  { %v1979_v62 = vadd.f32 1.0, %v1975_v50  ;;  %v1933_v4 = vmul.f32 %v1929_v7, %v1898_v21  ;;  %v1918_v23 = vmul.f32 1.0614054, %v1913_v8  ;;  %v1948_v33 = vmul.f32 %v1944_v39, %v1883_v5 }
 0xb0c   :  { %v2020_v17 = vperm.slane %v5228_v49, 5 }
 0xb0d   :  { %v1983_v11 = vmul.f32 %v1979_v62, %v1827_v6  ;;  %v1937_v42 = vadd.f32 -0.28449672, %v1933_v4  ;;  %v1922_v27 = vadd.f32 -1.4531521, %v1918_v23  ;;  %v1968_v48 = vmul.f32 %v4221_v53, %v1948_v33 }
 0xb0f   :  { %2003 = vmatmul.f32.vlgmr.msrb.gmra.mxu0 %v1983_v11  ;;  %v1941_v45 = vmul.f32 %v1937_v42, %v1898_v21  ;;  %v1926_v3 = vmul.f32 %v1922_v27, %v1913_v8  ;;  %v1972_v35 = vsub.f32 1.0, %v1968_v48 }
 0xb10   :  { %v4225_v13 = vpop.eup %4224 }
 0xb11   :  { %v1945_v22 = vadd.f32 0.2548296, %v1941_v45  ;;  %v1930_v37 = vadd.f32 1.4214138, %v1926_v3  ;;  %v1976_v31 = vmul.f32 %v1972_v35, %v1840_v9 }
 0xb13   :  { %v1949_v5 = vmul.f32 %v1945_v22, %v1898_v21  ;;  %v1934_v18 = vmul.f32 %v1930_v37, %v1913_v8  ;;  %v1980_v29 = vadd.f32 1.0, %v1976_v31  ;;  %v1829_v21 = vmul.f32 0.5, %v5345_v58 }
 0xb15   :  { %v1969_v40 = vmul.f32 %v4223_v24, %v1949_v5  ;;  %v1938_v43 = vadd.f32 -0.28449672, %v1934_v18  ;;  %v1984_v28 = vmul.f32 %v1980_v29, %v1828_v14  ;;  %v2049_v24 = vld [vmem:[%s6226_s3 + $0x60] sm:$0xff]  ;;  %v2048_v14 = vld [vmem:[%s6226_s3 + $0x58] sm:$0xff] }
 0xb16   :  { %2177 = vmatpush.msrb.mxu1 %v2049_v24 }
 0xb17   :  { %v1973_v0 = vsub.f32 1.0, %v1969_v40  ;;  %v1942_v38 = vmul.f32 %v1938_v43, %v1913_v8  ;;  %2006 = vmatmul.f32.gmra.mxu0 %v1984_v28  ;;  %v2047_v40 = vld [vmem:[%s6226_s3 + $0x50] sm:$0xff]  ;;  %v2046_v43 = vld [vmem:[%s6226_s3 + $0x48] sm:$0xff] }
 0xb18   :  { %2178 = vmatpush.msrb.mxu1 %v2048_v14 }
 0xb19   :  { %v1977_v56 = vmul.f32 %v1973_v0, %v1841_v32  ;;  %v1946_v47 = vadd.f32 0.2548296, %v1942_v38 }
 0xb1a   :  { %2179 = vmatpush.msrb.mxu1 %v2047_v40 }
 0xb1b   :  { %v1981_v25 = vadd.f32 1.0, %v1977_v56  ;;  %v1950_v26 = vmul.f32 %v1946_v47, %v1913_v8 }
 0xb1c   :  { %2180 = vmatpush.msrb.mxu1 %v2046_v43 }
 0xb1d   :  { %v1985_v54 = vmul.f32 %v1981_v25, %v1829_v21  ;;  %v1970_v20 = vmul.f32 %v4225_v13, %v1950_v26  ;;  %v2025_v25 = vld [vmem:[%s6225_s2 + $0x128] sm:$0xff] }
 0xb1f   :  { %v1974_v63 = vsub.f32 1.0, %v1970_v20  ;;  %2009 = vmatmul.f32.gmra.mxu0 %v1985_v54 }
 0xb21   :  { %v1978_v6 = vmul.f32 %v1974_v63, %v1842_v44  ;;  %v2143_v44 = vperm.slane %v2025_v25, 0 }
 0xb23   :  { %v1982_v46 = vadd.f32 1.0, %v1978_v6 }
 0xb25   :  { %v1986_v19 = vmul.f32 %v1982_v46, %v1830_v60 }
 0xb27   :  { %2012 = vmatmul.f32.gmra.mxu0 %v1986_v19 }
 0xb8c   :  { %v2004_v58 = vpop.f32.mrf.mxu0 }
 0xb8d   :  { %v2016_v1 = vadd.f32 %v2004_v58, %v5233_v2 }
 0xb8f   :  { %v5435_v50 = vadd.f32 %v2020_v17, %v2016_v1 }
 0xb91   :  { %v2055_v61 = vsel %vm119_vm0, %v5435_v50, 0.0 }
 0xb92   :  { %2056 = vadd.xlane.f32.xlu1 %v2055_v61 }
 0xb94   :  { %v2007_v30 = vpop.f32.mrf.mxu0 }
 0xb95   :  { %v2017_v7 = vadd.f32 %v2007_v30, %v5239_v36 }
 0xb97   :  { %v5440_v15 = vadd.f32 %v2020_v17, %v2017_v7 }
 0xb99   :  { %v2058_v16 = vsel %vm119_vm0, %v5440_v15, 0.0 }
 0xb9a   :  { %2059 = vadd.xlane.f32.xlu0 %v2058_v16 }
 0xb9c   :  { %v2010_v59 = vpop.f32.mrf.mxu0 }
 0xb9d   :  { %v2018_v49 = vadd.f32 %v2010_v59, %v5245_v10 }
 0xb9f   :  { %v5445_v51 = vadd.f32 %v2020_v17, %v2018_v49 }
 0xba1   :  { %v2061_v2 = vsel %vm119_vm0, %v5445_v51, 0.0 }
 0xba2   :  { %2062 = vadd.xlane.f32.xlu1 %v2061_v2 }
 0xba4   :  { %v2013_v55 = vpop.f32.mrf.mxu0 }
 0xba5   :  { %v2019_v62 = vadd.f32 %v2013_v55, %v5250_v52 }
 0xba7   :  { %v5450_v39 = vadd.f32 %v2020_v17, %v2019_v62  ;;  %v2148_v17 = vperm.slane %v2025_v25, 1 }
 0xba9   :  { %v2064_v36 = vsel %vm119_vm0, %v5450_v39, 0.0 }
 0xbaa   :  { %2065 = vadd.xlane.f32.xlu0 %v2064_v36 }
 0xc05   :  { %v2057_v4 = vpop.xlane.xlu1 %2056 }
 0xc06   :  { %v2067_v8 = vmul.f32 %v2057_v4, %v4487_v34 }
 0xc08   :  { %v2071_v10 = vsub.f32 %v5435_v50, %v2067_v8 }
 0xc0a   :  { %v2075_v23 = vmul.f32 %v2071_v10, %v2071_v10 }
 0xc0c   :  { %v2079_v11 = vsel %vm119_vm0, %v2075_v23, 0.0 }
 0xc0d   :  { %2080 = vadd.xlane.f32.xlu2 %v2079_v11  ;;  %v2060_v33 = vpop.xlane.xlu0 %2059 }
 0xc0e   :  { %v2068_v42 = vmul.f32 %v2060_v33, %v4487_v34 }
 0xc10   :  { %v5459_v52 = vsub.f32 %v5440_v15, %v2068_v42 }
 0xc12   :  { %v2076_v53 = vmul.f32 %v5459_v52, %v5459_v52 }
 0xc14   :  { %v2082_v27 = vsel %vm119_vm0, %v2076_v53, 0.0 }
 0xc15   :  { %2083 = vadd.xlane.f32.xlu1 %v2082_v27  ;;  %v2063_v12 = vpop.xlane.xlu1 %2062 }
 0xc16   :  { %v2069_v48 = vmul.f32 %v2063_v12, %v4487_v34 }
 0xc18   :  { %v5466_v45 = vsub.f32 %v5445_v51, %v2069_v48 }
 0xc1a   :  { %v2077_v3 = vmul.f32 %v5466_v45, %v5466_v45 }
 0xc1c   :  { %v2085_v35 = vsel %vm119_vm0, %v2077_v3, 0.0 }
 0xc1d   :  { %v2066_v22 = vpop.xlane.xlu0 %2065  ;;  %2086 = vadd.xlane.f32.xlu0 %v2085_v35 }
 0xc1e   :  { %v2070_v9 = vmul.f32 %v2066_v22, %v4487_v34 }
 0xc20   :  { %v5473_v37 = vsub.f32 %v5450_v39, %v2070_v9 }
 0xc22   :  { %v2078_v57 = vmul.f32 %v5473_v37, %v5473_v37 }
 0xc24   :  { %v2088_v31 = vsel %vm119_vm0, %v2078_v57, 0.0 }
 0xc25   :  { %2089 = vadd.xlane.f32.xlu2 %v2088_v31 }
 0xc80   :  { %v2081_v5 = vpop.xlane.xlu2 %2080 }
 0xc81   :  { %v2091_v18 = vmul.f32 %v2081_v5, %v4487_v34 }
 0xc83   :  { %v2095_v29 = vadd.f32 1e-05, %v2091_v18 }
 0xc85   :  { %4226 = vrsqrt.f32 %v2095_v29  ;;  %vm2105_vm7 = vweird.f32 %v2095_v29 }
 0xc88   :  { %v2084_v28 = vpop.xlane.xlu1 %2083 }
 0xc89   :  { %v2092_v32 = vmul.f32 %v2084_v28, %v4487_v34 }
 0xc8b   :  { %v4227_v0 = vpop.eup %4226  ;;  %v2096_v56 = vadd.f32 1e-05, %v2092_v32 }
 0xc8c   :  { %v2100_v38 = vmul.f32 %v4227_v0, %v2095_v29  ;;  %vm2106_vm6 = vweird.f32 %v4227_v0 }
 0xc8d   :  { %4228 = vrsqrt.f32 %v2096_v56  ;;  %vm2107_vm8 = vmor %vm2105_vm7, %vm2106_vm6  ;;  %vm2115_vm10 = vweird.f32 %v2096_v56 }
 0xc8e   :  { %v2101_v47 = vmul.f32 %v4227_v0, %v2100_v38 }
 0xc90   :  { %v2102_v21 = vmul.f32 0.5, %v2101_v47  ;;  %v2087_v13 = vpop.xlane.xlu0 %2086 }
 0xc91   :  { %v2093_v54 = vmul.f32 %v2087_v13, %v4487_v34  ;;  %v5542_v13 = vld [vmem:[%s6224_s1 + $0x8] sm:$0xff] }
 0xc92   :  { %v2103_v26 = vsub.f32 1.5, %v2102_v21 }
 0xc93   :  { %v4229_v63 = vpop.eup %4228  ;;  %v2097_v6 = vadd.f32 1e-05, %v2093_v54 }
 0xc94   :  { %v2104_v20 = vmul.f32 %v4227_v0, %v2103_v26  ;;  %v2110_v46 = vmul.f32 %v4229_v63, %v2096_v56  ;;  %vm2116_vm9 = vweird.f32 %v4229_v63  ;;  %v5535_v56 = vld [vmem:[%s6224_s1] sm:$0xff] }
 0xc95   :  { %4230 = vrsqrt.f32 %v2097_v6  ;;  %vm2117_vm11 = vmor %vm2115_vm10, %vm2116_vm9  ;;  %vm2125_vm13 = vweird.f32 %v2097_v6 }
 0xc96   :  { %v2108_v60 = vsel %vm2107_vm8, %v4227_v0, %v2104_v20  ;;  %v2111_v58 = vmul.f32 %v4229_v63, %v2110_v46 }
 0xc97   :  { %v2139_v19 = vmul.f32 %v2108_v60, %v2071_v10 }
 0xc98   :  { %v2112_v61 = vmul.f32 0.5, %v2111_v58  ;;  %v2090_v30 = vpop.xlane.xlu2 %2089  ;;  %v5556_v58 = vld [vmem:[%s6224_s1 + $0x18] sm:$0xff] }
 0xc99   :  { %v2144_v1 = vmul.f32 %v2143_v44, %v2139_v19  ;;  %v2094_v7 = vmul.f32 %v2090_v30, %v4487_v34 }
 0xc9a   :  { %v2113_v59 = vsub.f32 1.5, %v2112_v61 }
 0xc9b   :  { %v2149_v16 = vadd.f32 %v2148_v17, %v2144_v1  ;;  %v4231_v49 = vpop.eup %4230  ;;  %v2098_v2 = vadd.f32 1e-05, %v2094_v7 }
 0xc9c   :  { %v2114_v55 = vmul.f32 %v4229_v63, %v2113_v59  ;;  %v2120_v62 = vmul.f32 %v4231_v49, %v2097_v6  ;;  %vm2126_vm12 = vweird.f32 %v4231_v49  ;;  %v5549_v6 = vld [vmem:[%s6224_s1 + $0x10] sm:$0xff] }
 0xc9d   :  { %3921 = vmatmul.msk.f32.vlgmr.msrb.gmra.mxu1 %vm119_vm0, %v2149_v16  ;;  %4232 = vrsqrt.f32 %v2098_v2  ;;  %vm2127_vm15 = vmor %vm2125_vm13, %vm2126_vm12  ;;  %vm2135_vm2 = vweird.f32 %v2098_v2 }
 0xc9e   :  { %v2118_v36 = vsel %vm2117_vm11, %v4229_v63, %v2114_v55  ;;  %v2121_v4 = vmul.f32 %v4231_v49, %v2120_v62 }
 0xc9f   :  { %v2140_v8 = vmul.f32 %v2118_v36, %v5459_v52 }
 0xca0   :  { %v2122_v10 = vmul.f32 0.5, %v2121_v4 }
 0xca1   :  { %v2145_v23 = vmul.f32 %v2143_v44, %v2140_v8 }
 0xca2   :  { %v2123_v11 = vsub.f32 1.5, %v2122_v10 }
 0xca3   :  { %v4233_v33 = vpop.eup %4232  ;;  %v2150_v42 = vadd.f32 %v2148_v17, %v2145_v23 }
 0xca4   :  { %v2124_v53 = vmul.f32 %v4231_v49, %v2123_v11  ;;  %v2130_v27 = vmul.f32 %v4233_v33, %v2098_v2  ;;  %vm2136_vm1 = vweird.f32 %v4233_v33 }
 0xca5   :  { %3922 = vmatmul.msk.f32.gmra.mxu1 %vm119_vm0, %v2150_v42  ;;  %vm2137_vm3 = vmor %vm2135_vm2, %vm2136_vm1 }
 0xca6   :  { %v2128_v12 = vsel %vm2127_vm15, %v4231_v49, %v2124_v53  ;;  %v2131_v48 = vmul.f32 %v4233_v33, %v2130_v27 }
 0xca7   :  { %v2141_v3 = vmul.f32 %v2128_v12, %v5466_v45 }
 0xca8   :  { %v2132_v35 = vmul.f32 0.5, %v2131_v48 }
 0xca9   :  { %v2146_v22 = vmul.f32 %v2143_v44, %v2141_v3 }
 0xcaa   :  { %v2133_v9 = vsub.f32 1.5, %v2132_v35 }
 0xcab   :  { %v2151_v52 = vadd.f32 %v2148_v17, %v2146_v22 }
 0xcac   :  { %v2134_v57 = vmul.f32 %v4233_v33, %v2133_v9 }
 0xcad   :  { %3923 = vmatmul.msk.f32.gmra.mxu1 %vm119_vm0, %v2151_v52 }
 0xcae   :  { %v2138_v31 = vsel %vm2137_vm3, %v4233_v33, %v2134_v57 }
 0xcaf   :  { %v2142_v5 = vmul.f32 %v2138_v31, %v5473_v37 }
 0xcb1   :  { %v2147_v24 = vmul.f32 %v2143_v44, %v2142_v5 }
 0xcb3   :  { %v2152_v18 = vadd.f32 %v2148_v17, %v2147_v24 }
 0xcb5   :  { %3924 = vmatmul.msk.f32.gmra.mxu1 %vm119_vm0, %v2152_v18 }
 0xd1a   :  { %v5504_v14 = vpop.f32.mrf.mxu1 }
 0xd22   :  { %v5506_v45 = vpop.f32.mrf.mxu1 }
 0xd23   :  { %2200 = vrot.lane.b32.xlu2 %v5506_v45, %s4361_s24  ;;  %v5600_v35 = vpack.i.bf16 %v5504_v14, %v5506_v45 }
 0xd2a   :  { %v5510_v29 = vpop.f32.mrf.mxu1 }
 0xd2b   :  { %2202 = vrot.lane.b32.xlu0 %v5510_v29, %s4361_s24 }
 0xd32   :  { %v5514_v40 = vpop.f32.mrf.mxu1 }
 0xd33   :  { %2198 = vrot.lane.b32.xlu0 %v5504_v14, %s4361_s24  ;;  %2204 = vrot.lane.b32.xlu1 %v5514_v40, %s4361_s24  ;;  %v5562_v30 = vpack.i.bf16 %v5510_v29, %v5514_v40 }
 0xd7d   :  { %v2201_v28 = vpop.permute.xlu2 %2200 }
 0xd9d   :  { %v2203_v43 = vpop.permute.xlu0 %2202 }
 0xda5   :  { %v2205_v37 = vpop.permute.xlu1 %2204  ;;  %v2199_v0 = vpop.permute.xlu0 %2198 }
 0xda6   :  { %3925 = vmatpush.xpose.msk.msrb.mxu3 %vm278_vm14, %v2205_v37 }
 0xdaa   :  { %3926 = vmatpush.xpose.msk.msrb.mxu3 %vm278_vm14, %v2203_v43 }
 0xdae   :  { %3927 = vmatpush.xpose.msk.msrb.mxu3 %vm278_vm14, %v2201_v28 }
 0xdb2   :  { %3928 = vmatpush.xpose.msk.msrb.mxu3 %vm278_vm14, %v2199_v0 }
 0xdb5   :  { %3929 = vmatmul.msk.f32.vlgmr.msrb.gmra.mxu3 %vm278_vm14, %v5504_v14 }
 0xdbd   :  { %3930 = vmatmul.msk.f32.gmra.mxu3 %vm278_vm14, %v5506_v45 }
 0xdc5   :  { %3931 = vmatmul.msk.f32.gmra.mxu3 %vm278_vm14, %v5510_v29 }
 0xdcd   :  { %3932 = vmatmul.msk.f32.gmra.mxu3 %vm278_vm14, %v5514_v40 }
 0xe38   :  { %v2239_v32 = vpop.f32.mrf.mxu3 }
 0xe39   :  { %v2251_v38 = vmul.f32 0.35355338, %v2239_v32 }
 0xe3b   :  { %v2255_v47 = vadd.f32 %v5535_v56, %v2251_v38 }
 0xe3d   :  { %v2259_v21 = vsel %vm119_vm0, %v2255_v47, -inf }
 0xe3e   :  { %2260 = vmax.xlane.f32.xlu1 %v2259_v21 }
 0xe40   :  { %v2242_v25 = vpop.f32.mrf.mxu3 }
 0xe41   :  { %v2252_v26 = vmul.f32 0.35355338, %v2242_v25 }
 0xe43   :  { %v2256_v54 = vadd.f32 %v5542_v13, %v2252_v26 }
 0xe45   :  { %v2262_v20 = vsel %vm119_vm0, %v2256_v54, -inf }
 0xe46   :  { %2263 = vmax.xlane.f32.xlu2 %v2262_v20 }
 0xe48   :  { %v2245_v63 = vpop.f32.mrf.mxu3 }
 0xe49   :  { %v2253_v44 = vmul.f32 0.35355338, %v2245_v63 }
 0xe4b   :  { %v2257_v60 = vadd.f32 %v5549_v6, %v2253_v44 }
 0xe4d   :  { %v2265_v46 = vsel %vm119_vm0, %v2257_v60, -inf }
 0xe4e   :  { %2266 = vmax.xlane.f32.xlu0 %v2265_v46 }
 0xe50   :  { %v2248_v19 = vpop.f32.mrf.mxu3 }
 0xe51   :  { %v2254_v17 = vmul.f32 0.35355338, %v2248_v19 }
 0xe53   :  { %v2258_v1 = vadd.f32 %v5556_v58, %v2254_v17 }
 0xe55   :  { %v2268_v61 = vsel %vm119_vm0, %v2258_v1, -inf }
 0xe56   :  { %2269 = vmax.xlane.f32.xlu1 %v2268_v61 }
 0xe6f   :  { %4057 = vrot.lane.b32.xlu1 %v5562_v30, %s4362_s8 }
 0xe77   :  { %2418 = vrot.lane.b32.xlu1 %v5506_v45, %s4363_s9 }
 0xe7f   :  { %2408 = vrot.lane.b32.xlu1 %v5504_v14, %s4364_s10 }
 0xe87   :  { %2412 = vrot.lane.b32.xlu1 %v5510_v29, %s4364_s10 }
 0xe8f   :  { %2720 = vrot.lane.b32.xlu1 %v5510_v29, %s4365_s11 }
 0xe97   :  { %2718 = vrot.lane.b32.xlu1 %v5506_v45, %s4365_s11 }
 0xe9f   :  { %2979 = vrot.lane.b32.xlu1 %v5504_v14, %s4366_s12 }
 0xea7   :  { %2710 = vrot.lane.b32.xlu1 %v5506_v45, %s4367_s13 }
 0xeaf   :  { %2975 = vrot.lane.b32.xlu1 %v5510_v29, %s4368_s14 }
 0xeb1   :  { %v2261_v7 = vpop.xlane.xlu1 %2260 }
 0xeb2   :  { %v2271_v16 = vsub.f32 %v2255_v47, %v2261_v7 }
 0xeb4   :  { %v2275_v59 = vmul.f32 1.442695, %v2271_v16 }
 0xeb6   :  { %4234 = vpow2.f32 %v2275_v59  ;;  %v2026_v59 = vld [vmem:[%s6225_s2 + $0x130] sm:$0xff] }
 0xeb9   :  { %v2264_v49 = vpop.xlane.xlu2 %2263 }
 0xeba   :  { %v2272_v2 = vsub.f32 %v2256_v54, %v2264_v49 }
 0xebc   :  { %v5582_v55 = vpop.eup %4234  ;;  %v2277_v62 = vmul.f32 1.442695, %v2272_v2 }
 0xebd   :  { %v2283_v36 = vsel %vm119_vm0, %v5582_v55, 0.0 }
 0xebe   :  { %4236 = vpow2.f32 %v2277_v62  ;;  %2284 = vadd.xlane.f32.xlu2 %v2283_v36 }
 0xec1   :  { %v2267_v4 = vpop.xlane.xlu0 %2266 }
 0xec2   :  { %v2273_v8 = vsub.f32 %v2257_v60, %v2267_v4 }
 0xec4   :  { %v5586_v10 = vpop.eup %4236  ;;  %v2279_v23 = vmul.f32 1.442695, %v2273_v8 }
 0xec5   :  { %v2286_v11 = vsel %vm119_vm0, %v5586_v10, 0.0 }
 0xec6   :  { %4238 = vpow2.f32 %v2279_v23  ;;  %2287 = vadd.xlane.f32.xlu0 %v2286_v11 }
 0xec9   :  { %v2270_v33 = vpop.xlane.xlu1 %2269 }
 0xeca   :  { %v2274_v42 = vsub.f32 %v2258_v1, %v2270_v33 }
 0xecc   :  { %v5590_v53 = vpop.eup %4238  ;;  %v2281_v27 = vmul.f32 1.442695, %v2274_v42 }
 0xecd   :  { %v2289_v12 = vsel %vm119_vm0, %v5590_v53, 0.0 }
 0xece   :  { %4240 = vpow2.f32 %v2281_v27  ;;  %2290 = vadd.xlane.f32.xlu2 %v2289_v12 }
 0xed4   :  { %v5594_v48 = vpop.eup %4240 }
 0xed5   :  { %v2292_v3 = vsel %vm119_vm0, %v5594_v48, 0.0 }
 0xed6   :  { %2293 = vadd.xlane.f32.xlu2 %v2292_v3 }
 0xeda   :  { %4062 = vrot.lane.b32.xlu0 %v5600_v35, %s4362_s8 }
 0xee1   :  { %v4058_v22 = vpop.permute.xlu1 %4057 }
 0xee2   :  { %v4059_v9 = vunpack.i.l.bf16 %v4058_v22  ;;  %2420 = vrot.lane.b32.xlu0 %v5510_v29, %s4363_s9  ;;  %v4060_v52 = vunpack.i.h.bf16 %v4058_v22 }
 0xee4   :  { %2391 = vmatpush.msra.mxu2 %v4059_v9 }
 0xee6   :  { %2392 = vmatpush.msra.mxu2 %v4060_v52 }
 0xee9   :  { %v2419_v18 = vpop.permute.xlu1 %2418 }
 0xeea   :  { %2416 = vrot.lane.b32.xlu0 %v5504_v14, %s4363_s9 }
 0xeee   :  { %2422 = vrot.lane.b32.xlu2 %v5514_v40, %s4363_s9 }
 0xef1   :  { %v5639_v38 = vpop.permute.xlu1 %2408 }
 0xef2   :  { %2410 = vrot.lane.b32.xlu0 %v5506_v45, %s4364_s10 }
 0xef6   :  { %2722 = vrot.lane.b32.xlu2 %v5514_v40, %s4365_s11 }
 0xef9   :  { %v2413_v2 = vpop.permute.xlu1 %2412 }
 0xefa   :  { %2985 = vrot.lane.b32.xlu0 %v5514_v40, %s4366_s12 }
 0xefe   :  { %2983 = vrot.lane.b32.xlu2 %v5510_v29, %s4366_s12 }
 0xf01   :  { %v2721_v52 = vpop.permute.xlu1 %2720 }
 0xf02   :  { %2414 = vrot.lane.b32.xlu0 %v5514_v40, %s4364_s10 }
 0xf06   :  { %2981 = vrot.lane.b32.xlu2 %v5506_v45, %s4366_s12 }
 0xf0a   :  { %2716 = vrot.lane.b32.xlu0 %v5504_v14, %s4365_s11 }
 0xf0e   :  { %2708 = vrot.lane.b32.xlu2 %v5504_v14, %s4367_s13 }
 0xf12   :  { %2971 = vrot.lane.b32.xlu0 %v5504_v14, %s4368_s14 }
 0xf16   :  { %2973 = vrot.lane.b32.xlu2 %v5506_v45, %s4368_s14 }
 0xf1a   :  { %2712 = vrot.lane.b32.xlu0 %v5510_v29, %s4367_s13 }
 0xf1e   :  { %2714 = vrot.lane.b32.xlu2 %v5514_v40, %s4367_s13 }
 0xf22   :  { %2977 = vrot.lane.b32.xlu0 %v5514_v40, %s4368_s14 }
 0xf31   :  { %v2285_v57 = vpop.xlane.xlu2 %2284 }
 0xf32   :  { %4242 = vrcp.f32 %v2285_v57  ;;  %v2306_v32 = vand.u32 2147483648, %v2285_v57  ;;  %vm2300_vm5 = vweird.f32 %v2285_v57  ;;  %v2304_v47 = vand.u32 2147483647, %v2285_v57 }
 0xf34   :  { %v2307_v20 = vor.u32 1.1754944e-38, %v2306_v32  ;;  %vm2305_vm7 = vcmp.eq.f32.partialorder %v2304_v47, 8.507059e+37 }
 0xf38   :  { %v4243_v31 = vpop.eup %4242 }
 0xf39   :  { %v2288_v5 = vpop.xlane.xlu0 %2287  ;;  %v2296_v24 = vmul.f32 %v4243_v31, %v2285_v57  ;;  %vm2301_vm4 = vweird.f32 %v4243_v31 }
 0xf3a   :  { %4244 = vrcp.f32 %v2288_v5  ;;  %vm2302_vm6 = vmor %vm2300_vm5, %vm2301_vm4  ;;  %v2321_v17 = vand.u32 2147483648, %v2288_v5  ;;  %vm2315_vm9 = vweird.f32 %v2288_v5  ;;  %v2319_v16 = vand.u32 2147483647, %v2288_v5 }
 0xf3b   :  { %v2297_v14 = vsub.f32 1.0, %v2296_v24 }
 0xf3c   :  { %v2322_v8 = vor.u32 1.1754944e-38, %v2321_v17  ;;  %vm2320_vm11 = vcmp.eq.f32.partialorder %v2319_v16, 8.507059e+37 }
 0xf3d   :  { %v2298_v45 = vmul.f32 %v4243_v31, %v2297_v14 }
 0xf3f   :  { %v2299_v29 = vadd.f32 %v4243_v31, %v2298_v45 }
 0xf40   :  { %v4245_v37 = vpop.eup %4244 }
 0xf41   :  { %v5636_v43 = vpop.xlane.xlu2 %2290  ;;  %v2311_v28 = vmul.f32 %v4245_v37, %v2288_v5  ;;  %v2303_v25 = vsel %vm2302_vm6, %v4243_v31, %v2299_v29  ;;  %vm2316_vm8 = vweird.f32 %v4245_v37  ;;  %v2719_v29 = vpop.permute.xlu1 %2718 }
 0xf42   :  { %4246 = vrcp.f32 %v5636_v43  ;;  %v2308_v44 = vsel %vm2305_vm7, %v2307_v20, %v2303_v25  ;;  %vm2317_vm10 = vmor %vm2315_vm9, %vm2316_vm8  ;;  %v2336_v42 = vand.u32 2147483648, %v5636_v43  ;;  %vm2330_vm13 = vweird.f32 %v5636_v43 }
 0xf43   :  { %v2312_v0 = vsub.f32 1.0, %v2311_v28  ;;  %v2309_v7 = vmul.f32 %v5582_v55, %v2308_v44  ;;  %v2334_v12 = vand.u32 2147483647, %v5636_v43 }
 0xf44   :  { %v2337_v9 = vor.u32 1.1754944e-38, %v2336_v42 }
 0xf45   :  { %v2313_v26 = vmul.f32 %v4245_v37, %v2312_v0  ;;  %vm2335_vm1 = vcmp.eq.f32.partialorder %v2334_v12, 8.507059e+37 }
 0xf47   :  { %v2314_v19 = vadd.f32 %v4245_v37, %v2313_v26 }
 0xf48   :  { %v4247_v40 = vpop.eup %4246 }
 0xf49   :  { %v5641_v21 = vpop.xlane.xlu2 %2293  ;;  %v2326_v54 = vmul.f32 %v4247_v40, %v5636_v43  ;;  %v2318_v4 = vsel %vm2317_vm10, %v4245_v37, %v2314_v19  ;;  %vm2331_vm12 = vweird.f32 %v4247_v40  ;;  %v2980_v47 = vpop.permute.xlu1 %2979 }
 0xf4a   :  { %4248 = vrcp.f32 %v5641_v21  ;;  %v2323_v23 = vsel %vm2320_vm11, %v2322_v8, %v2318_v4  ;;  %vm2332_vm15 = vmor %vm2330_vm13, %vm2331_vm12  ;;  %vm2345_vm3 = vweird.f32 %v5641_v21 }
 0xf4b   :  { %v2327_v46 = vsub.f32 1.0, %v2326_v54  ;;  %v2324_v27 = vmul.f32 %v5586_v10, %v2323_v23  ;;  %v2351_v10 = vand.u32 2147483648, %v5641_v21 }
 0xf4c   :  { %v4063_v63 = vpop.permute.xlu0 %4062 }
 0xf4d   :  { %v4064_v60 = vunpack.i.l.bf16 %v4063_v63  ;;  %v4065_v1 = vunpack.i.h.bf16 %v4063_v63  ;;  %v2328_v62 = vmul.f32 %v4247_v40, %v2327_v46  ;;  %v2352_v43 = vor.u32 1.1754944e-38, %v2351_v10 }
 0xf4f   :  { %2393 = vmatpush.msra.mxu2 %v4064_v60  ;;  %v2329_v33 = vadd.f32 %v4247_v40, %v2328_v62 }
 0xf50   :  { %v4249_v61 = vpop.eup %4248 }
 0xf51   :  { %v2423_v49 = vpop.permute.xlu2 %2422  ;;  %2394 = vmatpush.msra.mxu2 %v4065_v1  ;;  %v2341_v36 = vmul.f32 %v4249_v61, %v5641_v21  ;;  %v2333_v22 = vsel %vm2332_vm15, %v4247_v40, %v2329_v33  ;;  %vm2346_vm2 = vweird.f32 %v4249_v61  ;;  %v2711_v26 = vpop.permute.xlu1 %2710 }
 0xf52   :  { %3933 = vmatmul.msk.f32.vlgmr.msra.gmra.mxu2 %vm119_vm0, %v2309_v7  ;;  %3937 = vmatpush.xpose.msk.msra.mxu0 %vm278_vm14, %v2423_v49  ;;  %v2338_v31 = vsel %vm2335_vm1, %v2337_v9, %v2333_v22  ;;  %vm2347_vm4 = vmor %vm2345_vm3, %vm2346_vm2 }
 0xf53   :  { %2694 = vmatpush.msrb.mxu2 %v2026_v59  ;;  %v2342_v11 = vsub.f32 1.0, %v2341_v36  ;;  %v2339_v14 = vmul.f32 %v5590_v53, %v2338_v31 }
 0xf54   :  { %v2421_v55 = vpop.permute.xlu0 %2420 }
 0xf55   :  { %v2343_v3 = vmul.f32 %v4249_v61, %v2342_v11 }
 0xf56   :  { %3938 = vmatpush.xpose.msk.msra.mxu0 %vm278_vm14, %v2421_v55 }
 0xf57   :  { %v2344_v24 = vadd.f32 %v4249_v61, %v2343_v3 }
 0xf59   :  { %v2723_v5 = vpop.permute.xlu2 %2722  ;;  %v2348_v37 = vsel %vm2347_vm4, %v4249_v61, %v2344_v24  ;;  %v2976_v22 = vpop.permute.xlu1 %2975 }
 0xf5a   :  { %3934 = vmatmul.msk.f32.gmra.mxu2 %vm119_vm0, %v2324_v27  ;;  %3939 = vmatpush.xpose.msk.msra.mxu0 %vm278_vm14, %v2419_v18  ;;  %v2349_v18 = vand.u32 2147483647, %v5641_v21 }
 0xf5c   :  { %v2417_v57 = vpop.permute.xlu0 %2416  ;;  %vm2350_vm5 = vcmp.eq.f32.partialorder %v2349_v18, 8.507059e+37 }
 0xf5d   :  { %v2353_v28 = vsel %vm2350_vm5, %v2352_v43, %v2348_v37 }
 0xf5e   :  { %3940 = vmatpush.xpose.msk.msra.mxu0 %vm278_vm14, %v2417_v57  ;;  %v2354_v53 = vmul.f32 %v5594_v48, %v2353_v28 }
 0xf61   :  { %3941 = vmatmul.msk.f32.vlgmr.msra.gmra.mxu0 %vm278_vm14, %v5639_v38  ;;  %v2984_v0 = vpop.permute.xlu2 %2983 }
 0xf62   :  { %3957 = vmatpush.xpose.msk.msrb.mxu0 %vm278_vm14, %v2723_v5  ;;  %3935 = vmatmul.msk.f32.gmra.mxu2 %vm119_vm0, %v2339_v14 }
 0xf64   :  { %v2411_v45 = vpop.permute.xlu0 %2410 }
 0xf66   :  { %3958 = vmatpush.xpose.msk.msrb.mxu0 %vm278_vm14, %v2721_v52 }
 0xf69   :  { %3942 = vmatmul.msk.f32.gmra.mxu0 %vm278_vm14, %v2411_v45  ;;  %v2982_v40 = vpop.permute.xlu2 %2981 }
 0xf6a   :  { %3959 = vmatpush.xpose.msk.msrb.mxu0 %vm278_vm14, %v2719_v29  ;;  %3936 = vmatmul.msk.f32.gmra.mxu2 %vm119_vm0, %v2354_v53 }
 0xf6c   :  { %v2986_v32 = vpop.permute.xlu0 %2985 }
 0xf6d   :  { %3973 = vmatpush.xpose.msk.msra.mxu2 %vm278_vm14, %v2986_v32 }
 0xf71   :  { %3943 = vmatmul.msk.f32.gmra.mxu0 %vm278_vm14, %v2413_v2  ;;  %3974 = vmatpush.xpose.msk.msra.mxu2 %vm278_vm14, %v2984_v0  ;;  %v2709_v21 = vpop.permute.xlu2 %2708 }
 0xf74   :  { %v2415_v38 = vpop.permute.xlu0 %2414 }
 0xf75   :  { %3975 = vmatpush.xpose.msk.msra.mxu2 %vm278_vm14, %v2982_v40 }
 0xf79   :  { %3944 = vmatmul.msk.f32.gmra.mxu0 %vm278_vm14, %v2415_v38  ;;  %3976 = vmatpush.xpose.msk.msra.mxu2 %vm278_vm14, %v2980_v47  ;;  %v2974_v54 = vpop.permute.xlu2 %2973 }
 0xf7c   :  { %v2717_v48 = vpop.permute.xlu0 %2716 }
 0xf7d   :  { %3960 = vmatpush.xpose.msk.msrb.mxu0 %vm278_vm14, %v2717_v48 }
 0xf81   :  { %3961 = vmatmul.msk.f32.vlgmr.msrb.gmra.mxu0 %vm278_vm14, %v2709_v21  ;;  %v2715_v63 = vpop.permute.xlu2 %2714 }
 0xf84   :  { %v2972_v25 = vpop.permute.xlu0 %2971 }
 0xf89   :  { %3962 = vmatmul.msk.f32.gmra.mxu0 %vm278_vm14, %v2711_v26 }
 0xf8c   :  { %v2713_v20 = vpop.permute.xlu0 %2712 }
 0xf91   :  { %3963 = vmatmul.msk.f32.gmra.mxu0 %vm278_vm14, %v2713_v20 }
 0xf94   :  { %v2978_v5 = vpop.permute.xlu0 %2977 }
 0xf99   :  { %3964 = vmatmul.msk.f32.gmra.mxu0 %vm278_vm14, %v2715_v63 }
 0xfd5   :  { %v2396_v44 = vpop.f32.mrf.mxu2 }
 0xfd6   :  { %3953 = vmatmul.msk.f32.vlgmr.msrb.gmra.mxu2 %vm278_vm14, %v2396_v44 }
 0xfdd   :  { %v2399_v60 = vpop.f32.mrf.mxu2 }
 0xfde   :  { %v2457_v46 = vpop.f32.mrf.mxu0  ;;  %3954 = vmatmul.msk.f32.gmra.mxu2 %vm278_vm14, %v2399_v60 }
 0xfdf   :  { %v2469_v19 = vmul.f32 0.35355338, %v2457_v46 }
 0xfe1   :  { %v2473_v17 = vadd.f32 %v5535_v56, %v2469_v19 }
 0xfe3   :  { %v2477_v1 = vsel %vm119_vm0, %v2473_v17, -inf }
 0xfe4   :  { %2478 = vmax.xlane.f32.xlu1 %v2477_v1 }
 0xfe5   :  { %v2402_v61 = vpop.f32.mrf.mxu2 }
 0xfe6   :  { %v2460_v7 = vpop.f32.mrf.mxu0  ;;  %3955 = vmatmul.msk.f32.gmra.mxu2 %vm278_vm14, %v2402_v61 }
 0xfe7   :  { %v2470_v16 = vmul.f32 0.35355338, %v2460_v7 }
 0xfe9   :  { %v2474_v59 = vadd.f32 %v5542_v13, %v2470_v16 }
 0xfeb   :  { %v2480_v49 = vsel %vm119_vm0, %v2474_v59, -inf }
 0xfec   :  { %2481 = vmax.xlane.f32.xlu2 %v2480_v49 }
 0xfed   :  { %v2405_v2 = vpop.f32.mrf.mxu2 }
 0xfee   :  { %v2463_v62 = vpop.f32.mrf.mxu0  ;;  %3956 = vmatmul.msk.f32.gmra.mxu2 %vm278_vm14, %v2405_v2 }
 0xfef   :  { %v2471_v36 = vmul.f32 0.35355338, %v2463_v62 }
 0xff1   :  { %v2475_v4 = vadd.f32 %v5549_v6, %v2471_v36 }
 0xff3   :  { %v2483_v8 = vsel %vm119_vm0, %v2475_v4, -inf }
 0xff4   :  { %2484 = vmax.xlane.f32.xlu0 %v2483_v8 }
 0xff6   :  { %v2466_v55 = vpop.f32.mrf.mxu0  ;;  %3977 = vmatmul.msk.f32.vlgmr.msra.gmra.mxu2 %vm278_vm14, %v2972_v25 }
 0xff7   :  { %v2472_v23 = vmul.f32 0.35355338, %v2466_v55 }
 0xff9   :  { %v2476_v11 = vadd.f32 %v5556_v58, %v2472_v23 }
 0xffb   :  { %v2486_v33 = vsel %vm119_vm0, %v2476_v11, -inf }
 0xffc   :  { %2487 = vmax.xlane.f32.xlu2 %v2486_v33 }
 0xffe   :  { %v2757_v42 = vpop.f32.mrf.mxu0  ;;  %3978 = vmatmul.msk.f32.gmra.mxu2 %vm278_vm14, %v2974_v54 }
 0xfff   :  { %v2769_v27 = vmul.f32 0.35355338, %v2757_v42 }
0x1001   :  { %v2773_v12 = vadd.f32 %v5535_v56, %v2769_v27 }
0x1003   :  { %v2777_v3 = vsel %vm119_vm0, %v2773_v12, -inf }
0x1004   :  { %2778 = vmax.xlane.f32.xlu1 %v2777_v3 }
0x1006   :  { %v2760_v9 = vpop.f32.mrf.mxu0  ;;  %3979 = vmatmul.msk.f32.gmra.mxu2 %vm278_vm14, %v2976_v22 }
0x1007   :  { %v2770_v52 = vmul.f32 0.35355338, %v2760_v9 }
0x1009   :  { %v5702_v57 = vadd.f32 %v5542_v13, %v2770_v52 }
0x100b   :  { %v2780_v31 = vsel %vm119_vm0, %v5702_v57, -inf }
0x100c   :  { %2781 = vmax.xlane.f32.xlu0 %v2780_v31 }
0x100e   :  { %v2763_v24 = vpop.f32.mrf.mxu0  ;;  %3980 = vmatmul.msk.f32.gmra.mxu2 %vm278_vm14, %v2978_v5 }
0x100f   :  { %v2771_v10 = vmul.f32 0.35355338, %v2763_v24 }
0x1011   :  { %v5708_v14 = vadd.f32 %v5549_v6, %v2771_v10 }
0x1013   :  { %v2783_v18 = vsel %vm119_vm0, %v5708_v14, -inf }
0x1014   :  { %2784 = vmax.xlane.f32.xlu1 %v2783_v18 }
0x1016   :  { %v2766_v37 = vpop.f32.mrf.mxu0 }
0x1017   :  { %v2772_v43 = vmul.f32 0.35355338, %v2766_v37 }
0x1019   :  { %v5713_v45 = vadd.f32 %v5556_v58, %v2772_v43 }
0x101b   :  { %v2786_v28 = vsel %vm119_vm0, %v5713_v45, -inf }
0x101c   :  { %2787 = vmax.xlane.f32.xlu1 %v2786_v28 }
0x1020   :  { %4067 = vrot.lane.b32.xlu0 %v5562_v30, %s4369_s20 }
0x1035   :  { %4072 = vrot.lane.b32.xlu1 %v5600_v35, %s4369_s20 }
0x1057   :  { %v2479_v29 = vpop.xlane.xlu1 %2478 }
0x1058   :  { %v2489_v53 = vsub.f32 %v2473_v17, %v2479_v29 }
0x1059   :  { %v5721_v0 = vpop.f32.mrf.mxu2 }
0x105a   :  { %v2493_v32 = vmul.f32 1.442695, %v2489_v53 }
0x105c   :  { %4250 = vpow2.f32 %v2493_v32 }
0x105f   :  { %v2482_v40 = vpop.xlane.xlu2 %2481 }
0x1060   :  { %v2490_v38 = vsub.f32 %v2474_v59, %v2482_v40 }
0x1061   :  { %v5723_v47 = vpop.f32.mrf.mxu2 }
0x1062   :  { %v5725_v48 = vpop.eup %4250  ;;  %v2495_v21 = vmul.f32 1.442695, %v2490_v38 }
0x1063   :  { %v2501_v25 = vsel %vm119_vm0, %v5725_v48, 0.0 }
0x1064   :  { %4252 = vpow2.f32 %v2495_v21  ;;  %2502 = vadd.xlane.f32.xlu2 %v2501_v25 }
0x1067   :  { %v2485_v26 = vpop.xlane.xlu0 %2484 }
0x1068   :  { %v2491_v54 = vsub.f32 %v2475_v4, %v2485_v26 }
0x1069   :  { %v5729_v20 = vpop.f32.mrf.mxu2 }
0x106a   :  { %v5731_v63 = vpop.eup %4252  ;;  %v2497_v44 = vmul.f32 1.442695, %v2491_v54 }
0x106b   :  { %v2504_v60 = vsel %vm119_vm0, %v5731_v63, 0.0 }
0x106c   :  { %4254 = vpow2.f32 %v2497_v44  ;;  %2505 = vadd.xlane.f32.xlu2 %v2504_v60 }
0x106f   :  { %v2488_v46 = vpop.xlane.xlu2 %2487 }
0x1070   :  { %v2492_v19 = vsub.f32 %v2476_v11, %v2488_v46 }
0x1071   :  { %v5735_v17 = vpop.f32.mrf.mxu2 }
0x1072   :  { %v5737_v1 = vpop.eup %4254  ;;  %v2499_v61 = vmul.f32 1.442695, %v2492_v19 }
0x1073   :  { %v2507_v7 = vsel %vm119_vm0, %v5737_v1, 0.0 }
0x1074   :  { %4256 = vpow2.f32 %v2499_v61  ;;  %2508 = vadd.xlane.f32.xlu2 %v2507_v7 }
0x1077   :  { %v2779_v16 = vpop.xlane.xlu1 %2778 }
0x1078   :  { %v2789_v59 = vsub.f32 %v2773_v12, %v2779_v16 }
0x1079   :  { %v3020_v49 = vpop.f32.mrf.mxu2 }
0x107a   :  { %v5741_v2 = vpop.eup %4256  ;;  %v2793_v62 = vmul.f32 1.442695, %v2789_v59  ;;  %v3032_v11 = vmul.f32 0.35355338, %v3020_v49 }
0x107b   :  { %v2510_v36 = vsel %vm119_vm0, %v5741_v2, 0.0 }
0x107c   :  { %4258 = vpow2.f32 %v2793_v62  ;;  %2511 = vadd.xlane.f32.xlu2 %v2510_v36  ;;  %v5756_v3 = vadd.f32 %v5535_v56, %v3032_v11 }
0x107f   :  { %v2782_v55 = vpop.xlane.xlu0 %2781 }
0x1080   :  { %v2790_v27 = vsub.f32 %v5702_v57, %v2782_v55 }
0x1081   :  { %v3023_v4 = vpop.f32.mrf.mxu2 }
0x1082   :  { %v5745_v8 = vpop.eup %4258  ;;  %v3033_v23 = vmul.f32 0.35355338, %v3023_v4  ;;  %v2795_v52 = vmul.f32 1.442695, %v2790_v27 }
0x1083   :  { %v2801_v33 = vsel %vm119_vm0, %v5745_v8, 0.0 }
0x1084   :  { %v5750_v42 = vadd.f32 %v5542_v13, %v3033_v23  ;;  %2802 = vadd.xlane.f32.xlu2 %v2801_v33  ;;  %v3040_v13 = vsel %vm119_vm0, %v5756_v3, -inf }
0x1086   :  { %v3043_v12 = vsel %vm119_vm0, %v5750_v42, -inf }
0x1087   :  { %v2785_v22 = vpop.xlane.xlu1 %2784  ;;  %3044 = vmax.xlane.f32.xlu0 %v3043_v12 }
0x1088   :  { %v2791_v9 = vsub.f32 %v5708_v14, %v2785_v22 }
0x1089   :  { %v3026_v31 = vpop.f32.mrf.mxu2 }
0x108a   :  { %v2797_v5 = vmul.f32 1.442695, %v2791_v9  ;;  %v3034_v24 = vmul.f32 0.35355338, %v3026_v31 }
0x108c   :  { %4260 = vpow2.f32 %v2797_v5  ;;  %v5762_v57 = vadd.f32 %v5549_v6, %v3034_v24  ;;  %3041 = vmax.xlane.f32.xlu2 %v3040_v13 }
0x108d   :  { %4262 = vpow2.f32 %v2795_v52 }
0x108e   :  { %v3046_v56 = vsel %vm119_vm0, %v5762_v57, -inf }
0x108f   :  { %3047 = vmax.xlane.f32.xlu0 %v3046_v56  ;;  %v5779_v38 = vpop.xlane.xlu1 %2787 }
0x1091   :  { %v3029_v10 = vpop.f32.mrf.mxu2 }
0x1092   :  { %v5766_v18 = vpop.eup %4260  ;;  %v3035_v14 = vmul.f32 0.35355338, %v3029_v10  ;;  %v4068_v37 = vpop.permute.xlu0 %4067 }
0x1093   :  { %v5768_v43 = vpop.eup %4262  ;;  %v4069_v28 = vunpack.i.l.bf16 %v4068_v37  ;;  %v2807_v29 = vsel %vm119_vm0, %v5766_v18, 0.0  ;;  %v4070_v53 = vunpack.i.h.bf16 %v4068_v37 }
0x1094   :  { %v5773_v6 = vadd.f32 %v5556_v58, %v3035_v14  ;;  %2808 = vadd.xlane.f32.xlu2 %v2807_v29  ;;  %v2804_v32 = vsel %vm119_vm0, %v5768_v43, 0.0 }
0x1095   :  { %2609 = vmatpush.msra.mxu1 %v4069_v28 }
0x1096   :  { %v3049_v40 = vsel %vm119_vm0, %v5773_v6, -inf }
0x1097   :  { %2610 = vmatpush.msra.mxu1 %v4070_v53  ;;  %2805 = vadd.xlane.f32.xlu0 %v2804_v32 }
0x1098   :  { %3050 = vmax.xlane.f32.xlu1 %v3049_v40 }
0x10a7   :  { %v4073_v21 = vpop.permute.xlu1 %4072 }
0x10a8   :  { %v4074_v25 = vunpack.i.l.bf16 %v4073_v21  ;;  %v4075_v26 = vunpack.i.h.bf16 %v4073_v21 }
0x10aa   :  { %2611 = vmatpush.msra.mxu1 %v4074_v25 }
0x10ab   :  { %4087 = vrot.lane.b32.xlu0 %v5562_v30, %s4371_s16 }
0x10ac   :  { %2612 = vmatpush.msra.mxu1 %v4075_v26 }
0x10b1   :  { %4077 = vrot.lane.b32.xlu1 %v5562_v30, %s4370_s30 }
0x10b3   :  { %4092 = vrot.lane.b32.xlu0 %v5600_v35, %s4371_s16 }
0x10d7   :  { %v2503_v58 = vpop.xlane.xlu2 %2502 }
0x10d8   :  { %4264 = vrcp.f32 %v2503_v58  ;;  %v2524_v19 = vand.u32 2147483648, %v2503_v58  ;;  %v2522_v7 = vand.u32 2147483647, %v2503_v58  ;;  %vm2518_vm7 = vweird.f32 %v2503_v58 }
0x10da   :  { %v2525_v49 = vor.u32 1.1754944e-38, %v2524_v19  ;;  %vm2523_vm9 = vcmp.eq.f32.partialorder %v2522_v7, 8.507059e+37 }
0x10de   :  { %v4265_v54 = vpop.eup %4264 }
0x10df   :  { %v2514_v44 = vmul.f32 %v4265_v54, %v2503_v58  ;;  %v2506_v60 = vpop.xlane.xlu2 %2505  ;;  %vm2519_vm6 = vweird.f32 %v4265_v54 }
0x10e0   :  { %4266 = vrcp.f32 %v2506_v60  ;;  %vm2520_vm8 = vmor %vm2518_vm7, %vm2519_vm6  ;;  %v2539_v33 = vand.u32 2147483648, %v2506_v60  ;;  %v2537_v27 = vand.u32 2147483647, %v2506_v60  ;;  %vm2533_vm11 = vweird.f32 %v2506_v60 }
0x10e1   :  { %v2515_v46 = vsub.f32 1.0, %v2514_v44 }
0x10e2   :  { %v2540_v9 = vor.u32 1.1754944e-38, %v2539_v33  ;;  %vm2538_vm13 = vcmp.eq.f32.partialorder %v2537_v27, 8.507059e+37 }
0x10e3   :  { %v2516_v61 = vmul.f32 %v4265_v54, %v2515_v46 }
0x10e5   :  { %v2517_v16 = vadd.f32 %v4265_v54, %v2516_v61 }
0x10e6   :  { %v4267_v59 = vpop.eup %4266 }
0x10e7   :  { %v2521_v30 = vsel %vm2520_vm8, %v4265_v54, %v2517_v16  ;;  %v2529_v62 = vmul.f32 %v4267_v59, %v2506_v60  ;;  %v2509_v36 = vpop.xlane.xlu2 %2508  ;;  %vm2534_vm10 = vweird.f32 %v4267_v59 }
0x10e8   :  { %v2526_v4 = vsel %vm2523_vm9, %v2525_v49, %v2521_v30  ;;  %4268 = vrcp.f32 %v2509_v36  ;;  %vm2535_vm12 = vmor %vm2533_vm11, %vm2534_vm10  ;;  %v2554_v10 = vand.u32 2147483648, %v2509_v36  ;;  %v2552_v14 = vand.u32 2147483647, %v2509_v36 }
0x10e9   :  { %v2530_v55 = vsub.f32 1.0, %v2529_v62  ;;  %v2527_v23 = vmul.f32 %v5725_v48, %v2526_v4  ;;  %vm2548_vm1 = vweird.f32 %v2509_v36 }
0x10ea   :  { %v2555_v29 = vor.u32 1.1754944e-38, %v2554_v10  ;;  %vm2553_vm3 = vcmp.eq.f32.partialorder %v2552_v14, 8.507059e+37  ;;  %v2792_v14 = vsub.f32 %v5713_v45, %v5779_v38 }
0x10eb   :  { %v2531_v11 = vmul.f32 %v4267_v59, %v2530_v55  ;;  %3945 = vmatmul.msk.f32.vlgmr.msra.gmra.mxu1 %vm119_vm0, %v2527_v23 }
0x10ed   :  { %v2532_v12 = vadd.f32 %v4267_v59, %v2531_v11 }
0x10ee   :  { %v4269_v22 = vpop.eup %4268 }
0x10ef   :  { %v2544_v52 = vmul.f32 %v4269_v22, %v2509_v36  ;;  %v2512_v31 = vpop.xlane.xlu2 %2511  ;;  %v2536_v5 = vsel %vm2535_vm12, %v4267_v59, %v2532_v12  ;;  %vm2549_vm15 = vweird.f32 %v4269_v22 }
0x10f0   :  { %4270 = vrcp.f32 %v2512_v31  ;;  %v2541_v13 = vsel %vm2538_vm13, %v2540_v9, %v2536_v5  ;;  %vm2550_vm2 = vmor %vm2548_vm1, %vm2549_vm15  ;;  %v2569_v26 = vand.u32 2147483648, %v2512_v31  ;;  %v2567_v44 = vand.u32 2147483647, %v2512_v31 }
0x10f1   :  { %v2545_v24 = vsub.f32 1.0, %v2544_v52  ;;  %v2542_v48 = vmul.f32 %v5731_v63, %v2541_v13  ;;  %vm2563_vm5 = vweird.f32 %v2512_v31 }
0x10f2   :  { %v2570_v61 = vor.u32 1.1754944e-38, %v2569_v26  ;;  %vm2568_vm7 = vcmp.eq.f32.partialorder %v2567_v44, 8.507059e+37 }
0x10f3   :  { %v2546_v56 = vmul.f32 %v4269_v22, %v2545_v24  ;;  %3946 = vmatmul.msk.f32.gmra.mxu1 %vm119_vm0, %v2542_v48 }
0x10f5   :  { %v2547_v37 = vadd.f32 %v4269_v22, %v2546_v56 }
0x10f6   :  { %v4271_v28 = vpop.eup %4270 }
0x10f7   :  { %v2559_v53 = vmul.f32 %v4271_v28, %v2512_v31  ;;  %v5791_v32 = vpop.xlane.xlu2 %2802  ;;  %v2551_v40 = vsel %vm2550_vm2, %v4269_v22, %v2547_v37  ;;  %vm2564_vm4 = vweird.f32 %v4271_v28  ;;  %v2799_v37 = vmul.f32 1.442695, %v2792_v14 }
0x10f8   :  { %v2556_v25 = vsel %vm2553_vm3, %v2555_v29, %v2551_v40  ;;  %vm2565_vm6 = vmor %vm2563_vm5, %vm2564_vm4  ;;  %vm2818_vm9 = vweird.f32 %v5791_v32 }
0x10f9   :  { %v2560_v21 = vsub.f32 1.0, %v2559_v53  ;;  %v2557_v58 = vmul.f32 %v5737_v1, %v2556_v25 }
0x10fa   :  { %v3045_v63 = vpop.xlane.xlu0 %3044 }
0x10fb   :  { %v2561_v54 = vmul.f32 %v4271_v28, %v2560_v21  ;;  %v3053_v60 = vsub.f32 %v5750_v42, %v3045_v63  ;;  %3947 = vmatmul.msk.f32.gmra.mxu1 %vm119_vm0, %v2557_v58 }
0x10fd   :  { %v2562_v46 = vadd.f32 %v4271_v28, %v2561_v54  ;;  %v3058_v19 = vmul.f32 1.442695, %v3053_v60 }
0x10ff   :  { %4272 = vpow2.f32 %v3058_v19  ;;  %v3042_v7 = vpop.xlane.xlu2 %3041  ;;  %v2566_v16 = vsel %vm2565_vm6, %v4271_v28, %v2562_v46  ;;  %v2027_v28 = vld [vmem:[%s6225_s2 + $0x138] sm:$0xff]  ;;  %v2824_v46 = vand.u32 2147483648, %v5791_v32  ;;  %v2822_v19 = vand.u32 2147483647, %v5791_v32 }
0x1100   :  { %v3052_v59 = vsub.f32 %v5756_v3, %v3042_v7  ;;  %v2571_v49 = vsel %vm2568_vm7, %v2570_v61, %v2566_v16  ;;  %2653 = vmatpush.msra.mxu3 %v2027_v28 }
0x1101   :  { %v2572_v1 = vmul.f32 %v5741_v2, %v2571_v49  ;;  %vm2823_vm11 = vcmp.eq.f32.partialorder %v2822_v19, 8.507059e+37 }
0x1102   :  { %v3056_v30 = vmul.f32 1.442695, %v3052_v59  ;;  %v3048_v62 = vpop.xlane.xlu0 %3047 }
0x1103   :  { %v3054_v42 = vsub.f32 %v5762_v57, %v3048_v62  ;;  %3948 = vmatmul.msk.f32.gmra.mxu1 %vm119_vm0, %v2572_v1  ;;  %v2825_v62 = vor.u32 1.1754944e-38, %v2824_v46 }
0x1104   :  { %4274 = vpow2.f32 %v3056_v30 }
0x1105   :  { %v5800_v36 = vpop.eup %4272  ;;  %v3060_v4 = vmul.f32 1.442695, %v3054_v42 }
0x1106   :  { %v3067_v55 = vsel %vm119_vm0, %v5800_v36, 0.0 }
0x1107   :  { %4276 = vpow2.f32 %v3060_v4  ;;  %3068 = vadd.xlane.f32.xlu1 %v3067_v55  ;;  %v5835_v25 = vpop.xlane.xlu2 %2808 }
0x110a   :  { %v5804_v23 = vpop.eup %4274  ;;  %v5813_v12 = vpop.xlane.xlu0 %2805 }
0x110b   :  { %v3051_v3 = vpop.xlane.xlu1 %3050  ;;  %v3064_v11 = vsel %vm119_vm0, %v5804_v23, 0.0  ;;  %vm2833_vm12 = vweird.f32 %v5813_v12 }
0x110c   :  { %v3055_v2 = vsub.f32 %v5773_v6, %v3051_v3  ;;  %3065 = vadd.xlane.f32.xlu2 %v3064_v11 }
0x110d   :  { %v5809_v57 = vpop.eup %4276 }
0x110e   :  { %v3062_v33 = vmul.f32 1.442695, %v3055_v2  ;;  %v3070_v27 = vsel %vm119_vm0, %v5809_v57, 0.0 }
0x110f   :  { %3071 = vadd.xlane.f32.xlu1 %v3070_v27 }
0x1110   :  { %4278 = vpow2.f32 %v3062_v33 }
0x1111   :  { %4280 = vpow2.f32 %v2799_v37 }
0x1112   :  { %4282 = vrcp.f32 %v5791_v32 }
0x1113   :  { %4284 = vrcp.f32 %v5813_v12 }
0x1116   :  { %v5815_v22 = vpop.eup %4278 }
0x1117   :  { %v3073_v9 = vsel %vm119_vm0, %v5815_v22, 0.0  ;;  %v5826_v29 = vpop.eup %4280 }
0x1118   :  { %3074 = vadd.xlane.f32.xlu1 %v3073_v9  ;;  %v4283_v40 = vpop.eup %4282 }
0x1119   :  { %v2814_v38 = vmul.f32 %v4283_v40, %v5791_v32  ;;  %v5840_v54 = vpop.eup %4284  ;;  %vm2819_vm8 = vweird.f32 %v4283_v40 }
0x111a   :  { %v2829_v60 = vmul.f32 %v5840_v54, %v5813_v12  ;;  %vm2820_vm10 = vmor %vm2818_vm9, %vm2819_vm8  ;;  %vm2834_vm13 = vweird.f32 %v5840_v54  ;;  %vm2848_vm9 = vweird.f32 %v5835_v25 }
0x111b   :  { %v2815_v21 = vsub.f32 1.0, %v2814_v38  ;;  %vm5878_vm1 = vmor %vm2833_vm12, %vm2834_vm13 }
0x111c   :  { %v2830_v49 = vsub.f32 1.0, %v2829_v60 }
0x111d   :  { %v4088_v6 = vpop.permute.xlu0 %4087  ;;  %v2816_v63 = vmul.f32 %v4283_v40, %v2815_v21 }
0x111e   :  { %v4089_v52 = vunpack.i.l.bf16 %v4088_v6  ;;  %v4090_v31 = vunpack.i.h.bf16 %v4088_v6  ;;  %v2831_v55 = vmul.f32 %v5840_v54, %v2830_v49  ;;  %v2837_v6 = vand.u32 2147483647, %v5813_v12 }
0x111f   :  { %v2817_v44 = vadd.f32 %v4283_v40, %v2816_v63  ;;  %v2854_v49 = vand.u32 2147483648, %v5835_v25 }
0x1120   :  { %3172 = vmatpush.msra.mxu0 %v4089_v52  ;;  %v2839_v52 = vand.u32 2147483648, %v5813_v12  ;;  %vm2838_vm3 = vcmp.eq.f32.partialorder %v2837_v6, 8.507059e+37 }
0x1121   :  { %v2821_v59 = vsel %vm2820_vm10, %v4283_v40, %v2817_v44 }
0x1122   :  { %3173 = vmatpush.msra.mxu0 %v4090_v31  ;;  %v2826_v32 = vsel %vm2823_vm11, %v2825_v62, %v2821_v59  ;;  %v2840_v38 = vor.u32 1.1754944e-38, %v2839_v52  ;;  %v2852_v59 = vand.u32 2147483647, %v5835_v25 }
0x1123   :  { %v4078_v5 = vpop.permute.xlu1 %4077  ;;  %v2827_v11 = vmul.f32 %v5745_v8, %v2826_v32 }
0x1124   :  { %v4079_v24 = vunpack.i.l.bf16 %v4078_v5  ;;  %4082 = vrot.lane.b32.xlu2 %v5600_v35, %s4370_s30  ;;  %v4080_v48 = vunpack.i.h.bf16 %v4078_v5  ;;  %v2810_v35 = vsel %vm119_vm0, %v5826_v29, 0.0  ;;  %vm2853_vm13 = vcmp.eq.f32.partialorder %v2852_v59, 8.507059e+37 }
0x1125   :  { %v4093_v13 = vpop.permute.xlu0 %4092 }
0x1126   :  { %v4094_v56 = vunpack.i.l.bf16 %v4093_v13  ;;  %2909 = vmatpush.msrb.mxu1 %v4079_v24  ;;  %v4095_v10 = vunpack.i.h.bf16 %v4093_v13  ;;  %v2832_v24 = vadd.f32 %v5840_v54, %v2831_v55 }
0x1128   :  { %2910 = vmatpush.msrb.mxu1 %v4080_v48  ;;  %3174 = vmatpush.msra.mxu0 %v4094_v56 }
0x112a   :  { %3175 = vmatpush.msra.mxu0 %v4095_v10 }
0x114d   :  { %2811 = vadd.xlane.f32.xlu2 %v2810_v35 }
0x1168   :  { %v2614_v53 = vpop.f32.mrf.mxu1 }
0x1169   :  { %3949 = vmatmul.msk.f32.vlgmr.msra.gmra.mxu3 %vm278_vm14, %v2614_v53 }
0x1170   :  { %v2617_v45 = vpop.f32.mrf.mxu1 }
0x1171   :  { %3950 = vmatmul.msk.f32.gmra.mxu3 %vm278_vm14, %v2617_v45  ;;  %v2836_v45 = vsel %vm5878_vm1, %v5840_v54, %v2832_v24 }
0x1172   :  { %v2841_v46 = vsel %vm2838_vm3, %v2840_v38, %v2836_v45  ;;  %v2028_v38 = vld [vmem:[%s6225_s2 + $0x140] sm:$0xff] }
0x1173   :  { %v2842_v32 = vmul.f32 %v5768_v43, %v2841_v46  ;;  %2953 = vmatpush.msrb.mxu3 %v2028_v38 }
0x1178   :  { %v2620_v26 = vpop.f32.mrf.mxu1 }
0x1179   :  { %3951 = vmatmul.msk.f32.gmra.mxu3 %vm278_vm14, %v2620_v26 }
0x117a   :  { %v5838_v58 = vpop.xlane.xlu1 %3068 }
0x117b   :  { %4286 = vrcp.f32 %v5838_v58  ;;  %v3102_v44 = vand.u32 2147483648, %v5838_v58  ;;  %vm3096_vm8 = vweird.f32 %v5838_v58 }
0x117c   :  { %4288 = vrcp.f32 %v5835_v25 }
0x117f   :  { %v3066_v61 = vpop.xlane.xlu2 %3065 }
0x1180   :  { %4290 = vrcp.f32 %v3066_v61  ;;  %v2623_v16 = vpop.f32.mrf.mxu1  ;;  %v3085_v8 = vand.u32 2147483647, %v3066_v61  ;;  %v3087_v56 = vand.u32 2147483648, %v3066_v61  ;;  %vm3081_vm2 = vweird.f32 %v3066_v61 }
0x1181   :  { %v5849_v7 = vpop.eup %4286  ;;  %3952 = vmatmul.msk.f32.gmra.mxu3 %vm278_vm14, %v2623_v16  ;;  %v3100_v16 = vand.u32 2147483647, %v5838_v58 }
0x1182   :  { %v5852_v1 = vpop.xlane.xlu1 %3071  ;;  %v5854_v30 = vpop.eup %4288  ;;  %v3092_v42 = vmul.f32 %v5849_v7, %v5838_v58  ;;  %v3088_v21 = vor.u32 1.1754944e-38, %v3087_v56  ;;  %vm3097_vm5 = vweird.f32 %v5849_v7  ;;  %vm3086_vm6 = vcmp.eq.f32.partialorder %v3085_v8, 8.507059e+37 }
0x1183   :  { %4292 = vrcp.f32 %v5852_v1  ;;  %v2844_v4 = vmul.f32 %v5854_v30, %v5835_v25  ;;  %vm2849_vm7 = vweird.f32 %v5854_v30  ;;  %vm3098_vm10 = vmor %vm3096_vm8, %vm3097_vm5  ;;  %v3103_v58 = vor.u32 1.1754944e-38, %v3102_v44 }
0x1184   :  { %v3093_v2 = vsub.f32 1.0, %v3092_v42  ;;  %vm2850_vm11 = vmor %vm2848_vm9, %vm2849_vm7  ;;  %vm3101_vm12 = vcmp.eq.f32.partialorder %v3100_v16, 8.507059e+37  ;;  %v3117_v43 = vand.u32 2147483648, %v5852_v1  ;;  %vm3111_vm1 = vweird.f32 %v5852_v1 }
0x1185   :  { %v2845_v5 = vsub.f32 1.0, %v2844_v4  ;;  %v2855_v4 = vor.u32 1.1754944e-38, %v2854_v49 }
0x1186   :  { %v4291_v3 = vpop.eup %4290  ;;  %v3094_v48 = vmul.f32 %v5849_v7, %v3093_v2  ;;  %v3118_v52 = vor.u32 1.1754944e-38, %v3117_v43 }
0x1187   :  { %v3077_v33 = vmul.f32 %v4291_v3, %v3066_v61  ;;  %v4083_v27 = vpop.permute.xlu2 %4082  ;;  %vm3082_vm15 = vweird.f32 %v4291_v3  ;;  %v2846_v53 = vmul.f32 %v5854_v30, %v2845_v5 }
0x1188   :  { %v4084_v31 = vunpack.i.l.bf16 %v4083_v27  ;;  %v4085_v10 = vunpack.i.h.bf16 %v4083_v27  ;;  %vm3083_vm4 = vmor %vm3081_vm2, %vm3082_vm15  ;;  %v3095_v63 = vadd.f32 %v5849_v7, %v3094_v48 }
0x1189   :  { %v5863_v9 = vpop.eup %4292  ;;  %v3078_v13 = vsub.f32 1.0, %v3077_v33  ;;  %v2847_v54 = vadd.f32 %v5854_v30, %v2846_v53 }
0x118a   :  { %2911 = vmatpush.msrb.mxu1 %v4084_v31  ;;  %v3107_v28 = vmul.f32 %v5863_v9, %v5852_v1  ;;  %vm3112_vm15 = vweird.f32 %v5863_v9 }
0x118b   :  { %v5871_v14 = vpop.xlane.xlu1 %3074  ;;  %v3079_v37 = vmul.f32 %v4291_v3, %v3078_v13  ;;  %v2851_v25 = vsel %vm2850_vm11, %v5854_v30, %v2847_v54  ;;  %vm3113_vm2 = vmor %vm3111_vm1, %vm3112_vm15 }
0x118c   :  { %4294 = vrcp.f32 %v5871_v14  ;;  %2912 = vmatpush.msrb.mxu1 %v4085_v10  ;;  %v3108_v26 = vsub.f32 1.0, %v3107_v28  ;;  %v3132_v24 = vand.u32 2147483648, %v5871_v14  ;;  %vm3126_vm5 = vweird.f32 %v5871_v14 }
0x118d   :  { %v3080_v40 = vadd.f32 %v4291_v3, %v3079_v37  ;;  %3965 = vmatmul.msk.f32.vlgmr.msrb.gmra.mxu1 %vm119_vm0, %v2827_v11  ;;  %v3115_v11 = vand.u32 2147483647, %v5852_v1 }
0x118e   :  { %v3109_v62 = vmul.f32 %v5863_v9, %v3108_v26 }
0x118f   :  { %v3084_v12 = vsel %vm3083_vm4, %v4291_v3, %v3080_v40  ;;  %vm3116_vm3 = vcmp.eq.f32.partialorder %v3115_v11, 8.507059e+37 }
0x1190   :  { %v3089_v60 = vsel %vm3086_vm6, %v3088_v21, %v3084_v12  ;;  %v3110_v3 = vadd.f32 %v5863_v9, %v3109_v62  ;;  %v2029_v21 = vld [vmem:[%s6225_s2 + $0x148] sm:$0xff] }
0x1191   :  { %v3090_v61 = vmul.f32 %v5804_v23, %v3089_v60  ;;  %v3099_v23 = vsel %vm3098_vm10, %v5849_v7, %v3095_v63  ;;  %v2856_v7 = vsel %vm2853_vm13, %v2855_v4, %v2851_v25  ;;  %3216 = vmatpush.msra.mxu1 %v2029_v21 }
0x1192   :  { %v4295_v19 = vpop.eup %4294  ;;  %v3104_v55 = vsel %vm3101_vm12, %v3103_v58, %v3099_v23  ;;  %v2857_v30 = vmul.f32 %v5766_v18, %v2856_v7  ;;  %v3114_v6 = vsel %vm3113_vm2, %v5863_v9, %v3110_v3  ;;  %v3133_v9 = vor.u32 1.1754944e-38, %v3132_v24  ;;  %v5946_v58 = vld [vmem:[%s6225_s2 + $0x128] sm:$0xff] }
0x1193   :  { %v3122_v42 = vmul.f32 %v4295_v19, %v5871_v14  ;;  %3981 = vmatmul.msk.f32.vlgmr.msra.gmra.mxu0 %vm119_vm0, %v3090_v61  ;;  %v3105_v33 = vmul.f32 %v5800_v36, %v3104_v55  ;;  %v3119_v31 = vsel %vm3116_vm3, %v3118_v52, %v3114_v6  ;;  %vm3127_vm4 = vweird.f32 %v4295_v19 }
0x1194   :  { %v3130_v36 = vand.u32 2147483647, %v5871_v14  ;;  %v3120_v1 = vmul.f32 %v5809_v57, %v3119_v31  ;;  %vm3128_vm6 = vmor %vm3126_vm5, %vm3127_vm4  ;;  %v3238_v25 = vperm.slane %v5946_v58, 4 }
0x1195   :  { %3966 = vmatmul.msk.f32.gmra.mxu1 %vm119_vm0, %v2842_v32  ;;  %v3123_v2 = vsub.f32 1.0, %v3122_v42 }
0x1196   :  { %vm3131_vm7 = vcmp.eq.f32.partialorder %v3130_v36, 8.507059e+37 }
0x1197   :  { %v3124_v27 = vmul.f32 %v4295_v19, %v3123_v2 }
0x1199   :  { %v3125_v5 = vadd.f32 %v4295_v19, %v3124_v27 }
0x119b   :  { %3982 = vmatmul.msk.f32.gmra.mxu0 %vm119_vm0, %v3105_v33  ;;  %v3129_v18 = vsel %vm3128_vm6, %v4295_v19, %v3125_v5 }
0x119c   :  { %v3134_v13 = vsel %vm3131_vm7, %v3133_v9, %v3129_v18 }
0x119d   :  { %3967 = vmatmul.msk.f32.gmra.mxu1 %vm119_vm0, %v2857_v30  ;;  %v3135_v48 = vmul.f32 %v5815_v22, %v3134_v13 }
0x11a3   :  { %3983 = vmatmul.msk.f32.gmra.mxu0 %vm119_vm0, %v3120_v1 }
0x11ab   :  { %3984 = vmatmul.msk.f32.gmra.mxu0 %vm119_vm0, %v3135_v48 }
0x11c0   :  { %v2812_v8 = vpop.xlane.xlu2 %2811 }
0x11c1   :  { %4296 = vrcp.f32 %v2812_v8  ;;  %v2869_v28 = vand.u32 2147483648, %v2812_v8  ;;  %v2867_v57 = vand.u32 2147483647, %v2812_v8  ;;  %vm2863_vm9 = vweird.f32 %v2812_v8 }
0x11c3   :  { %v2870_v53 = vor.u32 1.1754944e-38, %v2869_v28  ;;  %vm2868_vm11 = vcmp.eq.f32.partialorder %v2867_v57, 8.507059e+37 }
0x11c7   :  { %v4297_v56 = vpop.eup %4296 }
0x11c8   :  { %v2859_v10 = vmul.f32 %v4297_v56, %v2812_v8  ;;  %vm2864_vm8 = vweird.f32 %v4297_v56 }
0x11c9   :  { %vm2865_vm10 = vmor %vm2863_vm9, %vm2864_vm8 }
0x11ca   :  { %v2860_v37 = vsub.f32 1.0, %v2859_v10 }
0x11cc   :  { %v2861_v14 = vmul.f32 %v4297_v56, %v2860_v37 }
0x11ce   :  { %v2862_v35 = vadd.f32 %v4297_v56, %v2861_v14 }
0x11d0   :  { %v2866_v40 = vsel %vm2865_vm10, %v4297_v56, %v2862_v35 }
0x11d1   :  { %v2871_v45 = vsel %vm2868_vm11, %v2870_v53, %v2866_v40 }
0x11d2   :  { %v2872_v22 = vmul.f32 %v5826_v29, %v2871_v45 }
0x11d4   :  { %3968 = vmatmul.msk.f32.gmra.mxu1 %vm119_vm0, %v2872_v22 }
0x11ec   :  { %v2655_v54 = vpop.f32.mrf.mxu3 }
0x11ed   :  { %v2697_v49 = vadd.f32 %v5721_v0, %v2655_v54  ;;  %v2051_v54 = vld [vmem:[%s6226_s3 + $0x70] sm:$0xff] }
0x11f4   :  { %v2658_v61 = vpop.f32.mrf.mxu3 }
0x11f5   :  { %v2700_v55 = vadd.f32 %v5723_v47, %v2658_v61 }
0x11fc   :  { %v2661_v16 = vpop.f32.mrf.mxu3 }
0x11fd   :  { %v2703_v27 = vadd.f32 %v5729_v20, %v2661_v16  ;;  %v2050_v16 = vld [vmem:[%s6226_s3 + $0x68] sm:$0xff] }
0x1204   :  { %v2664_v59 = vpop.f32.mrf.mxu3 }
0x120a   :  { %v2914_v12 = vpop.f32.mrf.mxu1 }
0x120b   :  { %3969 = vmatmul.msk.f32.vlgmr.msrb.gmra.mxu3 %vm278_vm14, %v2914_v12 }
0x1210   :  { %v3177_v26 = vpop.f32.mrf.mxu0 }
0x1211   :  { %3985 = vmatmul.msk.f32.vlgmr.msra.gmra.mxu1 %vm278_vm14, %v3177_v26 }
0x1212   :  { %v2917_v63 = vpop.f32.mrf.mxu1 }
0x1213   :  { %3970 = vmatmul.msk.f32.gmra.mxu3 %vm278_vm14, %v2917_v63 }
0x1218   :  { %v3180_v29 = vpop.f32.mrf.mxu0 }
0x1219   :  { %3986 = vmatmul.msk.f32.gmra.mxu1 %vm278_vm14, %v3180_v29 }
0x121a   :  { %v2920_v44 = vpop.f32.mrf.mxu1 }
0x121b   :  { %3971 = vmatmul.msk.f32.gmra.mxu3 %vm278_vm14, %v2920_v44  ;;  %v2053_v44 = vld [vmem:[%s6226_s3 + $0x80] sm:$0xff] }
0x121c   :  { %3366 = vmatpush.msra.mxu3 %v2053_v44 }
0x1220   :  { %v3183_v60 = vpop.f32.mrf.mxu0 }
0x1221   :  { %3987 = vmatmul.msk.f32.gmra.mxu1 %vm278_vm14, %v3183_v60  ;;  %v2052_v60 = vld [vmem:[%s6226_s3 + $0x78] sm:$0xff] }
0x1222   :  { %3367 = vmatpush.msra.mxu3 %v2052_v60 }
0x1224   :  { %3368 = vmatpush.msra.mxu3 %v2051_v54 }
0x1226   :  { %3369 = vmatpush.msra.mxu3 %v2050_v16 }
0x1228   :  { %v3186_v46 = vpop.f32.mrf.mxu0 }
0x1229   :  { %3988 = vmatmul.msk.f32.gmra.mxu1 %vm278_vm14, %v3186_v46 }
0x1251   :  { %v2923_v19 = vpop.f32.mrf.mxu1 }
0x1252   :  { %3972 = vmatmul.msk.f32.gmra.mxu3 %vm278_vm14, %v2923_v19 }
0x128e   :  { %v2955_v62 = vpop.f32.mrf.mxu3  ;;  %v3218_v42 = vpop.f32.mrf.mxu1 }
0x128f   :  { %v2967_v32 = vadd.f32 %v2955_v62, %v2697_v49 }
0x1291   :  { %v3230_v23 = vadd.f32 %v3218_v42, %v2967_v32 }
0x1293   :  { %v3234_v4 = vadd.f32 %v3230_v23, %v5435_v50 }
0x1295   :  { %v5951_v3 = vadd.f32 %v3238_v25, %v3234_v4 }
0x1296   :  { %v2958_v2 = vpop.f32.mrf.mxu3  ;;  %v3221_v43 = vpop.f32.mrf.mxu1 }
0x1297   :  { %v2968_v0 = vadd.f32 %v2958_v2, %v2700_v55  ;;  %v3243_v7 = vsel %vm119_vm0, %v5951_v3, 0.0 }
0x1298   :  { %3244 = vadd.xlane.f32.xlu0 %v3243_v7 }
0x1299   :  { %v3231_v11 = vadd.f32 %v3221_v43, %v2968_v0 }
0x129b   :  { %v3235_v33 = vadd.f32 %v3231_v11, %v5440_v15  ;;  %v2706_v15 = vadd.f32 %v5735_v17, %v2664_v59 }
0x129d   :  { %v5957_v30 = vadd.f32 %v3238_v25, %v3235_v33  ;;  %v3331_v33 = vperm.slane %v5946_v58, 2 }
0x129e   :  { %v2961_v6 = vpop.f32.mrf.mxu3  ;;  %v3224_v52 = vpop.f32.mrf.mxu1 }
0x129f   :  { %v2969_v50 = vadd.f32 %v2961_v6, %v2703_v27  ;;  %v3246_v47 = vsel %vm119_vm0, %v5957_v30, 0.0 }
0x12a0   :  { %3247 = vadd.xlane.f32.xlu1 %v3246_v47 }
0x12a1   :  { %v3232_v31 = vadd.f32 %v3224_v52, %v2969_v50  ;;  %v3336_v50 = vperm.slane %v5946_v58, 3 }
0x12a3   :  { %v3236_v5 = vadd.f32 %v3232_v31, %v5445_v51 }
0x12a5   :  { %v5962_v24 = vadd.f32 %v3238_v25, %v3236_v5 }
0x12a6   :  { %v3227_v18 = vpop.f32.mrf.mxu1 }
0x12a7   :  { %v3249_v36 = vsel %vm119_vm0, %v5962_v24, 0.0 }
0x12a8   :  { %3250 = vadd.xlane.f32.xlu1 %v3249_v36 }
0x12d5   :  { %v2964_v20 = vpop.f32.mrf.mxu3 }
0x12d6   :  { %v2970_v1 = vadd.f32 %v2964_v20, %v2706_v15 }
0x12d8   :  { %v3233_v9 = vadd.f32 %v3227_v18, %v2970_v1 }
0x12da   :  { %v3237_v13 = vadd.f32 %v3233_v9, %v5450_v39 }
0x12dc   :  { %v5968_v48 = vadd.f32 %v3238_v25, %v3237_v13 }
0x12de   :  { %v3252_v8 = vsel %vm119_vm0, %v5968_v48, 0.0 }
0x12df   :  { %3253 = vadd.xlane.f32.xlu2 %v3252_v8 }
0x130b   :  { %v3245_v51 = vpop.xlane.xlu0 %3244 }
0x130c   :  { %v3255_v56 = vmul.f32 %v3245_v51, %v4487_v34 }
0x130e   :  { %v3259_v10 = vsub.f32 %v5951_v3, %v3255_v56 }
0x1310   :  { %v3263_v37 = vmul.f32 %v3259_v10, %v3259_v10 }
0x1312   :  { %v3267_v17 = vsel %vm119_vm0, %v3263_v37, 0.0 }
0x1313   :  { %v3248_v28 = vpop.xlane.xlu1 %3247  ;;  %3268 = vadd.xlane.f32.xlu1 %v3267_v17 }
0x1314   :  { %v3256_v14 = vmul.f32 %v3248_v28, %v4487_v34 }
0x1316   :  { %v5977_v39 = vsub.f32 %v5957_v30, %v3256_v14 }
0x1318   :  { %v3264_v57 = vmul.f32 %v5977_v39, %v5977_v39 }
0x131a   :  { %v3270_v35 = vsel %vm119_vm0, %v3264_v57, 0.0 }
0x131b   :  { %3271 = vadd.xlane.f32.xlu2 %v3270_v35  ;;  %v3251_v53 = vpop.xlane.xlu1 %3250 }
0x131c   :  { %v3257_v40 = vmul.f32 %v3251_v53, %v4487_v34 }
0x131e   :  { %v5984_v45 = vsub.f32 %v5962_v24, %v3257_v40 }
0x1320   :  { %v3265_v22 = vmul.f32 %v5984_v45, %v5984_v45 }
0x1322   :  { %v3273_v38 = vsel %vm119_vm0, %v3265_v22, 0.0 }
0x1323   :  { %3274 = vadd.xlane.f32.xlu1 %v3273_v38 }
0x1352   :  { %v3254_v21 = vpop.xlane.xlu2 %3253 }
0x1353   :  { %v3258_v12 = vmul.f32 %v3254_v21, %v4487_v34 }
0x1355   :  { %v5991_v26 = vsub.f32 %v5968_v48, %v3258_v12 }
0x1357   :  { %v3266_v63 = vmul.f32 %v5991_v26, %v5991_v26 }
0x1359   :  { %v3276_v29 = vsel %vm119_vm0, %v3266_v63, 0.0 }
0x135a   :  { %3277 = vadd.xlane.f32.xlu2 %v3276_v29 }
0x1386   :  { %v3269_v46 = vpop.xlane.xlu1 %3268 }
0x1387   :  { %v3279_v19 = vmul.f32 %v3269_v46, %v4487_v34  ;;  %v2054_v46 = vld [vmem:[%s6226_s3 + $0x88] sm:$0xff] }
0x1389   :  { %v3283_v61 = vadd.f32 1e-05, %v3279_v19  ;;  %v6024_v19 = vperm.slane %v2054_v46, 0 }
0x138b   :  { %4298 = vrsqrt.f32 %v3283_v61  ;;  %vm3293_vm12 = vweird.f32 %v3283_v61 }
0x138e   :  { %v3272_v59 = vpop.xlane.xlu2 %3271 }
0x138f   :  { %v3280_v49 = vmul.f32 %v3272_v59, %v4487_v34 }
0x1391   :  { %v4299_v62 = vpop.eup %4298  ;;  %v3284_v42 = vadd.f32 1e-05, %v3280_v49  ;;  %v2043_v49 = vld [vmem:[%s6225_s2 + $0x1b8] sm:$0xff] }
0x1392   :  { %v3288_v32 = vmul.f32 %v4299_v62, %v3283_v61  ;;  %vm3294_vm14 = vweird.f32 %v4299_v62  ;;  %v2045_v61 = vld [vmem:[%s6225_s2 + $0x1c8] sm:$0xff] }
0x1393   :  { %4300 = vrsqrt.f32 %v3284_v42  ;;  %vm3295_vm13 = vmor %vm3293_vm12, %vm3294_vm14  ;;  %vm3303_vm1 = vweird.f32 %v3284_v42  ;;  %3543 = vmatpush.msrb.mxu2 %v2045_v61 }
0x1394   :  { %v3289_v23 = vmul.f32 %v4299_v62, %v3288_v32 }
0x1396   :  { %v3290_v25 = vmul.f32 0.5, %v3289_v23  ;;  %v3275_v4 = vpop.xlane.xlu1 %3274 }
0x1397   :  { %v3281_v55 = vmul.f32 %v3275_v4, %v4487_v34 }
0x1398   :  { %v3291_v2 = vsub.f32 1.5, %v3290_v25  ;;  %v2041_v25 = vld [vmem:[%s6225_s2 + $0x1a8] sm:$0xff] }
0x1399   :  { %v4301_v43 = vpop.eup %4300  ;;  %v3285_v0 = vadd.f32 1e-05, %v3281_v55 }
0x139a   :  { %v3292_v7 = vmul.f32 %v4299_v62, %v3291_v2  ;;  %v3298_v11 = vmul.f32 %v4301_v43, %v3284_v42  ;;  %vm3304_vm15 = vweird.f32 %v4301_v43  ;;  %v2042_v42 = vld [vmem:[%s6225_s2 + $0x1b0] sm:$0xff]  ;;  %v2040_v2 = vld [vmem:[%s6225_s2 + $0x1a0] sm:$0xff] }
0x139b   :  { %4302 = vrsqrt.f32 %v3285_v0  ;;  %vm3305_vm2 = vmor %vm3303_vm1, %vm3304_vm15  ;;  %vm3313_vm4 = vweird.f32 %v3285_v0 }
0x139c   :  { %v3296_v27 = vsel %vm3295_vm13, %v4299_v62, %v3292_v7  ;;  %v3299_v6 = vmul.f32 %v4301_v43, %v3298_v11  ;;  %v2038_v11 = vld [vmem:[%s6225_s2 + $0x190] sm:$0xff] }
0x139d   :  { %v3327_v47 = vmul.f32 %v3296_v27, %v3259_v10 }
0x139e   :  { %v3300_v52 = vmul.f32 0.5, %v3299_v6  ;;  %v2037_v6 = vld [vmem:[%s6225_s2 + $0x188] sm:$0xff] }
0x139f   :  { %v3332_v31 = vmul.f32 %v3331_v33, %v3327_v47 }
0x13a0   :  { %v3301_v5 = vsub.f32 1.5, %v3300_v52 }
0x13a1   :  { %v4303_v36 = vpop.eup %4302  ;;  %v3337_v15 = vadd.f32 %v3336_v50, %v3332_v31 }
0x13a2   :  { %v3302_v20 = vmul.f32 %v4301_v43, %v3301_v5  ;;  %v3308_v1 = vmul.f32 %v4303_v36, %v3285_v0  ;;  %vm3314_vm3 = vweird.f32 %v4303_v36  ;;  %v2039_v0 = vld [vmem:[%s6225_s2 + $0x198] sm:$0xff]  ;;  %v2036_v5 = vld [vmem:[%s6225_s2 + $0x180] sm:$0xff] }
0x13a3   :  { %3989 = vmatmul.msk.f32.vlgmr.msra.gmra.mxu3 %vm119_vm0, %v3337_v15  ;;  %vm3315_vm5 = vmor %vm3313_vm4, %vm3314_vm3 }
0x13a4   :  { %v3306_v18 = vsel %vm3305_vm2, %v4301_v43, %v3302_v20  ;;  %v3309_v9 = vmul.f32 %v4303_v36, %v3308_v1  ;;  %v2035_v20 = vld [vmem:[%s6225_s2 + $0x178] sm:$0xff] }
0x13a5   :  { %v3328_v13 = vmul.f32 %v3306_v18, %v5977_v39 }
0x13a6   :  { %v3310_v8 = vmul.f32 0.5, %v3309_v9 }
0x13a7   :  { %v3333_v51 = vmul.f32 %v3331_v33, %v3328_v13 }
0x13a8   :  { %v3311_v56 = vsub.f32 1.5, %v3310_v8  ;;  %v2034_v8 = vld [vmem:[%s6225_s2 + $0x170] sm:$0xff] }
0x13a9   :  { %v3338_v10 = vadd.f32 %v3336_v50, %v3333_v51  ;;  %v2033_v51 = vld [vmem:[%s6225_s2 + $0x168] sm:$0xff] }
0x13aa   :  { %v3312_v37 = vmul.f32 %v4303_v36, %v3311_v56 }
0x13ab   :  { %3990 = vmatmul.msk.f32.gmra.mxu3 %vm119_vm0, %v3338_v10 }
0x13ac   :  { %v3316_v17 = vsel %vm3315_vm5, %v4303_v36, %v3312_v37  ;;  %v2032_v37 = vld [vmem:[%s6225_s2 + $0x160] sm:$0xff] }
0x13ad   :  { %v3329_v28 = vmul.f32 %v3316_v17, %v5984_v45 }
0x13af   :  { %v3334_v14 = vmul.f32 %v3331_v33, %v3329_v28 }
0x13b1   :  { %v3339_v57 = vadd.f32 %v3336_v50, %v3334_v14 }
0x13b3   :  { %3991 = vmatmul.msk.f32.gmra.mxu3 %vm119_vm0, %v3339_v57 }
0x13cd   :  { %v3278_v35 = vpop.xlane.xlu2 %3277 }
0x13ce   :  { %v3282_v39 = vmul.f32 %v3278_v35, %v4487_v34  ;;  %v2031_v35 = vld [vmem:[%s6225_s2 + $0x158] sm:$0xff] }
0x13d0   :  { %v3286_v53 = vadd.f32 1e-05, %v3282_v39 }
0x13d2   :  { %4304 = vrsqrt.f32 %v3286_v53  ;;  %vm3323_vm7 = vweird.f32 %v3286_v53 }
0x13d8   :  { %v4305_v40 = vpop.eup %4304 }
0x13d9   :  { %v3318_v22 = vmul.f32 %v4305_v40, %v3286_v53  ;;  %vm3324_vm6 = vweird.f32 %v4305_v40 }
0x13da   :  { %vm3325_vm8 = vmor %vm3323_vm7, %vm3324_vm6 }
0x13db   :  { %v3319_v38 = vmul.f32 %v4305_v40, %v3318_v22 }
0x13dd   :  { %v3320_v21 = vmul.f32 0.5, %v3319_v38  ;;  %v2030_v38 = vld [vmem:[%s6225_s2 + $0x150] sm:$0xff] }
0x13df   :  { %v3321_v12 = vsub.f32 1.5, %v3320_v21 }
0x13e1   :  { %v3322_v63 = vmul.f32 %v4305_v40, %v3321_v12 }
0x13e3   :  { %v3326_v29 = vsel %vm3325_vm8, %v4305_v40, %v3322_v63 }
0x13e4   :  { %v3330_v45 = vmul.f32 %v3326_v29, %v5991_v26  ;;  %v2044_v26 = vld [vmem:[%s6225_s2 + $0x1c0] sm:$0xff] }
0x13e5   :  { %3544 = vmatpush.msrb.mxu2 %v2044_v26 }
0x13e6   :  { %v3335_v44 = vmul.f32 %v3331_v33, %v3330_v45 }
0x13e7   :  { %3545 = vmatpush.msrb.mxu2 %v2043_v49 }
0x13e8   :  { %v3340_v60 = vadd.f32 %v3336_v50, %v3335_v44 }
0x13e9   :  { %3546 = vmatpush.msrb.mxu2 %v2042_v42 }
0x13ea   :  { %3992 = vmatmul.msk.f32.gmra.mxu3 %vm119_vm0, %v3340_v60 }
0x13eb   :  { %3547 = vmatpush.msrb.mxu2 %v2041_v25 }
0x13ed   :  { %3548 = vmatpush.msrb.mxu2 %v2040_v2 }
0x13ef   :  { %3549 = vmatpush.msrb.mxu2 %v2039_v0 }
0x13f1   :  { %3550 = vmatpush.msrb.mxu2 %v2038_v11 }
0x13f3   :  { %3551 = vmatpush.msrb.mxu2 %v2037_v6 }
0x13f5   :  { %3552 = vmatpush.msrb.mxu2 %v2036_v5 }
0x13f7   :  { %3553 = vmatpush.msrb.mxu2 %v2035_v20 }
0x13f9   :  { %3554 = vmatpush.msrb.mxu2 %v2034_v8 }
0x13fb   :  { %3555 = vmatpush.msrb.mxu2 %v2033_v51 }
0x13fd   :  { %3556 = vmatpush.msrb.mxu2 %v2032_v37 }
0x13ff   :  { %3557 = vmatpush.msrb.mxu2 %v2031_v35 }
0x1401   :  { %3558 = vmatpush.msrb.mxu2 %v2030_v38 }
0x1426   :  { %v3371_v54 = vpop.f32.mrf.mxu3 }
0x1427   :  { %v6030_v16 = vadd.f32 %v3371_v54, %v6024_v19 }
0x1429   :  { %v6036_v59 = vmul.f32 0.70710677, %v6030_v16 }
0x142b   :  { %v6042_v62 = vand.u32 2147483647, %v6036_v59  ;;  %vm3391_vm6 = vcmp.ge.f32.partialorder %v6036_v59, 0.0 }
0x142d   :  { %v3403_v32 = vmul.f32 0.3275911, %v6042_v62  ;;  %v3507_v53 = vsub.f32 0.0, %v6042_v62 }
0x142e   :  { %v3374_v23 = vpop.f32.mrf.mxu3 }
0x142f   :  { %v3407_v4 = vadd.f32 1.0, %v3403_v32  ;;  %v6052_v55 = vadd.f32 %v3374_v23, %v6024_v19  ;;  %v3511_v29 = vmul.f32 %v3507_v53, %v6042_v62 }
0x1431   :  { %4306 = vrcp.f32 %v3407_v4  ;;  %v6058_v43 = vmul.f32 0.70710677, %v6052_v55  ;;  %v3422_v1 = vand.u32 2147483648, %v3407_v4  ;;  %v3420_v13 = vand.u32 2147483647, %v3407_v4 }
0x1432   :  { %vm3416_vm10 = vweird.f32 %v3407_v4  ;;  %v3515_v42 = vmul.f32 1.442695, %v3511_v29 }
0x1433   :  { %v6064_v7 = vand.u32 2147483647, %v6058_v43  ;;  %v3423_v17 = vor.u32 1.1754944e-38, %v3422_v1  ;;  %vm3421_vm14 = vcmp.eq.f32.partialorder %v3420_v13, 8.507059e+37  ;;  %vm3392_vm7 = vcmp.ge.f32.partialorder %v6058_v43, 0.0 }
0x1435   :  { %v3404_v33 = vmul.f32 0.3275911, %v6064_v7  ;;  %v3508_v25 = vsub.f32 0.0, %v6064_v7 }
0x1436   :  { %v3377_v27 = vpop.f32.mrf.mxu3 }
0x1437   :  { %v4307_v50 = vpop.eup %4306  ;;  %v6074_v47 = vadd.f32 %v3377_v27, %v6024_v19  ;;  %v3408_v31 = vadd.f32 1.0, %v3404_v33 }
0x1438   :  { %v3412_v52 = vmul.f32 %v4307_v50, %v3407_v4  ;;  %vm3417_vm9 = vweird.f32 %v4307_v50 }
0x1439   :  { %v6080_v36 = vmul.f32 0.70710677, %v6074_v47  ;;  %4308 = vrcp.f32 %v3408_v31  ;;  %vm3418_vm11 = vmor %vm3416_vm10, %vm3417_vm9  ;;  %v3437_v63 = vand.u32 2147483648, %v3408_v31  ;;  %v3435_v44 = vand.u32 2147483647, %v3408_v31 }
0x143a   :  { %v3413_v15 = vsub.f32 1.0, %v3412_v52  ;;  %vm3431_vm13 = vweird.f32 %v3408_v31  ;;  %v3512_v52 = vmul.f32 %v3508_v25, %v6064_v7 }
0x143b   :  { %v6086_v18 = vand.u32 2147483647, %v6080_v36  ;;  %v3438_v49 = vor.u32 1.1754944e-38, %v3437_v63  ;;  %vm3436_vm1 = vcmp.eq.f32.partialorder %v3435_v44, 8.507059e+37  ;;  %v3383_v63 = vmul.f32 0.5, %v6030_v16 }
0x143c   :  { %v3414_v9 = vmul.f32 %v4307_v50, %v3413_v15  ;;  %v3384_v16 = vmul.f32 0.5, %v6052_v55  ;;  %vm3393_vm8 = vcmp.ge.f32.partialorder %v6080_v36, 0.0 }
0x143d   :  { %v3405_v56 = vmul.f32 0.3275911, %v6086_v18  ;;  %v3397_v43 = vsel %vm3393_vm8, 1.0, %v4372_v41 }
0x143e   :  { %v3415_v10 = vadd.f32 %v4307_v50, %v3414_v9  ;;  %v3509_v9 = vsub.f32 0.0, %v6086_v18 }
0x143f   :  { %v3409_v28 = vadd.f32 1.0, %v3405_v56  ;;  %v4309_v14 = vpop.eup %4308  ;;  %v3517_v56 = vmul.f32 1.442695, %v3512_v52 }
0x1440   :  { %v3419_v57 = vsel %vm3418_vm11, %v4307_v50, %v3415_v10  ;;  %v3427_v40 = vmul.f32 %v4309_v14, %v3408_v31  ;;  %vm3432_vm12 = vweird.f32 %v4309_v14 }
0x1441   :  { %v3424_v39 = vsel %vm3421_vm14, %v3423_v17, %v3419_v57  ;;  %4310 = vrcp.f32 %v3409_v28  ;;  %vm3433_vm15 = vmor %vm3431_vm13, %vm3432_vm12  ;;  %v3452_v2 = vand.u32 2147483648, %v3409_v28  ;;  %v3450_v27 = vand.u32 2147483647, %v3409_v28 }
0x1442   :  { %v3471_v22 = vmul.f32 1.0614054, %v3424_v39  ;;  %v3428_v21 = vsub.f32 1.0, %v3427_v40  ;;  %4312 = vpow2.f32 %v3515_v42  ;;  %vm3446_vm3 = vweird.f32 %v3409_v28 }
0x1443   :  { %v3453_v15 = vor.u32 1.1754944e-38, %v3452_v2  ;;  %vm3451_vm5 = vcmp.eq.f32.partialorder %v3450_v27, 8.507059e+37  ;;  %4314 = vpow2.f32 %v3517_v56  ;;  %v3395_v40 = vsel %vm3391_vm6, 1.0, %v4372_v41 }
0x1444   :  { %v3475_v12 = vadd.f32 -1.4531521, %v3471_v22  ;;  %v3429_v45 = vmul.f32 %v4309_v14, %v3428_v21 }
0x1446   :  { %v3479_v60 = vmul.f32 %v3475_v12, %v3424_v39  ;;  %v3430_v54 = vadd.f32 %v4309_v14, %v3429_v45 }
0x1447   :  { %v4311_v46 = vpop.eup %4310 }
0x1448   :  { %v3483_v61 = vadd.f32 1.4214138, %v3479_v60  ;;  %v3442_v26 = vmul.f32 %v4311_v46, %v3409_v28  ;;  %v3434_v32 = vsel %vm3433_vm15, %v4309_v14, %v3430_v54  ;;  %vm3447_vm2 = vweird.f32 %v4311_v46  ;;  %v4313_v37 = vpop.eup %4312 }
0x1449   :  { %v3439_v62 = vsel %vm3436_vm1, %v3438_v49, %v3434_v32  ;;  %vm3448_vm4 = vmor %vm3446_vm3, %vm3447_vm2  ;;  %v3513_v14 = vmul.f32 %v3509_v9, %v6086_v18  ;;  %v4315_v44 = vpop.eup %4314 }
0x144a   :  { %v3487_v23 = vmul.f32 %v3483_v61, %v3424_v39  ;;  %v3443_v4 = vsub.f32 1.0, %v3442_v26  ;;  %v3472_v0 = vmul.f32 1.0614054, %v3439_v62  ;;  %v3396_v26 = vsel %vm3392_vm7, 1.0, %v4372_v41 }
0x144c   :  { %v3491_v11 = vadd.f32 -0.28449672, %v3487_v23  ;;  %v3444_v33 = vmul.f32 %v4311_v46, %v3443_v4  ;;  %v3476_v6 = vadd.f32 -1.4531521, %v3472_v0 }
0x144e   :  { %v3495_v50 = vmul.f32 %v3491_v11, %v3424_v39  ;;  %v3445_v31 = vadd.f32 %v4311_v46, %v3444_v33  ;;  %v3480_v5 = vmul.f32 %v3476_v6, %v3439_v62  ;;  %v3385_v11 = vmul.f32 0.5, %v6074_v47 }
0x1450   :  { %v3499_v20 = vadd.f32 0.2548296, %v3495_v50  ;;  %v3449_v1 = vsel %vm3448_vm4, %v4311_v46, %v3445_v31  ;;  %v3484_v13 = vadd.f32 1.4214138, %v3480_v5 }
0x1451   :  { %v3454_v8 = vsel %vm3451_vm5, %v3453_v15, %v3449_v1 }
0x1452   :  { %v3503_v51 = vmul.f32 %v3499_v20, %v3424_v39  ;;  %v3473_v10 = vmul.f32 1.0614054, %v3454_v8  ;;  %v3488_v17 = vmul.f32 %v3484_v13, %v3439_v62  ;;  %v3519_v39 = vmul.f32 1.442695, %v3513_v14 }
0x1454   :  { %v3523_v7 = vmul.f32 %v4313_v37, %v3503_v51  ;;  %v3477_v28 = vadd.f32 -1.4531521, %v3473_v10  ;;  %v3492_v57 = vadd.f32 -0.28449672, %v3488_v17  ;;  %4316 = vpow2.f32 %v3519_v39 }
0x1456   :  { %v3527_v35 = vsub.f32 1.0, %v3523_v7  ;;  %v3481_v53 = vmul.f32 %v3477_v28, %v3454_v8  ;;  %v3496_v22 = vmul.f32 %v3492_v57, %v3439_v62 }
0x1458   :  { %v3531_v38 = vmul.f32 %v3527_v35, %v3395_v40  ;;  %v3485_v21 = vadd.f32 1.4214138, %v3481_v53  ;;  %v3500_v12 = vadd.f32 0.2548296, %v3496_v22 }
0x145a   :  { %v3535_v29 = vadd.f32 1.0, %v3531_v38  ;;  %v3489_v45 = vmul.f32 %v3485_v21, %v3454_v8  ;;  %v3504_v59 = vmul.f32 %v3500_v12, %v3439_v62  ;;  %v4317_v23 = vpop.eup %4316 }
0x145c   :  { %v3539_v60 = vmul.f32 %v3535_v29, %v3383_v63  ;;  %v3493_v46 = vadd.f32 -0.28449672, %v3489_v45  ;;  %v3524_v18 = vmul.f32 %v4315_v44, %v3504_v59  ;;  %v3576_v44 = vperm.slane %v5946_v58, 5 }
0x145e   :  { %3559 = vmatmul.f32.vlgmr.msrb.gmra.mxu2 %v3539_v60  ;;  %v3497_v54 = vmul.f32 %v3493_v46, %v3454_v8  ;;  %v3528_v61 = vsub.f32 1.0, %v3524_v18 }
0x1460   :  { %v3501_v49 = vadd.f32 0.2548296, %v3497_v54  ;;  %v3532_v42 = vmul.f32 %v3528_v61, %v3396_v26 }
0x1462   :  { %v3505_v32 = vmul.f32 %v3501_v49, %v3454_v8  ;;  %v3536_v25 = vadd.f32 1.0, %v3532_v42 }
0x1464   :  { %v3525_v4 = vmul.f32 %v4317_v23, %v3505_v32  ;;  %v3540_v62 = vmul.f32 %v3536_v25, %v3384_v16 }
0x1466   :  { %v3529_v2 = vsub.f32 1.0, %v3525_v4  ;;  %3562 = vmatmul.f32.gmra.mxu2 %v3540_v62 }
0x1468   :  { %v3533_v0 = vmul.f32 %v3529_v2, %v3397_v43 }
0x146a   :  { %v3537_v33 = vadd.f32 1.0, %v3533_v0 }
0x146c   :  { %v3541_v27 = vmul.f32 %v3537_v33, %v3385_v11 }
0x146d   :  { %v3380_v6 = vpop.f32.mrf.mxu3 }
0x146e   :  { %v3381_v50 = vadd.f32 %v3380_v6, %v6024_v19  ;;  %3565 = vmatmul.f32.gmra.mxu2 %v3541_v27 }
0x1470   :  { %v3390_v52 = vmul.f32 0.70710677, %v3381_v50  ;;  %v3386_v29 = vmul.f32 0.5, %v3381_v50 }
0x1472   :  { %v3402_v55 = vand.u32 2147483647, %v3390_v52  ;;  %vm3394_vm12 = vcmp.ge.f32.partialorder %v3390_v52, 0.0 }
0x1473   :  { %v3398_v12 = vsel %vm3394_vm12, 1.0, %v4372_v41 }
0x1474   :  { %v3406_v31 = vmul.f32 0.3275911, %v3402_v55  ;;  %v3510_v19 = vsub.f32 0.0, %v3402_v55 }
0x1476   :  { %v3410_v5 = vadd.f32 1.0, %v3406_v31  ;;  %v3514_v17 = vmul.f32 %v3510_v19, %v3402_v55 }
0x1478   :  { %4318 = vrcp.f32 %v3410_v5  ;;  %v3467_v1 = vand.u32 2147483648, %v3410_v5  ;;  %v3465_v13 = vand.u32 2147483647, %v3410_v5  ;;  %vm3461_vm10 = vweird.f32 %v3410_v5 }
0x1479   :  { %v3521_v14 = vmul.f32 1.442695, %v3514_v17 }
0x147a   :  { %v3468_v8 = vor.u32 1.1754944e-38, %v3467_v1  ;;  %vm3466_vm14 = vcmp.eq.f32.partialorder %v3465_v13, 8.507059e+37 }
0x147b   :  { %4320 = vpow2.f32 %v3521_v14 }
0x147e   :  { %v4319_v36 = vpop.eup %4318 }
0x147f   :  { %v3457_v15 = vmul.f32 %v4319_v36, %v3410_v5  ;;  %vm3462_vm9 = vweird.f32 %v4319_v36 }
0x1480   :  { %vm3463_vm11 = vmor %vm3461_vm10, %vm3462_vm9 }
0x1481   :  { %v3458_v20 = vsub.f32 1.0, %v3457_v15  ;;  %v4321_v38 = vpop.eup %4320 }
0x1483   :  { %v3459_v9 = vmul.f32 %v4319_v36, %v3458_v20 }
0x1485   :  { %v3460_v47 = vadd.f32 %v4319_v36, %v3459_v9 }
0x1487   :  { %v3464_v51 = vsel %vm3463_vm11, %v4319_v36, %v3460_v47 }
0x1488   :  { %v3469_v56 = vsel %vm3466_vm14, %v3468_v8, %v3464_v51 }
0x1489   :  { %v3474_v10 = vmul.f32 1.0614054, %v3469_v56 }
0x148b   :  { %v3478_v37 = vadd.f32 -1.4531521, %v3474_v10 }
0x148d   :  { %v3482_v7 = vmul.f32 %v3478_v37, %v3469_v56 }
0x148f   :  { %v3486_v28 = vadd.f32 1.4214138, %v3482_v7 }
0x1491   :  { %v3490_v57 = vmul.f32 %v3486_v28, %v3469_v56 }
0x1493   :  { %v3494_v35 = vadd.f32 -0.28449672, %v3490_v57  ;;  %v6152_v57 = vld [vmem:[%s6225_s2 + $0x1d0] sm:$0xff] }
0x1495   :  { %v3498_v53 = vmul.f32 %v3494_v35, %v3469_v56 }
0x1497   :  { %v3502_v40 = vadd.f32 0.2548296, %v3498_v53 }
0x1499   :  { %v3506_v22 = vmul.f32 %v3502_v40, %v3469_v56 }
0x149b   :  { %v3526_v21 = vmul.f32 %v4321_v38, %v3506_v22  ;;  %v3675_v38 = vperm.slane %v6152_v57, 0 }
0x149d   :  { %v3530_v39 = vsub.f32 1.0, %v3526_v21 }
0x149f   :  { %v3534_v63 = vmul.f32 %v3530_v39, %v3398_v12 }
0x14a1   :  { %v3538_v45 = vadd.f32 1.0, %v3534_v63  ;;  %v3680_v63 = vperm.slane %v6152_v57, 1 }
0x14a3   :  { %v3542_v59 = vmul.f32 %v3538_v45, %v3386_v29 }
0x14a5   :  { %3568 = vmatmul.f32.gmra.mxu2 %v3542_v59 }
0x14e1   :  { %v3560_v60 = vpop.f32.mrf.mxu2 }
0x14e2   :  { %v3572_v46 = vadd.f32 %v3560_v60, %v5951_v3 }
0x14e4   :  { %v3577_v18 = vadd.f32 %v3576_v44, %v3572_v46 }
0x14e6   :  { %v3587_v54 = vsel %vm119_vm0, %v3577_v18, 0.0 }
0x14e7   :  { %3588 = vadd.xlane.f32.xlu1 %v3587_v54 }
0x14e9   :  { %v3563_v61 = vpop.f32.mrf.mxu2 }
0x14ea   :  { %v3573_v26 = vadd.f32 %v3563_v61, %v5957_v30 }
0x14ec   :  { %v3578_v49 = vadd.f32 %v3576_v44, %v3573_v26 }
0x14ee   :  { %v3590_v41 = vsel %vm119_vm0, %v3578_v49, 0.0 }
0x14ef   :  { %3591 = vadd.xlane.f32.xlu2 %v3590_v41 }
0x14f1   :  { %v3566_v42 = vpop.f32.mrf.mxu2 }
0x14f2   :  { %v3574_v32 = vadd.f32 %v3566_v42, %v5962_v24 }
0x14f4   :  { %v3579_v23 = vadd.f32 %v3576_v44, %v3574_v32 }
0x14f6   :  { %v3593_v58 = vsel %vm119_vm0, %v3579_v23, 0.0 }
0x14f7   :  { %3594 = vadd.xlane.f32.xlu0 %v3593_v58 }
0x1528   :  { %v3569_v16 = vpop.f32.mrf.mxu2 }
0x1529   :  { %v3575_v3 = vadd.f32 %v3569_v16, %v5968_v48 }
0x152b   :  { %v3580_v25 = vadd.f32 %v3576_v44, %v3575_v3 }
0x152d   :  { %v3596_v4 = vsel %vm119_vm0, %v3580_v25, 0.0 }
0x152e   :  { %3597 = vadd.xlane.f32.xlu1 %v3596_v4 }
0x155a   :  { %v3589_v62 = vpop.xlane.xlu1 %3588 }
0x155b   :  { %v3599_v30 = vmul.f32 %v3589_v62, %v4487_v34 }
0x155d   :  { %v3603_v2 = vsub.f32 %v3577_v18, %v3599_v30 }
0x155f   :  { %v3607_v43 = vmul.f32 %v3603_v2, %v3603_v2 }
0x1561   :  { %v3611_v0 = vsel %vm119_vm0, %v3607_v43, 0.0 }
0x1562   :  { %3612 = vadd.xlane.f32.xlu2 %v3611_v0  ;;  %v3592_v24 = vpop.xlane.xlu2 %3591 }
0x1563   :  { %v3600_v11 = vmul.f32 %v3592_v24, %v4487_v34 }
0x1565   :  { %v3604_v33 = vsub.f32 %v3578_v49, %v3600_v11 }
0x1567   :  { %v3608_v27 = vmul.f32 %v3604_v33, %v3604_v33 }
0x1569   :  { %v3614_v6 = vsel %vm119_vm0, %v3608_v27, 0.0 }
0x156a   :  { %3615 = vadd.xlane.f32.xlu0 %v3614_v6  ;;  %v3595_v48 = vpop.xlane.xlu0 %3594 }
0x156b   :  { %v3601_v50 = vmul.f32 %v3595_v48, %v4487_v34 }
0x156d   :  { %v6135_v52 = vsub.f32 %v3579_v23, %v3601_v50 }
0x156f   :  { %v3609_v55 = vmul.f32 %v6135_v52, %v6135_v52 }
0x1571   :  { %v3617_v31 = vsel %vm119_vm0, %v3609_v55, 0.0 }
0x1572   :  { %3618 = vadd.xlane.f32.xlu1 %v3617_v31 }
0x15a1   :  { %v3598_v5 = vpop.xlane.xlu1 %3597 }
0x15a2   :  { %v3602_v36 = vmul.f32 %v3598_v5, %v4487_v34 }
0x15a4   :  { %v6141_v15 = vsub.f32 %v3580_v25, %v3602_v36 }
0x15a6   :  { %v3610_v20 = vmul.f32 %v6141_v15, %v6141_v15 }
0x15a8   :  { %v3620_v1 = vsel %vm119_vm0, %v3610_v20, 0.0 }
0x15a9   :  { %3621 = vadd.xlane.f32.xlu2 %v3620_v1 }
0x15d5   :  { %v3613_v9 = vpop.xlane.xlu2 %3612 }
0x15d6   :  { %v3623_v13 = vmul.f32 %v3613_v9, %v4487_v34 }
0x15d8   :  { %v3627_v47 = vadd.f32 1e-05, %v3623_v13 }
0x15da   :  { %4322 = vrsqrt.f32 %v3627_v47  ;;  %vm3637_vm15 = vweird.f32 %v3627_v47 }
0x15dd   :  { %v3616_v8 = vpop.xlane.xlu0 %3615 }
0x15de   :  { %v3624_v51 = vmul.f32 %v3616_v8, %v4487_v34 }
0x15e0   :  { %v4323_v19 = vpop.eup %4322  ;;  %v3628_v10 = vadd.f32 1e-05, %v3624_v51 }
0x15e1   :  { %v3632_v56 = vmul.f32 %v4323_v19, %v3627_v47  ;;  %vm3638_vm13 = vweird.f32 %v4323_v19 }
0x15e2   :  { %4324 = vrsqrt.f32 %v3628_v10  ;;  %vm3639_vm1 = vmor %vm3637_vm15, %vm3638_vm13  ;;  %vm3647_vm3 = vweird.f32 %v3628_v10 }
0x15e3   :  { %v3633_v37 = vmul.f32 %v4323_v19, %v3632_v56 }
0x15e5   :  { %v3634_v17 = vmul.f32 0.5, %v3633_v37  ;;  %v3619_v7 = vpop.xlane.xlu1 %3618 }
0x15e6   :  { %v3625_v14 = vmul.f32 %v3619_v7, %v4487_v34 }
0x15e7   :  { %v3635_v28 = vsub.f32 1.5, %v3634_v17 }
0x15e8   :  { %v4325_v35 = vpop.eup %4324  ;;  %v3629_v40 = vadd.f32 1e-05, %v3625_v14 }
0x15e9   :  { %v3636_v53 = vmul.f32 %v4323_v19, %v3635_v28  ;;  %v3642_v22 = vmul.f32 %v4325_v35, %v3628_v10  ;;  %vm3648_vm2 = vweird.f32 %v4325_v35 }
0x15ea   :  { %4326 = vrsqrt.f32 %v3629_v40  ;;  %vm3649_vm4 = vmor %vm3647_vm3, %vm3648_vm2  ;;  %vm3657_vm6 = vweird.f32 %v3629_v40 }
0x15eb   :  { %v3640_v21 = vsel %vm3639_vm1, %v4323_v19, %v3636_v53  ;;  %v3643_v39 = vmul.f32 %v4325_v35, %v3642_v22  ;;  %v3585_v22 = vld [vmem:[%s6226_s3 + $0xa8] sm:$0xff] }
0x15ec   :  { %v3671_v12 = vmul.f32 %v3640_v21, %v3603_v2  ;;  %3808 = vmatpush.msrb.mxu0 %v3585_v22 }
0x15ed   :  { %v3644_v29 = vmul.f32 0.5, %v3643_v39 }
0x15ee   :  { %v3676_v45 = vmul.f32 %v3675_v38, %v3671_v12  ;;  %v3583_v12 = vld [vmem:[%s6226_s3 + $0x98] sm:$0xff] }
0x15ef   :  { %v3645_v59 = vsub.f32 1.5, %v3644_v29  ;;  %v3582_v29 = vld [vmem:[%s6226_s3 + $0x90] sm:$0xff] }
0x15f0   :  { %v3681_v44 = vadd.f32 %v3680_v63, %v3676_v45  ;;  %v4327_v60 = vpop.eup %4326 }
0x15f1   :  { %v3646_v46 = vmul.f32 %v4325_v35, %v3645_v59  ;;  %v3652_v18 = vmul.f32 %v4327_v60, %v3629_v40  ;;  %vm3658_vm5 = vweird.f32 %v4327_v60 }
0x15f2   :  { %v3685_v54 = vsel %vm119_vm0, %v3681_v44, 0.0  ;;  %vm3659_vm7 = vmor %vm3657_vm6, %vm3658_vm5 }
0x15f3   :  { %3686 = vadd.xlane.f32.xlu0 %v3685_v54  ;;  %v3653_v61 = vmul.f32 %v4327_v60, %v3652_v18  ;;  %v3650_v26 = vsel %vm3649_vm4, %v4325_v35, %v3646_v46 }
0x15f4   :  { %v3672_v49 = vmul.f32 %v3650_v26, %v3604_v33 }
0x15f5   :  { %v3654_v41 = vmul.f32 0.5, %v3653_v61 }
0x15f6   :  { %v3677_v42 = vmul.f32 %v3675_v38, %v3672_v49 }
0x15f7   :  { %v3655_v32 = vsub.f32 1.5, %v3654_v41 }
0x15f8   :  { %v3682_v23 = vadd.f32 %v3680_v63, %v3677_v42 }
0x15f9   :  { %v3656_v58 = vmul.f32 %v4327_v60, %v3655_v32 }
0x15fa   :  { %v3688_v16 = vsel %vm119_vm0, %v3682_v23, 0.0 }
0x15fb   :  { %3689 = vadd.xlane.f32.xlu1 %v3688_v16  ;;  %v3660_v3 = vsel %vm3659_vm7, %v4327_v60, %v3656_v58 }
0x15fc   :  { %v3673_v25 = vmul.f32 %v3660_v3, %v6135_v52  ;;  %v3778_v3 = vperm.slane %v6152_v57, 3 }
0x15fe   :  { %v3678_v4 = vmul.f32 %v3675_v38, %v3673_v25 }
0x1600   :  { %v3683_v62 = vadd.f32 %v3680_v63, %v3678_v4 }
0x1602   :  { %v3691_v30 = vsel %vm119_vm0, %v3683_v62, 0.0 }
0x1603   :  { %3692 = vadd.xlane.f32.xlu2 %v3691_v30 }
0x161c   :  { %v3622_v2 = vpop.xlane.xlu2 %3621 }
0x161d   :  { %v3626_v43 = vmul.f32 %v3622_v2, %v4487_v34 }
0x161f   :  { %v3630_v0 = vadd.f32 1e-05, %v3626_v43 }
0x1621   :  { %4328 = vrsqrt.f32 %v3630_v0  ;;  %vm3667_vm9 = vweird.f32 %v3630_v0 }
0x1627   :  { %v4329_v24 = vpop.eup %4328 }
0x1628   :  { %v3662_v11 = vmul.f32 %v4329_v24, %v3630_v0  ;;  %vm3668_vm8 = vweird.f32 %v4329_v24 }
0x1629   :  { %vm3669_vm10 = vmor %vm3667_vm9, %vm3668_vm8 }
0x162a   :  { %v3663_v33 = vmul.f32 %v4329_v24, %v3662_v11 }
0x162c   :  { %v3664_v27 = vmul.f32 0.5, %v3663_v33 }
0x162e   :  { %v3665_v6 = vsub.f32 1.5, %v3664_v27 }
0x1630   :  { %v3666_v48 = vmul.f32 %v4329_v24, %v3665_v6 }
0x1632   :  { %v3670_v50 = vsel %vm3669_vm10, %v4329_v24, %v3666_v48 }
0x1633   :  { %v3674_v52 = vmul.f32 %v3670_v50, %v6141_v15 }
0x1635   :  { %v3679_v55 = vmul.f32 %v3675_v38, %v3674_v52  ;;  %v3584_v38 = vld [vmem:[%s6226_s3 + $0xa0] sm:$0xff] }
0x1636   :  { %3809 = vmatpush.msrb.mxu0 %v3584_v38 }
0x1637   :  { %v3684_v31 = vadd.f32 %v3680_v63, %v3679_v55 }
0x1638   :  { %3810 = vmatpush.msrb.mxu0 %v3583_v12 }
0x1639   :  { %v3694_v5 = vsel %vm119_vm0, %v3684_v31, 0.0 }
0x163a   :  { %3695 = vadd.xlane.f32.xlu0 %v3694_v5  ;;  %3811 = vmatpush.msrb.mxu0 %v3582_v29 }
0x1666   :  { %v3687_v36 = vpop.xlane.xlu0 %3686 }
0x1667   :  { %v3697_v20 = vmul.f32 %v3687_v36, %v4487_v34 }
0x1669   :  { %v3701_v1 = vsub.f32 %v3681_v44, %v3697_v20 }
0x166b   :  { %v3705_v9 = vmul.f32 %v3701_v1, %v3701_v1 }
0x166d   :  { %v3709_v13 = vsel %vm119_vm0, %v3705_v9, 0.0 }
0x166e   :  { %3710 = vadd.xlane.f32.xlu1 %v3709_v13  ;;  %v3690_v47 = vpop.xlane.xlu1 %3689 }
0x166f   :  { %v3698_v8 = vmul.f32 %v3690_v47, %v4487_v34 }
0x1671   :  { %v6166_v51 = vsub.f32 %v3682_v23, %v3698_v8  ;;  %v3773_v23 = vperm.slane %v6152_v57, 2 }
0x1673   :  { %v3706_v15 = vmul.f32 %v6166_v51, %v6166_v51 }
0x1675   :  { %v3712_v19 = vsel %vm119_vm0, %v3706_v15, 0.0 }
0x1676   :  { %v3693_v56 = vpop.xlane.xlu2 %3692  ;;  %3713 = vadd.xlane.f32.xlu2 %v3712_v19 }
0x1677   :  { %v3699_v10 = vmul.f32 %v3693_v56, %v4487_v34 }
0x1679   :  { %v6172_v37 = vsub.f32 %v3683_v62, %v3699_v10 }
0x167b   :  { %v3707_v17 = vmul.f32 %v6172_v37, %v6172_v37 }
0x167d   :  { %v3715_v7 = vsel %vm119_vm0, %v3707_v17, 0.0 }
0x167e   :  { %3716 = vadd.xlane.f32.xlu0 %v3715_v7 }
0x16ad   :  { %v3696_v28 = vpop.xlane.xlu0 %3695 }
0x16ae   :  { %v3700_v14 = vmul.f32 %v3696_v28, %v4487_v34 }
0x16b0   :  { %v6178_v35 = vsub.f32 %v3684_v31, %v3700_v14 }
0x16b2   :  { %v3708_v53 = vmul.f32 %v6178_v35, %v6178_v35 }
0x16b4   :  { %v3718_v40 = vsel %vm119_vm0, %v3708_v53, 0.0 }
0x16b5   :  { %3719 = vadd.xlane.f32.xlu1 %v3718_v40 }
0x16e1   :  { %v3711_v21 = vpop.xlane.xlu1 %3710 }
0x16e2   :  { %v3721_v39 = vmul.f32 %v3711_v21, %v4487_v34 }
0x16e4   :  { %v3725_v63 = vadd.f32 1e-05, %v3721_v39 }
0x16e6   :  { %4330 = vrsqrt.f32 %v3725_v63  ;;  %vm3735_vm14 = vweird.f32 %v3725_v63 }
0x16e9   :  { %v3714_v45 = vpop.xlane.xlu2 %3713 }
0x16ea   :  { %v3722_v59 = vmul.f32 %v3714_v45, %v4487_v34 }
0x16ec   :  { %v4331_v44 = vpop.eup %4330  ;;  %v3726_v46 = vadd.f32 1e-05, %v3722_v59 }
0x16ed   :  { %v3730_v60 = vmul.f32 %v4331_v44, %v3725_v63  ;;  %vm3736_vm11 = vweird.f32 %v4331_v44 }
0x16ee   :  { %4332 = vrsqrt.f32 %v3726_v46  ;;  %vm3737_vm12 = vmor %vm3735_vm14, %vm3736_vm11  ;;  %vm3745_vm15 = vweird.f32 %v3726_v46 }
0x16ef   :  { %v3731_v18 = vmul.f32 %v4331_v44, %v3730_v60 }
0x16f1   :  { %v3732_v54 = vmul.f32 0.5, %v3731_v18  ;;  %v3717_v61 = vpop.xlane.xlu0 %3716 }
0x16f2   :  { %v3723_v49 = vmul.f32 %v3717_v61, %v4487_v34 }
0x16f3   :  { %v3733_v26 = vsub.f32 1.5, %v3732_v54 }
0x16f4   :  { %v4333_v41 = vpop.eup %4332  ;;  %v3727_v32 = vadd.f32 1e-05, %v3723_v49 }
0x16f5   :  { %v3734_v42 = vmul.f32 %v4331_v44, %v3733_v26  ;;  %v3740_v58 = vmul.f32 %v4333_v41, %v3726_v46  ;;  %vm3746_vm13 = vweird.f32 %v4333_v41 }
0x16f6   :  { %4334 = vrsqrt.f32 %v3727_v32  ;;  %vm3747_vm1 = vmor %vm3745_vm15, %vm3746_vm13  ;;  %vm3755_vm3 = vweird.f32 %v3727_v32 }
0x16f7   :  { %v3738_v16 = vsel %vm3737_vm12, %v4331_v44, %v3734_v42  ;;  %v3741_v4 = vmul.f32 %v4333_v41, %v3740_v58 }
0x16f8   :  { %v3769_v25 = vmul.f32 %v3738_v16, %v3701_v1 }
0x16f9   :  { %v3742_v30 = vmul.f32 0.5, %v3741_v4 }
0x16fa   :  { %v3774_v62 = vmul.f32 %v3773_v23, %v3769_v25 }
0x16fb   :  { %v3743_v43 = vsub.f32 1.5, %v3742_v30 }
0x16fc   :  { %v3779_v2 = vadd.f32 %v3778_v3, %v3774_v62  ;;  %v4335_v0 = vpop.eup %4334 }
0x16fd   :  { %v3744_v24 = vmul.f32 %v4333_v41, %v3743_v43  ;;  %v3750_v11 = vmul.f32 %v4335_v0, %v3727_v32  ;;  %vm3756_vm2 = vweird.f32 %v4335_v0 }
0x16fe   :  { %3993 = vmatmul.msk.f32.vlgmr.msrb.gmra.mxu0 %vm119_vm0, %v3779_v2  ;;  %vm3757_vm4 = vmor %vm3755_vm3, %vm3756_vm2 }
0x16ff   :  { %v3748_v33 = vsel %vm3747_vm1, %v4333_v41, %v3744_v24  ;;  %v3751_v27 = vmul.f32 %v4335_v0, %v3750_v11 }
0x1700   :  { %v3770_v6 = vmul.f32 %v3748_v33, %v6166_v51 }
0x1701   :  { %v3752_v48 = vmul.f32 0.5, %v3751_v27 }
0x1702   :  { %v3775_v57 = vmul.f32 %v3773_v23, %v3770_v6 }
0x1703   :  { %v3753_v50 = vsub.f32 1.5, %v3752_v48 }
0x1704   :  { %v3780_v52 = vadd.f32 %v3778_v3, %v3775_v57 }
0x1705   :  { %v3754_v55 = vmul.f32 %v4335_v0, %v3753_v50 }
0x1706   :  { %3994 = vmatmul.msk.f32.gmra.mxu0 %vm119_vm0, %v3780_v52 }
0x1707   :  { %v3758_v31 = vsel %vm3757_vm4, %v4335_v0, %v3754_v55 }
0x1708   :  { %v3771_v5 = vmul.f32 %v3758_v31, %v6172_v37 }
0x170a   :  { %v3776_v36 = vmul.f32 %v3773_v23, %v3771_v5 }
0x170c   :  { %v3781_v20 = vadd.f32 %v3778_v3, %v3776_v36 }
0x170e   :  { %3995 = vmatmul.msk.f32.gmra.mxu0 %vm119_vm0, %v3781_v20 }
0x1728   :  { %v3720_v1 = vpop.xlane.xlu1 %3719 }
0x1729   :  { %v3724_v9 = vmul.f32 %v3720_v1, %v4487_v34  ;;  %v3586_v34 = vld [vmem:[%s6226_s3 + $0xb0] sm:$0xff] }
0x172a   :  { %v3783_v28 = vperm.slane %v3586_v34, 0 }
0x172b   :  { %v3728_v13 = vadd.f32 1e-05, %v3724_v9 }
0x172d   :  { %4336 = vrsqrt.f32 %v3728_v13  ;;  %vm3765_vm6 = vweird.f32 %v3728_v13 }
0x1733   :  { %v4337_v47 = vpop.eup %4336 }
0x1734   :  { %v3760_v8 = vmul.f32 %v4337_v47, %v3728_v13  ;;  %vm3766_vm5 = vweird.f32 %v4337_v47 }
0x1735   :  { %vm3767_vm7 = vmor %vm3765_vm6, %vm3766_vm5 }
0x1736   :  { %v3761_v51 = vmul.f32 %v4337_v47, %v3760_v8 }
0x1738   :  { %v3762_v15 = vmul.f32 0.5, %v3761_v51 }
0x173a   :  { %v3763_v19 = vsub.f32 1.5, %v3762_v15 }
0x173c   :  { %v3764_v56 = vmul.f32 %v4337_v47, %v3763_v19 }
0x173e   :  { %v3768_v10 = vsel %vm3767_vm7, %v4337_v47, %v3764_v56 }
0x173f   :  { %v3772_v37 = vmul.f32 %v3768_v10, %v6178_v35 }
0x1741   :  { %v3777_v17 = vmul.f32 %v3773_v23, %v3772_v37 }
0x1743   :  { %v3782_v7 = vadd.f32 %v3778_v3, %v3777_v17 }
0x1745   :  { %3996 = vmatmul.msk.f32.gmra.mxu0 %vm119_vm0, %v3782_v7 }
0x177b   :  { %v3813_v14 = vpop.f32.mrf.mxu0 }
0x177c   :  { %v3814_v53 = vadd.f32 %v3813_v14, %v3783_v28 }
0x177e   :  { %3825 = vst [vmem:[%s6229_s6] sm:$0xff] %v3814_v53 }
0x1783   :  { %v3816_v40 = vpop.f32.mrf.mxu0 }
0x1784   :  { %v3817_v22 = vadd.f32 %v3816_v40, %v3783_v28 }
0x1786   :  { %3826 = vst [vmem:[%s6229_s6 + $0x8] sm:$0xff] %v3817_v22 }
0x178b   :  { %v3819_v35 = vpop.f32.mrf.mxu0 }
0x178c   :  { %v3820_v38 = vadd.f32 %v3819_v35, %v3783_v28 }
0x178e   :  { %3827 = vst [vmem:[%s6229_s6 + $0x10] sm:$0xff] %v3820_v38 }
0x17c2   :  { %v3822_v21 = vpop.f32.mrf.mxu0 }
0x17c3   :  { %v3823_v39 = vadd.f32 %v3822_v21, %v3783_v28 }
0x17c5   :  { %3828 = vst [vmem:[%s6229_s6 + $0x18] sm:$0xff] %v3823_v39 }
0x17c6   :  { %3833 = vsyncpa [#allocation3], 1 }

</bundles_post_ra>
